<compile_context>
chip_gen: v5e
topology: v5e:2x2
jax: 0.10.0
libtpu: 0.0.40
codegen_flags: <defaults>
</compile_context>

<pallas_src>
import functools

import jax
import jax.numpy as jnp
from jax.experimental import pallas as pl
from jax.experimental.pallas import tpu as pltpu

_EPS = 1e-5
_TM_CAP = 256  # row-tile cap; keeps double-buffered tiles small on all VMEM sizes


# ----------------------------------------------------------------------------
# Pallas kernels
# ----------------------------------------------------------------------------
def matmul_stats_kernel(x_ref, w_ref, y_ref, stats_ref):
    """Conv tile as one matmul: y = x @ w (pre-BN) + per-tile channel sum/sumsq.

    x_ref:     (TM, K)       K = KH*KW*Cin (im2col columns)
    w_ref:     (K, Cout)
    y_ref:     (TM, Cout)    pre-BatchNorm conv output tile
    stats_ref: (1, 2, Cout)  row 0 = sum, row 1 = sum of squares (this tile)
    """
    acc = jnp.dot(x_ref[...], w_ref[...], preferred_element_type=jnp.float32)
    y_ref[...] = acc
    s = jnp.sum(acc, axis=0, keepdims=True)
    ss = jnp.sum(acc * acc, axis=0, keepdims=True)
    stats_ref[...] = jnp.concatenate([s, ss], axis=0)[None]


def pool_matmul_stats_kernel(x_ref, w_ref, y_ref, stats_ref, *, n_taps):
    """3x3/s1/p1 max-pool (max over taps) + 1x1 conv + per-tile stats.

    x_ref:     (T, TM, Cin)  T = 9 shifted views of the -inf padded input
    w_ref:     (Cin, Cout)
    y_ref:     (TM, Cout)
    stats_ref: (1, 2, Cout)
    """
    pooled = x_ref[0]
    for t in range(1, n_taps):
        pooled = jnp.maximum(pooled, x_ref[t])
    acc = jnp.dot(pooled, w_ref[...], preferred_element_type=jnp.float32)
    y_ref[...] = acc
    s = jnp.sum(acc, axis=0, keepdims=True)
    ss = jnp.sum(acc * acc, axis=0, keepdims=True)
    stats_ref[...] = jnp.concatenate([s, ss], axis=0)[None]


def bn_apply_relu_kernel(y_ref, scale_ref, shift_ref, o_ref):
    """Folded BatchNorm affine + ReLU: o = max(y * scale + shift, 0)."""
    o_ref[...] = jnp.maximum(y_ref[...] * scale_ref[...] + shift_ref[...], 0.0)


def bn_apply_relu_concat_kernel(y1_ref, y2_ref, y3_ref, y4_ref,
                                scale_ref, shift_ref, o_ref):
    """Apply folded BN + ReLU to the four branch tiles and concat on channels."""
    y = jnp.concatenate(
        [y1_ref[...], y2_ref[...], y3_ref[...], y4_ref[...]], axis=-1)
    o_ref[...] = jnp.maximum(y * scale_ref[...] + shift_ref[...], 0.0)


# ----------------------------------------------------------------------------
# pallas_call wrappers (tiled over M, "parallel" grid axis)
# ----------------------------------------------------------------------------
def _pick_tm(m, cap=_TM_CAP):
    if m <= cap:
        return m
    for tm in range(cap - cap % 8, 7, -8):
        if m % tm == 0:
            return tm
    return m


def _conv_stats(x2d, w2d):
    """Tiled (M, K) @ (K, Cout) matmul + per-tile BN-stat partials."""
    m, k = x2d.shape
    cout = w2d.shape[1]
    tm = _pick_tm(m)
    grid = (m // tm,)
    y, stats = pl.pallas_call(
        matmul_stats_kernel,
        out_shape=(jax.ShapeDtypeStruct((m, cout), jnp.float32),
                   jax.ShapeDtypeStruct((grid[0], 2, cout), jnp.float32)),
        grid=grid,
        in_specs=[pl.BlockSpec((tm, k), lambda i: (i, 0)),
                  pl.BlockSpec((k, cout), lambda i: (0, 0))],
        out_specs=(pl.BlockSpec((tm, cout), lambda i: (i, 0)),
                   pl.BlockSpec((1, 2, cout), lambda i: (i, 0, 0))),
        compiler_params=pltpu.CompilerParams(
            dimension_semantics=("parallel",)),
    )(x2d, w2d)
    return y, jnp.sum(stats, axis=0)  # (2, Cout): global sum / sumsq


def _pool_conv_stats(x_taps, w2d):
    """Tiled 3x3 max-pool + 1x1 conv + per-tile BN-stat partials."""
    t, m, cin = x_taps.shape
    cout = w2d.shape[1]
    tm = _pick_tm(m)
    grid = (m // tm,)
    kernel = functools.partial(pool_matmul_stats_kernel, n_taps=t)
    y, stats = pl.pallas_call(
        kernel,
        out_shape=(jax.ShapeDtypeStruct((m, cout), jnp.float32),
                   jax.ShapeDtypeStruct((grid[0], 2, cout), jnp.float32)),
        grid=grid,
        in_specs=[pl.BlockSpec((t, tm, cin), lambda i: (0, i, 0)),
                  pl.BlockSpec((cin, cout), lambda i: (0, 0))],
        out_specs=(pl.BlockSpec((tm, cout), lambda i: (i, 0)),
                   pl.BlockSpec((1, 2, cout), lambda i: (i, 0, 0))),
        compiler_params=pltpu.CompilerParams(
            dimension_semantics=("parallel",)),
    )(x_taps, w2d)
    return y, jnp.sum(stats, axis=0)


def _bn_apply_relu(y, scale, shift):
    m, c = y.shape
    tm = _pick_tm(m)
    grid = (m // tm,)
    return pl.pallas_call(
        bn_apply_relu_kernel,
        out_shape=jax.ShapeDtypeStruct((m, c), jnp.float32),
        grid=grid,
        in_specs=[pl.BlockSpec((tm, c), lambda i: (i, 0)),
                  pl.BlockSpec((1, c), lambda i: (0, 0)),
                  pl.BlockSpec((1, c), lambda i: (0, 0))],
        out_specs=pl.BlockSpec((tm, c), lambda i: (i, 0)),
        compiler_params=pltpu.CompilerParams(
            dimension_semantics=("parallel",)),
    )(y, scale, shift)


def _bn_apply_relu_concat(y1, y2, y3, y4, scale, shift):
    m = y1.shape[0]
    cs = (y1.shape[1], y2.shape[1], y3.shape[1], y4.shape[1])
    ctot = sum(cs)
    tm = _pick_tm(m)
    grid = (m // tm,)
    in_specs = [pl.BlockSpec((tm, c), lambda i: (i, 0)) for c in cs]
    in_specs += [pl.BlockSpec((1, ctot), lambda i: (0, 0)),
                 pl.BlockSpec((1, ctot), lambda i: (0, 0))]
    return pl.pallas_call(
        bn_apply_relu_concat_kernel,
        out_shape=jax.ShapeDtypeStruct((m, ctot), jnp.float32),
        grid=grid,
        in_specs=in_specs,
        out_specs=pl.BlockSpec((tm, ctot), lambda i: (i, 0)),
        compiler_params=pltpu.CompilerParams(
            dimension_semantics=("parallel",)),
    )(y1, y2, y3, y4, scale, shift)


# ----------------------------------------------------------------------------
# Plain-JAX glue: im2col, weight re-layout, BN folding
# ----------------------------------------------------------------------------
def _w2d(w):
    """PyTorch conv weight (Cout, Cin, KH, KW) -> im2col matrix (KH*KW*Cin, Cout)."""
    cout, cin, kh, kw = w.shape
    return jnp.transpose(w, (2, 3, 1, 0)).reshape(kh * kw * cin, cout)


def _im2col(x_nhwc, k):
    """'same'-padded KxK im2col: NHWC -> (N*H*W, K*K*C); tap order (kh, kw)."""
    n, h, w, c = x_nhwc.shape
    if k == 1:
        return x_nhwc.reshape(n * h * w, c)
    p = (k - 1) // 2
    xp = jnp.pad(x_nhwc, ((0, 0), (p, p), (p, p), (0, 0)))
    cols = [xp[:, kh:kh + h, kw:kw + w, :] for kh in range(k) for kw in range(k)]
    return jnp.stack(cols, axis=3).reshape(n * h * w, k * k * c)


def _tap_stack(x_nhwc, k, pad_value):
    """Stack the k*k shifted views: NHWC -> (k*k, N*H*W, C)."""
    n, h, w, c = x_nhwc.shape
    p = (k - 1) // 2
    xp = jnp.pad(x_nhwc, ((0, 0), (p, p), (p, p), (0, 0)),
                 constant_values=pad_value)
    views = [xp[:, kh:kh + h, kw:kw + w, :].reshape(n * h * w, c)
             for kh in range(k) for kw in range(k)]
    return jnp.stack(views, axis=0)


def _fold_bn(stats, gamma, beta, m, eps=_EPS):
    """Fold training-mode BatchNorm (batch stats, biased var) into scale/shift."""
    mean = stats[0] / m
    var = jnp.maximum(stats[1] / m - mean * mean, 0.0)
    scale = gamma * jax.lax.rsqrt(var + eps)
    shift = beta - mean * scale
    return scale.reshape(1, -1), shift.reshape(1, -1)


# ----------------------------------------------------------------------------
# Inception forward
# ----------------------------------------------------------------------------
def inception_forward(x_nchw, params):
    n, _, h, w = x_nchw.shape
    m = n * h * w
    x = jnp.transpose(x_nchw, (0, 2, 3, 1))          # NCHW -> NHWC
    x2d = x.reshape(m, -1)

    p1, p2a, p2b = params["b1"], params["b2a"], params["b2b"]
    p3a, p3b, p4 = params["b3a"], params["b3b"], params["b4"]
    c1 = p1["w"].shape[0]
    c2r = p2a["w"].shape[0]
    c3r = p3a["w"].shape[0]

    # ---- fused 1x1 reductions: branch1 | branch2-reduce | branch3-reduce ----
    w_fused = jnp.concatenate(
        [_w2d(p1["w"]), _w2d(p2a["w"]), _w2d(p3a["w"])], axis=1)
    y_fused, st_fused = _conv_stats(x2d, w_fused)
    sc1, sh1 = _fold_bn(st_fused[:, :c1], p1["gamma"], p1["beta"], m)
    sc2a, sh2a = _fold_bn(st_fused[:, c1:c1 + c2r], p2a["gamma"], p2a["beta"], m)
    sc3a, sh3a = _fold_bn(st_fused[:, c1 + c2r:], p3a["gamma"], p3a["beta"], m)

    y_b1 = y_fused[:, :c1]          # branch1 pre-BN output (applied at the end)
    y_red = y_fused[:, c1:]         # branch2/3 reduce pre-BN outputs

    # One fused BN+ReLU apply for both reduce layers.
    a_red = _bn_apply_relu(y_red,
                           jnp.concatenate([sc2a, sc3a], axis=1),
                           jnp.concatenate([sh2a, sh3a], axis=1))
    a2 = a_red[:, :c2r].reshape(n, h, w, c2r)
    a3 = a_red[:, c2r:].reshape(n, h, w, c3r)

    # ---- branch2: 3x3 conv --------------------------------------------------
    y_b2, st_b2 = _conv_stats(_im2col(a2, 3), _w2d(p2b["w"]))
    sc2, sh2 = _fold_bn(st_b2, p2b["gamma"], p2b["beta"], m)

    # ---- branch3: 5x5 conv --------------------------------------------------
    y_b3, st_b3 = _conv_stats(_im2col(a3, 5), _w2d(p3b["w"]))
    sc3, sh3 = _fold_bn(st_b3, p3b["gamma"], p3b["beta"], m)

    # ---- branch4: 3x3/s1/p1 max-pool + 1x1 conv ------------------------------
    y_b4, st_b4 = _pool_conv_stats(_tap_stack(x, 3, -jnp.inf), _w2d(p4["w"]))
    sc4, sh4 = _fold_bn(st_b4, p4["gamma"], p4["beta"], m)

    # ---- final fused BN+ReLU apply + channel concat (lane-denser store) ------
    scale_cat = jnp.concatenate([sc1, sc2, sc3, sc4], axis=1)
    shift_cat = jnp.concatenate([sh1, sh2, sh3, sh4], axis=1)
    out = _bn_apply_relu_concat(y_b1, y_b2, y_b3, y_b4, scale_cat, shift_cat)
    out = out.reshape(n, h, w, -1)
    return jnp.transpose(out, (0, 3, 1, 2))          # NHWC -> NCHW


# ----------------------------------------------------------------------------
# Pure-JAX reference (for a correctness check) and parameter construction
# ----------------------------------------------------------------------------
def _ref_basic_conv(x_nchw, p):
    k = p["w"].shape[2]
    pad = (k - 1) // 2
    y = jax.lax.conv_general_dilated(
        x_nchw, p["w"], window_strides=(1, 1),
        padding=((pad, pad), (pad, pad)),
        dimension_numbers=("NCHW", "OIHW", "NCHW"))
    mean = jnp.mean(y, axis=(0, 2, 3), keepdims=True)
    var = jnp.var(y, axis=(0, 2, 3), keepdims=True)
    g = p["gamma"].reshape(1, -1, 1, 1)
    b = p["beta"].reshape(1, -1, 1, 1)
    return jnp.maximum((y - mean) * jax.lax.rsqrt(var + _EPS) * g + b, 0.0)


def _ref_forward(x, params):
    b1 = _ref_basic_conv(x, params["b1"])
    b2 = _ref_basic_conv(_ref_basic_conv(x, params["b2a"]), params["b2b"])
    b3 = _ref_basic_conv(_ref_basic_conv(x, params["b3a"]), params["b3b"])
    pooled = jax.lax.reduce_window(
        x, -jnp.inf, jax.lax.max, (1, 1, 3, 3), (1, 1, 1, 1),
        ((0, 0), (0, 0), (1, 1), (1, 1)))
    b4 = _ref_basic_conv(pooled, params["b4"])
    return jnp.concatenate([b1, b2, b3, b4], axis=1)


def make_basic_conv2d_params(key, cin, cout, k):
    kw_, kg, kb = jax.random.split(key, 3)
    return {
        "w": 0.1 * jax.random.normal(kw_, (cout, cin, k, k), jnp.float32),
        "gamma": jax.random.uniform(kg, (cout,), jnp.float32, 0.5, 1.5),
        "beta": 0.1 * jax.random.normal(kb, (cout,), jnp.float32),
    }


if __name__ == "__main__":
    in_ch, ch1x1, ch3x3red, ch3x3, ch5x5red, ch5x5, pool_proj = 4, 8, 4, 8, 4, 8, 8
    N, H, W = 2, 16, 16

    key = jax.random.PRNGKey(0)
    keys = jax.random.split(key, 7)
    params = {
        "b1": make_basic_conv2d_params(keys[0], in_ch, ch1x1, 1),
        "b2a": make_basic_conv2d_params(keys[1], in_ch, ch3x3red, 1),
        "b2b": make_basic_conv2d_params(keys[2], ch3x3red, ch3x3, 3),
        "b3a": make_basic_conv2d_params(keys[3], in_ch, ch5x5red, 1),
        "b3b": make_basic_conv2d_params(keys[4], ch5x5red, ch5x5, 5),
        "b4": make_basic_conv2d_params(keys[5], in_ch, pool_proj, 1),
    }
    x = jax.random.normal(keys[6], (N, in_ch, H, W), jnp.float32)

    fwd = jax.jit(lambda xx: inception_forward(xx, params))
    out = jax.block_until_ready(fwd(x))

    assert out.shape == (N, ch1x1 + ch3x3 + ch5x5 + pool_proj, H, W), out.shape
    assert out.dtype == jnp.float32
    assert bool(jnp.all(jnp.isfinite(out)))

    ref = _ref_forward(x, params)
    err = float(jnp.max(jnp.abs(out - ref)))
    assert err < 5e-3, f"max abs error vs reference = {err}"
    print("KERNEL_OK")
</pallas_src>

<mosaic_0001>
module attributes {stable_mosaic.version = 11 : i64} {
  func.func @matmul_stats_kernel(%arg0: i32, %arg1: memref<256x4xf32, #tpu.memory_space<vmem>>, %arg2: memref<4x16xf32, #tpu.memory_space<vmem>>, %arg3: memref<256x16xf32, #tpu.memory_space<vmem>>, %arg4: memref<1x2x16xf32, #tpu.memory_space<vmem>>) attributes {dimension_semantics = [#tpu.dimension_semantics<parallel>], iteration_bounds = array<i64: 2>, scalar_prefetch = 0 : i64, scratch_operands = 0 : i64, tpu.core_type = #tpu.core_type<tc>, window_params = [{transform_indices = @transform_0, window_bounds = array<i64: 256, 4>}, {pipeline_mode = #tpu.pipeline_mode<synchronous>, transform_indices = @transform_1, window_bounds = array<i64: 4, 16>}, {transform_indices = @transform_2, window_bounds = array<i64: 256, 16>}, {transform_indices = @transform_3, window_bounds = array<i64: 1, 2, 16>}]} {
    %c0 = arith.constant 0 : index
    %c0_0 = arith.constant 0 : index
    %0 = vector.load %arg1[%c0, %c0_0] : memref<256x4xf32, #tpu.memory_space<vmem>>, vector<256x4xf32>
    %c0_1 = arith.constant 0 : index
    %c0_2 = arith.constant 0 : index
    %1 = vector.load %arg2[%c0_1, %c0_2] : memref<4x16xf32, #tpu.memory_space<vmem>>, vector<4x16xf32>
    %cst = arith.constant dense<0.000000e+00> : vector<256x16xf32>
    %2 = tpu.matmul %0, %1, %cst {dimension_numbers = #tpu.dot_dimension_numbers<[1], [0], [0], [1], [0, 0, 1, 1], [], []>} : vector<256x4xf32>, vector<4x16xf32>, vector<256x16xf32> -> vector<256x16xf32>
    %c0_3 = arith.constant 0 : index
    %c0_4 = arith.constant 0 : index
    %3 = vector.load %arg3[%c0_3, %c0_4] : memref<256x16xf32, #tpu.memory_space<vmem>>, vector<256x16xf32>
    tpu.vector_store %arg3[%c0_3, %c0_4], %2 {strides = array<i32>} : memref<256x16xf32, #tpu.memory_space<vmem>>, vector<256x16xf32>,
    %cst_5 = arith.constant dense<0.000000e+00> : vector<16xf32>
    %4 = vector.multi_reduction <add>, %2, %cst_5 [0] : vector<256x16xf32> to vector<16xf32>
    %5 = vector.shape_cast %4 : vector<16xf32> to vector<1x16xf32>
    %6 = arith.mulf %2, %2 : vector<256x16xf32>
    %cst_6 = arith.constant dense<0.000000e+00> : vector<16xf32>
    %7 = vector.multi_reduction <add>, %6, %cst_6 [0] : vector<256x16xf32> to vector<16xf32>
    %8 = vector.shape_cast %7 : vector<16xf32> to vector<1x16xf32>
    %9 = tpu.concatenate %5, %8 in 0 : vector<1x16xf32>, vector<1x16xf32> -> vector<2x16xf32>
    %10 = vector.shape_cast %9 : vector<2x16xf32> to vector<1x2x16xf32>
    %c0_7 = arith.constant 0 : index
    %c0_8 = arith.constant 0 : index
    %c0_9 = arith.constant 0 : index
    %11 = vector.load %arg4[%c0_7, %c0_8, %c0_9] : memref<1x2x16xf32, #tpu.memory_space<vmem>>, vector<1x2x16xf32>
    tpu.vector_store %arg4[%c0_7, %c0_8, %c0_9], %10 {strides = array<i32>} : memref<1x2x16xf32, #tpu.memory_space<vmem>>, vector<1x2x16xf32>,
    return
  }
  func.func @transform_0(%arg0: i32) -> (i32, i32) {
    %c0_i32 = arith.constant 0 : i32
    %c0_i32_0 = arith.constant 0 : i32
    return %arg0, %c0_i32 : i32, i32
  }
  func.func @transform_1(%arg0: i32) -> (i32, i32) {
    %c0_i32 = arith.constant 0 : i32
    %c0_i32_0 = arith.constant 0 : i32
    %c0_i32_1 = arith.constant 0 : i32
    return %c0_i32, %c0_i32_0 : i32, i32
  }
  func.func @transform_2(%arg0: i32) -> (i32, i32) {
    %c0_i32 = arith.constant 0 : i32
    %c0_i32_0 = arith.constant 0 : i32
    return %arg0, %c0_i32 : i32, i32
  }
  func.func @transform_3(%arg0: i32) -> (i32, i32, i32) {
    %c0_i32 = arith.constant 0 : i32
    %c0_i32_0 = arith.constant 0 : i32
    %c0_i32_1 = arith.constant 0 : i32
    return %arg0, %c0_i32, %c0_i32_0 : i32, i32, i32
  }
}

module attributes {stable_mosaic.version = 11 : i64} {
  func.func @bn_apply_relu_kernel(%arg0: i32, %arg1: memref<256x8xf32, #tpu.memory_space<vmem>>, %arg2: memref<1x8xf32, #tpu.memory_space<vmem>>, %arg3: memref<1x8xf32, #tpu.memory_space<vmem>>, %arg4: memref<256x8xf32, #tpu.memory_space<vmem>>) attributes {dimension_semantics = [#tpu.dimension_semantics<parallel>], iteration_bounds = array<i64: 2>, scalar_prefetch = 0 : i64, scratch_operands = 0 : i64, tpu.core_type = #tpu.core_type<tc>, window_params = [{transform_indices = @transform_0, window_bounds = array<i64: 256, 8>}, {pipeline_mode = #tpu.pipeline_mode<synchronous>, transform_indices = @transform_1, window_bounds = array<i64: 1, 8>}, {pipeline_mode = #tpu.pipeline_mode<synchronous>, transform_indices = @transform_2, window_bounds = array<i64: 1, 8>}, {transform_indices = @transform_3, window_bounds = array<i64: 256, 8>}]} {
    %c0 = arith.constant 0 : index
    %c0_0 = arith.constant 0 : index
    %0 = vector.load %arg1[%c0, %c0_0] : memref<256x8xf32, #tpu.memory_space<vmem>>, vector<256x8xf32>
    %c0_1 = arith.constant 0 : index
    %c0_2 = arith.constant 0 : index
    %1 = vector.load %arg2[%c0_1, %c0_2] : memref<1x8xf32, #tpu.memory_space<vmem>>, vector<1x8xf32>
    %2 = vector.broadcast %1 : vector<1x8xf32> to vector<256x8xf32>
    %3 = arith.mulf %0, %2 : vector<256x8xf32>
    %c0_3 = arith.constant 0 : index
    %c0_4 = arith.constant 0 : index
    %4 = vector.load %arg3[%c0_3, %c0_4] : memref<1x8xf32, #tpu.memory_space<vmem>>, vector<1x8xf32>
    %5 = vector.broadcast %4 : vector<1x8xf32> to vector<256x8xf32>
    %6 = arith.addf %3, %5 : vector<256x8xf32>
    %cst = arith.constant 0.000000e+00 : f32
    %7 = vector.broadcast %cst : f32 to vector<256x8xf32>
    %8 = arith.maximumf %6, %7 : vector<256x8xf32>
    %c0_5 = arith.constant 0 : index
    %c0_6 = arith.constant 0 : index
    %9 = vector.load %arg4[%c0_5, %c0_6] : memref<256x8xf32, #tpu.memory_space<vmem>>, vector<256x8xf32>
    tpu.vector_store %arg4[%c0_5, %c0_6], %8 {strides = array<i32>} : memref<256x8xf32, #tpu.memory_space<vmem>>, vector<256x8xf32>,
    return
  }
  func.func @transform_0(%arg0: i32) -> (i32, i32) {
    %c0_i32 = arith.constant 0 : i32
    %c0_i32_0 = arith.constant 0 : i32
    return %arg0, %c0_i32 : i32, i32
  }
  func.func @transform_1(%arg0: i32) -> (i32, i32) {
    %c0_i32 = arith.constant 0 : i32
    %c0_i32_0 = arith.constant 0 : i32
    %c0_i32_1 = arith.constant 0 : i32
    return %c0_i32, %c0_i32_0 : i32, i32
  }
  func.func @transform_2(%arg0: i32) -> (i32, i32) {
    %c0_i32 = arith.constant 0 : i32
    %c0_i32_0 = arith.constant 0 : i32
    %c0_i32_1 = arith.constant 0 : i32
    return %c0_i32, %c0_i32_0 : i32, i32
  }
  func.func @transform_3(%arg0: i32) -> (i32, i32) {
    %c0_i32 = arith.constant 0 : i32
    %c0_i32_0 = arith.constant 0 : i32
    return %arg0, %c0_i32 : i32, i32
  }
}

module attributes {stable_mosaic.version = 11 : i64} {
  func.func @matmul_stats_kernel(%arg0: i32, %arg1: memref<256x36xf32, #tpu.memory_space<vmem>>, %arg2: memref<36x8xf32, #tpu.memory_space<vmem>>, %arg3: memref<256x8xf32, #tpu.memory_space<vmem>>, %arg4: memref<1x2x8xf32, #tpu.memory_space<vmem>>) attributes {dimension_semantics = [#tpu.dimension_semantics<parallel>], iteration_bounds = array<i64: 2>, scalar_prefetch = 0 : i64, scratch_operands = 0 : i64, tpu.core_type = #tpu.core_type<tc>, window_params = [{transform_indices = @transform_0, window_bounds = array<i64: 256, 36>}, {pipeline_mode = #tpu.pipeline_mode<synchronous>, transform_indices = @transform_1, window_bounds = array<i64: 36, 8>}, {transform_indices = @transform_2, window_bounds = array<i64: 256, 8>}, {transform_indices = @transform_3, window_bounds = array<i64: 1, 2, 8>}]} {
    %c0 = arith.constant 0 : index
    %c0_0 = arith.constant 0 : index
    %0 = vector.load %arg1[%c0, %c0_0] : memref<256x36xf32, #tpu.memory_space<vmem>>, vector<256x36xf32>
    %c0_1 = arith.constant 0 : index
    %c0_2 = arith.constant 0 : index
    %1 = vector.load %arg2[%c0_1, %c0_2] : memref<36x8xf32, #tpu.memory_space<vmem>>, vector<36x8xf32>
    %cst = arith.constant dense<0.000000e+00> : vector<256x8xf32>
    %2 = tpu.matmul %0, %1, %cst {dimension_numbers = #tpu.dot_dimension_numbers<[1], [0], [0], [1], [0, 0, 1, 1], [], []>} : vector<256x36xf32>, vector<36x8xf32>, vector<256x8xf32> -> vector<256x8xf32>
    %c0_3 = arith.constant 0 : index
    %c0_4 = arith.constant 0 : index
    %3 = vector.load %arg3[%c0_3, %c0_4] : memref<256x8xf32, #tpu.memory_space<vmem>>, vector<256x8xf32>
    tpu.vector_store %arg3[%c0_3, %c0_4], %2 {strides = array<i32>} : memref<256x8xf32, #tpu.memory_space<vmem>>, vector<256x8xf32>,
    %cst_5 = arith.constant dense<0.000000e+00> : vector<8xf32>
    %4 = vector.multi_reduction <add>, %2, %cst_5 [0] : vector<256x8xf32> to vector<8xf32>
    %5 = vector.shape_cast %4 : vector<8xf32> to vector<1x8xf32>
    %6 = arith.mulf %2, %2 : vector<256x8xf32>
    %cst_6 = arith.constant dense<0.000000e+00> : vector<8xf32>
    %7 = vector.multi_reduction <add>, %6, %cst_6 [0] : vector<256x8xf32> to vector<8xf32>
    %8 = vector.shape_cast %7 : vector<8xf32> to vector<1x8xf32>
    %9 = tpu.concatenate %5, %8 in 0 : vector<1x8xf32>, vector<1x8xf32> -> vector<2x8xf32>
    %10 = vector.shape_cast %9 : vector<2x8xf32> to vector<1x2x8xf32>
    %c0_7 = arith.constant 0 : index
    %c0_8 = arith.constant 0 : index
    %c0_9 = arith.constant 0 : index
    %11 = vector.load %arg4[%c0_7, %c0_8, %c0_9] : memref<1x2x8xf32, #tpu.memory_space<vmem>>, vector<1x2x8xf32>
    tpu.vector_store %arg4[%c0_7, %c0_8, %c0_9], %10 {strides = array<i32>} : memref<1x2x8xf32, #tpu.memory_space<vmem>>, vector<1x2x8xf32>,
    return
  }
  func.func @transform_0(%arg0: i32) -> (i32, i32) {
    %c0_i32 = arith.constant 0 : i32
    %c0_i32_0 = arith.constant 0 : i32
    return %arg0, %c0_i32 : i32, i32
  }
  func.func @transform_1(%arg0: i32) -> (i32, i32) {
    %c0_i32 = arith.constant 0 : i32
    %c0_i32_0 = arith.constant 0 : i32
    %c0_i32_1 = arith.constant 0 : i32
    return %c0_i32, %c0_i32_0 : i32, i32
  }
  func.func @transform_2(%arg0: i32) -> (i32, i32) {
    %c0_i32 = arith.constant 0 : i32
    %c0_i32_0 = arith.constant 0 : i32
    return %arg0, %c0_i32 : i32, i32
  }
  func.func @transform_3(%arg0: i32) -> (i32, i32, i32) {
    %c0_i32 = arith.constant 0 : i32
    %c0_i32_0 = arith.constant 0 : i32
    %c0_i32_1 = arith.constant 0 : i32
    return %arg0, %c0_i32, %c0_i32_0 : i32, i32, i32
  }
}

module attributes {stable_mosaic.version = 11 : i64} {
  func.func @matmul_stats_kernel(%arg0: i32, %arg1: memref<256x100xf32, #tpu.memory_space<vmem>>, %arg2: memref<100x8xf32, #tpu.memory_space<vmem>>, %arg3: memref<256x8xf32, #tpu.memory_space<vmem>>, %arg4: memref<1x2x8xf32, #tpu.memory_space<vmem>>) attributes {dimension_semantics = [#tpu.dimension_semantics<parallel>], iteration_bounds = array<i64: 2>, scalar_prefetch = 0 : i64, scratch_operands = 0 : i64, tpu.core_type = #tpu.core_type<tc>, window_params = [{transform_indices = @transform_0, window_bounds = array<i64: 256, 100>}, {pipeline_mode = #tpu.pipeline_mode<synchronous>, transform_indices = @transform_1, window_bounds = array<i64: 100, 8>}, {transform_indices = @transform_2, window_bounds = array<i64: 256, 8>}, {transform_indices = @transform_3, window_bounds = array<i64: 1, 2, 8>}]} {
    %c0 = arith.constant 0 : index
    %c0_0 = arith.constant 0 : index
    %0 = vector.load %arg1[%c0, %c0_0] : memref<256x100xf32, #tpu.memory_space<vmem>>, vector<256x100xf32>
    %c0_1 = arith.constant 0 : index
    %c0_2 = arith.constant 0 : index
    %1 = vector.load %arg2[%c0_1, %c0_2] : memref<100x8xf32, #tpu.memory_space<vmem>>, vector<100x8xf32>
    %cst = arith.constant dense<0.000000e+00> : vector<256x8xf32>
    %2 = tpu.matmul %0, %1, %cst {dimension_numbers = #tpu.dot_dimension_numbers<[1], [0], [0], [1], [0, 0, 1, 1], [], []>} : vector<256x100xf32>, vector<100x8xf32>, vector<256x8xf32> -> vector<256x8xf32>
    %c0_3 = arith.constant 0 : index
    %c0_4 = arith.constant 0 : index
    %3 = vector.load %arg3[%c0_3, %c0_4] : memref<256x8xf32, #tpu.memory_space<vmem>>, vector<256x8xf32>
    tpu.vector_store %arg3[%c0_3, %c0_4], %2 {strides = array<i32>} : memref<256x8xf32, #tpu.memory_space<vmem>>, vector<256x8xf32>,
    %cst_5 = arith.constant dense<0.000000e+00> : vector<8xf32>
    %4 = vector.multi_reduction <add>, %2, %cst_5 [0] : vector<256x8xf32> to vector<8xf32>
    %5 = vector.shape_cast %4 : vector<8xf32> to vector<1x8xf32>
    %6 = arith.mulf %2, %2 : vector<256x8xf32>
    %cst_6 = arith.constant dense<0.000000e+00> : vector<8xf32>
    %7 = vector.multi_reduction <add>, %6, %cst_6 [0] : vector<256x8xf32> to vector<8xf32>
    %8 = vector.shape_cast %7 : vector<8xf32> to vector<1x8xf32>
    %9 = tpu.concatenate %5, %8 in 0 : vector<1x8xf32>, vector<1x8xf32> -> vector<2x8xf32>
    %10 = vector.shape_cast %9 : vector<2x8xf32> to vector<1x2x8xf32>
    %c0_7 = arith.constant 0 : index
    %c0_8 = arith.constant 0 : index
    %c0_9 = arith.constant 0 : index
    %11 = vector.load %arg4[%c0_7, %c0_8, %c0_9] : memref<1x2x8xf32, #tpu.memory_space<vmem>>, vector<1x2x8xf32>
    tpu.vector_store %arg4[%c0_7, %c0_8, %c0_9], %10 {strides = array<i32>} : memref<1x2x8xf32, #tpu.memory_space<vmem>>, vector<1x2x8xf32>,
    return
  }
  func.func @transform_0(%arg0: i32) -> (i32, i32) {
    %c0_i32 = arith.constant 0 : i32
    %c0_i32_0 = arith.constant 0 : i32
    return %arg0, %c0_i32 : i32, i32
  }
  func.func @transform_1(%arg0: i32) -> (i32, i32) {
    %c0_i32 = arith.constant 0 : i32
    %c0_i32_0 = arith.constant 0 : i32
    %c0_i32_1 = arith.constant 0 : i32
    return %c0_i32, %c0_i32_0 : i32, i32
  }
  func.func @transform_2(%arg0: i32) -> (i32, i32) {
    %c0_i32 = arith.constant 0 : i32
    %c0_i32_0 = arith.constant 0 : i32
    return %arg0, %c0_i32 : i32, i32
  }
  func.func @transform_3(%arg0: i32) -> (i32, i32, i32) {
    %c0_i32 = arith.constant 0 : i32
    %c0_i32_0 = arith.constant 0 : i32
    %c0_i32_1 = arith.constant 0 : i32
    return %arg0, %c0_i32, %c0_i32_0 : i32, i32, i32
  }
}

module attributes {stable_mosaic.version = 11 : i64} {
  func.func @pool_matmul_stats_kernel(%arg0: i32, %arg1: memref<9x256x4xf32, #tpu.memory_space<vmem>>, %arg2: memref<4x8xf32, #tpu.memory_space<vmem>>, %arg3: memref<256x8xf32, #tpu.memory_space<vmem>>, %arg4: memref<1x2x8xf32, #tpu.memory_space<vmem>>) attributes {dimension_semantics = [#tpu.dimension_semantics<parallel>], iteration_bounds = array<i64: 2>, scalar_prefetch = 0 : i64, scratch_operands = 0 : i64, tpu.core_type = #tpu.core_type<tc>, window_params = [{transform_indices = @transform_0, window_bounds = array<i64: 9, 256, 4>}, {pipeline_mode = #tpu.pipeline_mode<synchronous>, transform_indices = @transform_1, window_bounds = array<i64: 4, 8>}, {transform_indices = @transform_2, window_bounds = array<i64: 256, 8>}, {transform_indices = @transform_3, window_bounds = array<i64: 1, 2, 8>}]} {
    %c0 = arith.constant 0 : index
    %c0_0 = arith.constant 0 : index
    %c0_1 = arith.constant 0 : index
    %0 = vector.load %arg1[%c0, %c0_0, %c0_1] : memref<9x256x4xf32, #tpu.memory_space<vmem>>, vector<1x256x4xf32>
    %1 = vector.shape_cast %0 : vector<1x256x4xf32> to vector<256x4xf32>
    %c1 = arith.constant 1 : index
    %c0_2 = arith.constant 0 : index
    %c0_3 = arith.constant 0 : index
    %2 = vector.load %arg1[%c1, %c0_2, %c0_3] : memref<9x256x4xf32, #tpu.memory_space<vmem>>, vector<1x256x4xf32>
    %3 = vector.shape_cast %2 : vector<1x256x4xf32> to vector<256x4xf32>
    %4 = arith.maximumf %1, %3 : vector<256x4xf32>
    %c2 = arith.constant 2 : index
    %c0_4 = arith.constant 0 : index
    %c0_5 = arith.constant 0 : index
    %5 = vector.load %arg1[%c2, %c0_4, %c0_5] : memref<9x256x4xf32, #tpu.memory_space<vmem>>, vector<1x256x4xf32>
    %6 = vector.shape_cast %5 : vector<1x256x4xf32> to vector<256x4xf32>
    %7 = arith.maximumf %4, %6 : vector<256x4xf32>
    %c3 = arith.constant 3 : index
    %c0_6 = arith.constant 0 : index
    %c0_7 = arith.constant 0 : index
    %8 = vector.load %arg1[%c3, %c0_6, %c0_7] : memref<9x256x4xf32, #tpu.memory_space<vmem>>, vector<1x256x4xf32>
    %9 = vector.shape_cast %8 : vector<1x256x4xf32> to vector<256x4xf32>
    %10 = arith.maximumf %7, %9 : vector<256x4xf32>
    %c4 = arith.constant 4 : index
    %c0_8 = arith.constant 0 : index
    %c0_9 = arith.constant 0 : index
    %11 = vector.load %arg1[%c4, %c0_8, %c0_9] : memref<9x256x4xf32, #tpu.memory_space<vmem>>, vector<1x256x4xf32>
    %12 = vector.shape_cast %11 : vector<1x256x4xf32> to vector<256x4xf32>
    %13 = arith.maximumf %10, %12 : vector<256x4xf32>
    %c5 = arith.constant 5 : index
    %c0_10 = arith.constant 0 : index
    %c0_11 = arith.constant 0 : index
    %14 = vector.load %arg1[%c5, %c0_10, %c0_11] : memref<9x256x4xf32, #tpu.memory_space<vmem>>, vector<1x256x4xf32>
    %15 = vector.shape_cast %14 : vector<1x256x4xf32> to vector<256x4xf32>
    %16 = arith.maximumf %13, %15 : vector<256x4xf32>
    %c6 = arith.constant 6 : index
    %c0_12 = arith.constant 0 : index
    %c0_13 = arith.constant 0 : index
    %17 = vector.load %arg1[%c6, %c0_12, %c0_13] : memref<9x256x4xf32, #tpu.memory_space<vmem>>, vector<1x256x4xf32>
    %18 = vector.shape_cast %17 : vector<1x256x4xf32> to vector<256x4xf32>
    %19 = arith.maximumf %16, %18 : vector<256x4xf32>
    %c7 = arith.constant 7 : index
    %c0_14 = arith.constant 0 : index
    %c0_15 = arith.constant 0 : index
    %20 = vector.load %arg1[%c7, %c0_14, %c0_15] : memref<9x256x4xf32, #tpu.memory_space<vmem>>, vector<1x256x4xf32>
    %21 = vector.shape_cast %20 : vector<1x256x4xf32> to vector<256x4xf32>
    %22 = arith.maximumf %19, %21 : vector<256x4xf32>
    %c8 = arith.constant 8 : index
    %c0_16 = arith.constant 0 : index
    %c0_17 = arith.constant 0 : index
    %23 = vector.load %arg1[%c8, %c0_16, %c0_17] : memref<9x256x4xf32, #tpu.memory_space<vmem>>, vector<1x256x4xf32>
    %24 = vector.shape_cast %23 : vector<1x256x4xf32> to vector<256x4xf32>
    %25 = arith.maximumf %22, %24 : vector<256x4xf32>
    %c0_18 = arith.constant 0 : index
    %c0_19 = arith.constant 0 : index
    %26 = vector.load %arg2[%c0_18, %c0_19] : memref<4x8xf32, #tpu.memory_space<vmem>>, vector<4x8xf32>
    %cst = arith.constant dense<0.000000e+00> : vector<256x8xf32>
    %27 = tpu.matmul %25, %26, %cst {dimension_numbers = #tpu.dot_dimension_numbers<[1], [0], [0], [1], [0, 0, 1, 1], [], []>} : vector<256x4xf32>, vector<4x8xf32>, vector<256x8xf32> -> vector<256x8xf32>
    %c0_20 = arith.constant 0 : index
    %c0_21 = arith.constant 0 : index
    %28 = vector.load %arg3[%c0_20, %c0_21] : memref<256x8xf32, #tpu.memory_space<vmem>>, vector<256x8xf32>
    tpu.vector_store %arg3[%c0_20, %c0_21], %27 {strides = array<i32>} : memref<256x8xf32, #tpu.memory_space<vmem>>, vector<256x8xf32>,
    %cst_22 = arith.constant dense<0.000000e+00> : vector<8xf32>
    %29 = vector.multi_reduction <add>, %27, %cst_22 [0] : vector<256x8xf32> to vector<8xf32>
    %30 = vector.shape_cast %29 : vector<8xf32> to vector<1x8xf32>
    %31 = arith.mulf %27, %27 : vector<256x8xf32>
    %cst_23 = arith.constant dense<0.000000e+00> : vector<8xf32>
    %32 = vector.multi_reduction <add>, %31, %cst_23 [0] : vector<256x8xf32> to vector<8xf32>
    %33 = vector.shape_cast %32 : vector<8xf32> to vector<1x8xf32>
    %34 = tpu.concatenate %30, %33 in 0 : vector<1x8xf32>, vector<1x8xf32> -> vector<2x8xf32>
    %35 = vector.shape_cast %34 : vector<2x8xf32> to vector<1x2x8xf32>
    %c0_24 = arith.constant 0 : index
    %c0_25 = arith.constant 0 : index
    %c0_26 = arith.constant 0 : index
    %36 = vector.load %arg4[%c0_24, %c0_25, %c0_26] : memref<1x2x8xf32, #tpu.memory_space<vmem>>, vector<1x2x8xf32>
    tpu.vector_store %arg4[%c0_24, %c0_25, %c0_26], %35 {strides = array<i32>} : memref<1x2x8xf32, #tpu.memory_space<vmem>>, vector<1x2x8xf32>,
    return
  }
  func.func @transform_0(%arg0: i32) -> (i32, i32, i32) {
    %c0_i32 = arith.constant 0 : i32
    %c0_i32_0 = arith.constant 0 : i32
    %c0_i32_1 = arith.constant 0 : i32
    return %c0_i32, %arg0, %c0_i32_0 : i32, i32, i32
  }
  func.func @transform_1(%arg0: i32) -> (i32, i32) {
    %c0_i32 = arith.constant 0 : i32
    %c0_i32_0 = arith.constant 0 : i32
    %c0_i32_1 = arith.constant 0 : i32
    return %c0_i32, %c0_i32_0 : i32, i32
  }
  func.func @transform_2(%arg0: i32) -> (i32, i32) {
    %c0_i32 = arith.constant 0 : i32
    %c0_i32_0 = arith.constant 0 : i32
    return %arg0, %c0_i32 : i32, i32
  }
  func.func @transform_3(%arg0: i32) -> (i32, i32, i32) {
    %c0_i32 = arith.constant 0 : i32
    %c0_i32_0 = arith.constant 0 : i32
    %c0_i32_1 = arith.constant 0 : i32
    return %arg0, %c0_i32, %c0_i32_0 : i32, i32, i32
  }
}

module attributes {stable_mosaic.version = 11 : i64} {
  func.func @bn_apply_relu_concat_kernel(%arg0: i32, %arg1: memref<256x8xf32, #tpu.memory_space<vmem>>, %arg2: memref<256x8xf32, #tpu.memory_space<vmem>>, %arg3: memref<256x8xf32, #tpu.memory_space<vmem>>, %arg4: memref<256x8xf32, #tpu.memory_space<vmem>>, %arg5: memref<1x32xf32, #tpu.memory_space<vmem>>, %arg6: memref<1x32xf32, #tpu.memory_space<vmem>>, %arg7: memref<256x32xf32, #tpu.memory_space<vmem>>) attributes {dimension_semantics = [#tpu.dimension_semantics<parallel>], iteration_bounds = array<i64: 2>, scalar_prefetch = 0 : i64, scratch_operands = 0 : i64, tpu.core_type = #tpu.core_type<tc>, window_params = [{transform_indices = @transform_0, window_bounds = array<i64: 256, 8>}, {transform_indices = @transform_1, window_bounds = array<i64: 256, 8>}, {transform_indices = @transform_2, window_bounds = array<i64: 256, 8>}, {transform_indices = @transform_3, window_bounds = array<i64: 256, 8>}, {pipeline_mode = #tpu.pipeline_mode<synchronous>, transform_indices = @transform_4, window_bounds = array<i64: 1, 32>}, {pipeline_mode = #tpu.pipeline_mode<synchronous>, transform_indices = @transform_5, window_bounds = array<i64: 1, 32>}, {transform_indices = @transform_6, window_bounds = array<i64: 256, 32>}]} {
    %c0 = arith.constant 0 : index
    %c0_0 = arith.constant 0 : index
    %0 = vector.load %arg1[%c0, %c0_0] : memref<256x8xf32, #tpu.memory_space<vmem>>, vector<256x8xf32>
    %c0_1 = arith.constant 0 : index
    %c0_2 = arith.constant 0 : index
    %1 = vector.load %arg2[%c0_1, %c0_2] : memref<256x8xf32, #tpu.memory_space<vmem>>, vector<256x8xf32>
    %c0_3 = arith.constant 0 : index
    %c0_4 = arith.constant 0 : index
    %2 = vector.load %arg3[%c0_3, %c0_4] : memref<256x8xf32, #tpu.memory_space<vmem>>, vector<256x8xf32>
    %c0_5 = arith.constant 0 : index
    %c0_6 = arith.constant 0 : index
    %3 = vector.load %arg4[%c0_5, %c0_6] : memref<256x8xf32, #tpu.memory_space<vmem>>, vector<256x8xf32>
    %4 = tpu.concatenate %0, %1, %2, %3 in 1 : vector<256x8xf32>, vector<256x8xf32>, vector<256x8xf32>, vector<256x8xf32> -> vector<256x32xf32>
    %c0_7 = arith.constant 0 : index
    %c0_8 = arith.constant 0 : index
    %5 = vector.load %arg5[%c0_7, %c0_8] : memref<1x32xf32, #tpu.memory_space<vmem>>, vector<1x32xf32>
    %6 = vector.broadcast %5 : vector<1x32xf32> to vector<256x32xf32>
    %7 = arith.mulf %4, %6 : vector<256x32xf32>
    %c0_9 = arith.constant 0 : index
    %c0_10 = arith.constant 0 : index
    %8 = vector.load %arg6[%c0_9, %c0_10] : memref<1x32xf32, #tpu.memory_space<vmem>>, vector<1x32xf32>
    %9 = vector.broadcast %8 : vector<1x32xf32> to vector<256x32xf32>
    %10 = arith.addf %7, %9 : vector<256x32xf32>
    %cst = arith.constant 0.000000e+00 : f32
    %11 = vector.broadcast %cst : f32 to vector<256x32xf32>
    %12 = arith.maximumf %10, %11 : vector<256x32xf32>
    %c0_11 = arith.constant 0 : index
    %c0_12 = arith.constant 0 : index
    %13 = vector.load %arg7[%c0_11, %c0_12] : memref<256x32xf32, #tpu.memory_space<vmem>>, vector<256x32xf32>
    tpu.vector_store %arg7[%c0_11, %c0_12], %12 {strides = array<i32>} : memref<256x32xf32, #tpu.memory_space<vmem>>, vector<256x32xf32>,
    return
  }
  func.func @transform_0(%arg0: i32) -> (i32, i32) {
    %c0_i32 = arith.constant 0 : i32
    %c0_i32_0 = arith.constant 0 : i32
    return %arg0, %c0_i32 : i32, i32
  }
  func.func @transform_1(%arg0: i32) -> (i32, i32) {
    %c0_i32 = arith.constant 0 : i32
    %c0_i32_0 = arith.constant 0 : i32
    return %arg0, %c0_i32 : i32, i32
  }
  func.func @transform_2(%arg0: i32) -> (i32, i32) {
    %c0_i32 = arith.constant 0 : i32
    %c0_i32_0 = arith.constant 0 : i32
    return %arg0, %c0_i32 : i32, i32
  }
  func.func @transform_3(%arg0: i32) -> (i32, i32) {
    %c0_i32 = arith.constant 0 : i32
    %c0_i32_0 = arith.constant 0 : i32
    return %arg0, %c0_i32 : i32, i32
  }
  func.func @transform_4(%arg0: i32) -> (i32, i32) {
    %c0_i32 = arith.constant 0 : i32
    %c0_i32_0 = arith.constant 0 : i32
    %c0_i32_1 = arith.constant 0 : i32
    return %c0_i32, %c0_i32_0 : i32, i32
  }
  func.func @transform_5(%arg0: i32) -> (i32, i32) {
    %c0_i32 = arith.constant 0 : i32
    %c0_i32_0 = arith.constant 0 : i32
    %c0_i32_1 = arith.constant 0 : i32
    return %c0_i32, %c0_i32_0 : i32, i32
  }
  func.func @transform_6(%arg0: i32) -> (i32, i32) {
    %c0_i32 = arith.constant 0 : i32
    %c0_i32_0 = arith.constant 0 : i32
    return %arg0, %c0_i32 : i32, i32
  }
}

</mosaic_0001>

<bundles_post_ra>
// kernel: _lambda_.6
= control target key start
LH: loop header
LB: loop body
LE: loop exit
PB: predicated region body
PF: predicated region fallthrough
CT: control target
= control target key end

     0   :  { %9 = vsyncpa [#allocation3], 0  ;;  %s885_s12 = smov 0   ;;  %s1249_s0 = inlined_call_operand.vmem [shape: f32[512,4], index: 0, kind: input, shape index: {}]   ;;  %s1250_s1 = inlined_call_operand.hbm [shape: f32[4,16], index: 1, kind: input, shape index: {}]   ;;  %s1251_s2 = inlined_call_operand.vmem [shape: f32[512,16], index: 2, kind: output, shape index: {0}]   ;;  %s1252_s3 = inlined_call_operand.vmem [shape: f32[2,2,16], index: 3, kind: output, shape index: {1}]  }
   0x1 LB: > { %s891_s13 = sadd.s32 4294967295, %s862_s12   ;;  %p755_p0 = scmp.ge.s32.totalorder %s862_s12, 1  ;;  %s862_s12 = sphi %s885_s12, %s15_s12  }
   0x2   : > { %p119_p1 = scmp.lt.s32.totalorder %s862_s12, 3  ;;  %s131_s16 = sshll.u32 %s1250_s1, 4  ;;  %s132_s16 = int_to_ptr.hbm [resolvable:$true] %s131_s16 }
   0x3   : > { %p811_p3 = scmp.eq.s32.totalorder %s891_s13, 0  ;;  %s864_s17 = smov [#allocation2]  }
   0x4   : > { %p120_p2 = pnand %p755_p0, %p119_p1  ;;  %s133_s18 = sshll.u32 %s864_s17, 4  ;;  %s134_s18 = int_to_ptr.vmem [resolvable:$true] %s133_s18 }
   0x6   : > { %p807_p4 = pneg %p120_p2  ;;  %155 = sbr.rel (%p120_p2) target bundleno = 268 (0x10c), region = 28 }
   0x8   : > { %p808_p5 = pnand %p811_p3, %p807_p4 }
   0xa   : > { %810 = dma.hbm_to_vmem [thread:$0]  (!%p808_p5), %s132_s16, 64, %s134_s18, [#allocation3]  }
   0xb   : > { %857 = dma.done.wait (%p811_p3), [#allocation3], 64  }
   0xc   : > { %859 = vsyncadd (%p811_p3), [#allocation3], 4294967232  ;;  %s760_s19 = sshll.u32 %s891_s13, 5  ;;  %vm330_vm0 = vcmask 1043456   ;;  %vm233_vm1 = vcmask 31744   ;;  %vm447_vm2 = vcmask 130048  }
   0xd   : > { %p185_p6 = scmp.lt.s32.totalorder %s760_s19, 63  ;;  %v232_v0 = vld [vmem:[#allocation2] sm:$0xf]  ;;  %p196_p7 = scmp.lt.s32.totalorder %s891_s13, 1  ;;  %vm650_vm3 = vcmask 1040384   ;;  %vm652_vm4 = vcmask 123904  }
   0xe   : > { %765 = vmatpush.msk.msra.mxu0 %vm330_vm0, %v232_v0  ;;  %800 = vmatpush.msk.msra.mxu1 %vm330_vm0, %v232_v0 }
   0xf   : > { %s1254_s19 = smov (!%p185_p6, %s760_s19), 63  ;;  %801 = vmatpush.msk.msra.mxu2 %vm330_vm0, %v232_v0  ;;  %802 = vmatpush.msk.msra.mxu3 %vm330_vm0, %v232_v0  ;;  %s1256_s13 = smov (!%p196_p7, %s891_s13), 1 }
  0x10   : > { %s761_s20 = sshll.u32 %s1254_s19, 3  ;;  %s764_s27 = sshll.u32 %s1256_s13, 1 }
  0x11   : > { %s908_s23 = scalar_lea.vmem %s1249_s0, %s761_s20  ;;  %s979_s26 = scalar_lea.vmem %s1251_s2, %s761_s20 }
  0x12   : > { %v200_v1 = vld [vmem:[%s908_s23] sm:$0xff]  ;;  %v201_v4 = vld [vmem:[%s908_s23 + $0x8] sm:$0xff]  ;;  %v202_v8 = vld [vmem:[%s908_s23 + $0x10] sm:$0xff]  ;;  %s199_s30 = scalar_lea.vmem %s1252_s3, %s764_s27 }
  0x13   : > { %v208_v2 = vld [vmem:[%s908_s23 + $0x40] sm:$0xff]  ;;  %766 = vmatmul.msk.f32.vlgmr.msra.gmra.mxu0 %vm233_vm1, %v200_v1  ;;  %v209_v5 = vld [vmem:[%s908_s23 + $0x48] sm:$0xff]  ;;  %v210_v9 = vld [vmem:[%s908_s23 + $0x50] sm:$0xff] }
  0x14   : > { %774 = vmatmul.msk.f32.vlgmr.msra.gmra.mxu1 %vm233_vm1, %v208_v2  ;;  %v216_v3 = vld [vmem:[%s908_s23 + $0x80] sm:$0xff]  ;;  %v217_v6 = vld [vmem:[%s908_s23 + $0x88] sm:$0xff]  ;;  %v218_v10 = vld [vmem:[%s908_s23 + $0x90] sm:$0xff] }
  0x15   : > { %782 = vmatmul.msk.f32.vlgmr.msra.gmra.mxu2 %vm233_vm1, %v216_v3  ;;  %v224_v7 = vld [vmem:[%s908_s23 + $0xc0] sm:$0xff]  ;;  %v225_v11 = vld [vmem:[%s908_s23 + $0xc8] sm:$0xff]  ;;  %v203_v12 = vld [vmem:[%s908_s23 + $0x18] sm:$0xff] }
  0x16   : > { %790 = vmatmul.msk.f32.vlgmr.msra.gmra.mxu3 %vm233_vm1, %v224_v7  ;;  %v211_v13 = vld [vmem:[%s908_s23 + $0x58] sm:$0xff]  ;;  %v226_v15 = vld [vmem:[%s908_s23 + $0xd0] sm:$0xff]  ;;  %v204_v16 = vld [vmem:[%s908_s23 + $0x20] sm:$0xff] }
  0x17   : > { %v219_v14 = vld [vmem:[%s908_s23 + $0x98] sm:$0xff]  ;;  %v212_v17 = vld [vmem:[%s908_s23 + $0x60] sm:$0xff]  ;;  %v205_v20 = vld [vmem:[%s908_s23 + $0x28] sm:$0xff] }
  0x18   : > { %v227_v18 = vld [vmem:[%s908_s23 + $0xd8] sm:$0xff]  ;;  %v220_v19 = vld [vmem:[%s908_s23 + $0xa0] sm:$0xff]  ;;  %v213_v21 = vld [vmem:[%s908_s23 + $0x68] sm:$0xff] }
  0x19   : > { %v228_v22 = vld [vmem:[%s908_s23 + $0xe0] sm:$0xff]  ;;  %v221_v23 = vld [vmem:[%s908_s23 + $0xa8] sm:$0xff]  ;;  %v206_v24 = vld [vmem:[%s908_s23 + $0x30] sm:$0xff] }
  0x1a   : > { %v214_v25 = vld [vmem:[%s908_s23 + $0x70] sm:$0xff]  ;;  %v229_v26 = vld [vmem:[%s908_s23 + $0xe8] sm:$0xff]  ;;  %v207_v28 = vld [vmem:[%s908_s23 + $0x38] sm:$0xff] }
  0x1b   : > { %767 = vmatmul.msk.f32.gmra.mxu0 %vm233_vm1, %v201_v4  ;;  %v222_v27 = vld [vmem:[%s908_s23 + $0xb0] sm:$0xff]  ;;  %v215_v29 = vld [vmem:[%s908_s23 + $0x78] sm:$0xff] }
  0x1c   : > { %775 = vmatmul.msk.f32.gmra.mxu1 %vm233_vm1, %v209_v5  ;;  %v230_v30 = vld [vmem:[%s908_s23 + $0xf0] sm:$0xff]  ;;  %v223_v31 = vld [vmem:[%s908_s23 + $0xb8] sm:$0xff] }
  0x1d   : > { %783 = vmatmul.msk.f32.gmra.mxu2 %vm233_vm1, %v217_v6  ;;  %v231_v32 = vld [vmem:[%s908_s23 + $0xf8] sm:$0xff] }
  0x1e   : > { %791 = vmatmul.msk.f32.gmra.mxu3 %vm233_vm1, %v225_v11 }
  0x23   : > { %768 = vmatmul.msk.f32.gmra.mxu0 %vm233_vm1, %v202_v8 }
  0x24   : > { %776 = vmatmul.msk.f32.gmra.mxu1 %vm233_vm1, %v210_v9 }
  0x25   : > { %784 = vmatmul.msk.f32.gmra.mxu2 %vm233_vm1, %v218_v10 }
  0x26   : > { %792 = vmatmul.msk.f32.gmra.mxu3 %vm233_vm1, %v226_v15 }
  0x2b   : > { %769 = vmatmul.msk.f32.gmra.mxu0 %vm233_vm1, %v203_v12 }
  0x2c   : > { %777 = vmatmul.msk.f32.gmra.mxu1 %vm233_vm1, %v211_v13 }
  0x2d   : > { %785 = vmatmul.msk.f32.gmra.mxu2 %vm233_vm1, %v219_v14 }
  0x2e   : > { %793 = vmatmul.msk.f32.gmra.mxu3 %vm233_vm1, %v227_v18 }
  0x33   : > { %770 = vmatmul.msk.f32.gmra.mxu0 %vm233_vm1, %v204_v16 }
  0x34   : > { %778 = vmatmul.msk.f32.gmra.mxu1 %vm233_vm1, %v212_v17 }
  0x35   : > { %786 = vmatmul.msk.f32.gmra.mxu2 %vm233_vm1, %v220_v19 }
  0x36   : > { %794 = vmatmul.msk.f32.gmra.mxu3 %vm233_vm1, %v228_v22 }
  0x3b   : > { %771 = vmatmul.msk.f32.gmra.mxu0 %vm233_vm1, %v205_v20 }
  0x3c   : > { %779 = vmatmul.msk.f32.gmra.mxu1 %vm233_vm1, %v213_v21 }
  0x3d   : > { %787 = vmatmul.msk.f32.gmra.mxu2 %vm233_vm1, %v221_v23 }
  0x3e   : > { %795 = vmatmul.msk.f32.gmra.mxu3 %vm233_vm1, %v229_v26 }
  0x43   : > { %772 = vmatmul.msk.f32.gmra.mxu0 %vm233_vm1, %v206_v24 }
  0x44   : > { %780 = vmatmul.msk.f32.gmra.mxu1 %vm233_vm1, %v214_v25 }
  0x45   : > { %788 = vmatmul.msk.f32.gmra.mxu2 %vm233_vm1, %v222_v27 }
  0x46   : > { %796 = vmatmul.msk.f32.gmra.mxu3 %vm233_vm1, %v230_v30 }
  0x4b   : > { %773 = vmatmul.msk.f32.gmra.mxu0 %vm233_vm1, %v207_v28 }
  0x4c   : > { %781 = vmatmul.msk.f32.gmra.mxu1 %vm233_vm1, %v215_v29 }
  0x4d   : > { %789 = vmatmul.msk.f32.gmra.mxu2 %vm233_vm1, %v223_v31 }
  0x4e   : > { %797 = vmatmul.msk.f32.gmra.mxu3 %vm233_vm1, %v231_v32 }
  0x90   : > { %v351_v33 = vpop.f32.mrf.mxu0 }
  0x91   : > { %v981_v34 = vpop.f32.mrf.mxu1  ;;  %448 = vst.msk [vmem:[%s979_s26] sm:$0xff] %vm447_vm2, %v351_v33  ;;  %v549_v55 = vmul.f32 %v351_v33, %v351_v33  ;;  %v480_v58 = vsel %vm447_vm2, %v351_v33, 0.0 }
  0x92   : > { %456 = vst.msk [vmem:[%s979_s26 + $0x40] sm:$0xff] %vm447_vm2, %v981_v34  ;;  %v557_v28 = vmul.f32 %v981_v34, %v981_v34 }
  0x93   : > { %v581_v63 = vsel %vm447_vm2, %v549_v55, 0.0 }
  0x94   : > { %v596_v55 = vsel %vm447_vm2, %v557_v28, 0.0 }
  0x98   : > { %v354_v35 = vpop.f32.mrf.mxu0  ;;  %v992_v37 = vpop.f32.mrf.mxu2 }
  0x99   : > { %v988_v36 = vpop.f32.mrf.mxu1  ;;  %449 = vst.msk [vmem:[%s979_s26 + $0x8] sm:$0xff] %vm447_vm2, %v354_v35  ;;  %v1006_v41 = vpop.f32.mrf.mxu3  ;;  %v550_v52 = vmul.f32 %v354_v35, %v354_v35  ;;  %v481_v56 = vsel %vm447_vm2, %v354_v35, 0.0 }
  0x9a   : > { %457 = vst.msk [vmem:[%s979_s26 + $0x48] sm:$0xff] %vm447_vm2, %v988_v36  ;;  %v482_v62 = vadd.f32 %v481_v56, %v480_v58  ;;  %v497_v56 = vsel %vm447_vm2, %v988_v36, 0.0 }
  0x9b   : > { %464 = vst.msk [vmem:[%s979_s26 + $0x80] sm:$0xff] %vm447_vm2, %v992_v37  ;;  %v582_v59 = vsel %vm447_vm2, %v550_v52, 0.0 }
  0x9c   : > { %472 = vst.msk [vmem:[%s979_s26 + $0xc0] sm:$0xff] %vm447_vm2, %v1006_v41  ;;  %v583_v3 = vadd.f32 %v582_v59, %v581_v63 }
  0xa0   : > { %v357_v38 = vpop.f32.mrf.mxu0  ;;  %v1004_v40 = vpop.f32.mrf.mxu2 }
  0xa1   : > { %v1000_v39 = vpop.f32.mrf.mxu1  ;;  %450 = vst.msk [vmem:[%s979_s26 + $0x10] sm:$0xff] %vm447_vm2, %v357_v38  ;;  %v1023_v45 = vpop.f32.mrf.mxu3  ;;  %v551_v57 = vmul.f32 %v357_v38, %v357_v38  ;;  %v483_v60 = vsel %vm447_vm2, %v357_v38, 0.0  ;;  %v495_v38 = vsel %vm447_vm2, %v981_v34, 0.0 }
  0xa2   : > { %458 = vst.msk [vmem:[%s979_s26 + $0x50] sm:$0xff] %vm447_vm2, %v1000_v39  ;;  %v484_v4 = vadd.f32 %v483_v60, %v482_v62  ;;  %v559_v34 = vmul.f32 %v1000_v39, %v1000_v39  ;;  %v499_v60 = vsel %vm447_vm2, %v1000_v39, 0.0 }
  0xa3   : > { %465 = vst.msk [vmem:[%s979_s26 + $0x88] sm:$0xff] %vm447_vm2, %v1004_v40  ;;  %v584_v0 = vsel %vm447_vm2, %v551_v57, 0.0 }
  0xa4   : > { %473 = vst.msk [vmem:[%s979_s26 + $0xc8] sm:$0xff] %vm447_vm2, %v1023_v45  ;;  %v585_v12 = vadd.f32 %v584_v0, %v583_v3  ;;  %v600_v0 = vsel %vm447_vm2, %v559_v34, 0.0 }
  0xa8   : > { %v360_v42 = vpop.f32.mrf.mxu0  ;;  %v1021_v44 = vpop.f32.mrf.mxu2 }
  0xa9   : > { %v1017_v43 = vpop.f32.mrf.mxu1  ;;  %451 = vst.msk [vmem:[%s979_s26 + $0x18] sm:$0xff] %vm447_vm2, %v360_v42  ;;  %v1040_v49 = vpop.f32.mrf.mxu3  ;;  %v552_v61 = vmul.f32 %v360_v42, %v360_v42  ;;  %v485_v1 = vsel %vm447_vm2, %v360_v42, 0.0  ;;  %v558_v42 = vmul.f32 %v988_v36, %v988_v36 }
  0xaa   : > { %459 = vst.msk [vmem:[%s979_s26 + $0x58] sm:$0xff] %vm447_vm2, %v1017_v43  ;;  %v486_v13 = vadd.f32 %v485_v1, %v484_v4  ;;  %v501_v36 = vsel %vm447_vm2, %v1017_v43, 0.0 }
  0xab   : > { %466 = vst.msk [vmem:[%s979_s26 + $0x90] sm:$0xff] %vm447_vm2, %v1021_v44  ;;  %v586_v7 = vsel %vm447_vm2, %v552_v61, 0.0  ;;  %v598_v59 = vsel %vm447_vm2, %v558_v42, 0.0  ;;  %v560_v61 = vmul.f32 %v1017_v43, %v1017_v43 }
  0xac   : > { %474 = vst.msk [vmem:[%s979_s26 + $0xd0] sm:$0xff] %vm447_vm2, %v1040_v49  ;;  %v587_v17 = vadd.f32 %v586_v7, %v585_v12 }
  0xad   : > { %v602_v39 = vsel %vm447_vm2, %v560_v61, 0.0 }
  0xb0   : > { %v363_v46 = vpop.f32.mrf.mxu0  ;;  %v1038_v48 = vpop.f32.mrf.mxu2 }
  0xb1   : > { %v1034_v47 = vpop.f32.mrf.mxu1  ;;  %452 = vst.msk [vmem:[%s979_s26 + $0x20] sm:$0xff] %vm447_vm2, %v363_v46  ;;  %v1057_v54 = vpop.f32.mrf.mxu3  ;;  %v553_v2 = vmul.f32 %v363_v46, %v363_v46  ;;  %v487_v8 = vsel %vm447_vm2, %v363_v46, 0.0 }
  0xb2   : > { %460 = vst.msk [vmem:[%s979_s26 + $0x60] sm:$0xff] %vm447_vm2, %v1034_v47  ;;  %v488_v18 = vadd.f32 %v487_v8, %v486_v13  ;;  %v561_v1 = vmul.f32 %v1034_v47, %v1034_v47  ;;  %v503_v7 = vsel %vm447_vm2, %v1034_v47, 0.0 }
  0xb3   : > { %467 = vst.msk [vmem:[%s979_s26 + $0x98] sm:$0xff] %vm447_vm2, %v1038_v48  ;;  %v588_v14 = vsel %vm447_vm2, %v553_v2, 0.0 }
  0xb4   : > { %475 = vst.msk [vmem:[%s979_s26 + $0xd8] sm:$0xff] %vm447_vm2, %v1057_v54  ;;  %v589_v21 = vadd.f32 %v588_v14, %v587_v17  ;;  %v604_v12 = vsel %vm447_vm2, %v561_v1, 0.0 }
  0xb8   : > { %v366_v50 = vpop.f32.mrf.mxu0  ;;  %v1055_v53 = vpop.f32.mrf.mxu2 }
  0xb9   : > { %v1051_v51 = vpop.f32.mrf.mxu1  ;;  %453 = vst.msk [vmem:[%s979_s26 + $0x28] sm:$0xff] %vm447_vm2, %v366_v50  ;;  %v554_v9 = vmul.f32 %v366_v50, %v366_v50  ;;  %v1083_v11 = vpop.f32.mrf.mxu3  ;;  %v489_v15 = vsel %vm447_vm2, %v366_v50, 0.0  ;;  %v569_v34 = vmul.f32 %v1055_v53, %v1055_v53 }
  0xba   : > { %461 = vst.msk [vmem:[%s979_s26 + $0x68] sm:$0xff] %vm447_vm2, %v1051_v51  ;;  %v490_v22 = vadd.f32 %v489_v15, %v488_v18  ;;  %v562_v8 = vmul.f32 %v1051_v51, %v1051_v51  ;;  %v505_v13 = vsel %vm447_vm2, %v1051_v51, 0.0 }
  0xbb   : > { %468 = vst.msk [vmem:[%s979_s26 + $0xa0] sm:$0xff] %vm447_vm2, %v1055_v53  ;;  %v590_v19 = vsel %vm447_vm2, %v554_v9, 0.0 }
  0xbc   : > { %476 = vst.msk [vmem:[%s979_s26 + $0xe0] sm:$0xff] %vm447_vm2, %v1083_v11  ;;  %v591_v24 = vadd.f32 %v590_v19, %v589_v21  ;;  %v606_v17 = vsel %vm447_vm2, %v562_v8, 0.0 }
  0xc0   : > { %v369_v5 = vpop.f32.mrf.mxu0  ;;  %v1081_v10 = vpop.f32.mrf.mxu2 }
  0xc1   : > { %v1075_v6 = vpop.f32.mrf.mxu1  ;;  %454 = vst.msk [vmem:[%s979_s26 + $0x30] sm:$0xff] %vm447_vm2, %v369_v5  ;;  %v555_v16 = vmul.f32 %v369_v5, %v369_v5  ;;  %v491_v20 = vsel %vm447_vm2, %v369_v5, 0.0  ;;  %v1106_v32 = vpop.f32.mrf.mxu3 }
  0xc2   : > { %462 = vst.msk [vmem:[%s979_s26 + $0x70] sm:$0xff] %vm447_vm2, %v1075_v6  ;;  %v492_v25 = vadd.f32 %v491_v20, %v490_v22  ;;  %v563_v14 = vmul.f32 %v1075_v6, %v1075_v6  ;;  %v507_v18 = vsel %vm447_vm2, %v1075_v6, 0.0  ;;  %v565_v22 = vmul.f32 %v992_v37, %v992_v37 }
  0xc3   : > { %469 = vst.msk [vmem:[%s979_s26 + $0xa8] sm:$0xff] %vm447_vm2, %v1081_v10  ;;  %v592_v23 = vsel %vm447_vm2, %v555_v16, 0.0  ;;  %v511_v6 = vsel %vm447_vm2, %v992_v37, 0.0  ;;  %v515_v37 = vsel %vm447_vm2, %v1021_v44, 0.0 }
  0xc4   : > { %v593_v33 = vadd.f32 %v592_v23, %v591_v24  ;;  %477 = vst.msk [vmem:[%s979_s26 + $0xe8] sm:$0xff] %vm447_vm2, %v1106_v32  ;;  %v608_v51 = vsel %vm447_vm2, %v563_v14, 0.0  ;;  %v527_v14 = vsel %vm447_vm2, %v1006_v41, 0.0 }
  0xc8   : > { %v372_v26 = vpop.f32.mrf.mxu0  ;;  %v1104_v31 = vpop.f32.mrf.mxu2 }
  0xc9   : > { %v396_v27 = vpop.f32.mrf.mxu1  ;;  %455 = vst.msk [vmem:[%s979_s26 + $0x38] sm:$0xff] %vm447_vm2, %v372_v26  ;;  %v493_v29 = vsel %vm447_vm2, %v372_v26, 0.0  ;;  %v556_v30 = vmul.f32 %v372_v26, %v372_v26  ;;  %v1136_v3 = vpop.f32.mrf.mxu3 }
  0xca   : > { %v494_v35 = vadd.f32 %v493_v29, %v492_v25  ;;  %463 = vst.msk [vmem:[%s979_s26 + $0x78] sm:$0xff] %vm447_vm2, %v396_v27  ;;  %v564_v15 = vmul.f32 %v396_v27, %v396_v27  ;;  %v509_v19 = vsel %vm447_vm2, %v396_v27, 0.0  ;;  %v566_v27 = vmul.f32 %v1004_v40, %v1004_v40 }
  0xcb   : > { %v594_v46 = vsel %vm447_vm2, %v556_v30, 0.0  ;;  %470 = vst.msk [vmem:[%s979_s26 + $0xb0] sm:$0xff] %vm447_vm2, %v1104_v31  ;;  %v612_v30 = vsel %vm447_vm2, %v565_v22, 0.0 }
  0xcc   : > { %v496_v50 = vadd.f32 %v495_v38, %v494_v35  ;;  %v595_v52 = vadd.f32 %v594_v46, %v593_v33  ;;  %478 = vst.msk [vmem:[%s979_s26 + $0xf0] sm:$0xff] %vm447_vm2, %v1136_v3  ;;  %v610_v23 = vsel %vm447_vm2, %v564_v15, 0.0  ;;  %v513_v33 = vsel %vm447_vm2, %v1004_v40, 0.0 }
  0xcd   : > { %v567_v35 = vmul.f32 %v1021_v44, %v1021_v44  ;;  %v614_v46 = vsel %vm447_vm2, %v566_v27, 0.0  ;;  %v517_v40 = vsel %vm447_vm2, %v1038_v48, 0.0  ;;  %v519_v44 = vsel %vm447_vm2, %v1055_v53, 0.0 }
  0xce   : > { %v498_v57 = vadd.f32 %v497_v56, %v496_v50  ;;  %v597_v58 = vadd.f32 %v596_v55, %v595_v52  ;;  %v568_v50 = vmul.f32 %v1038_v48, %v1038_v48  ;;  %v521_v48 = vsel %vm447_vm2, %v1081_v10, 0.0 }
  0xcf   : > { %v616_v56 = vsel %vm447_vm2, %v567_v35, 0.0  ;;  %v523_v53 = vsel %vm447_vm2, %v1104_v31, 0.0  ;;  %v574_v15 = vmul.f32 %v1023_v45, %v1023_v45  ;;  %v579_v35 = vmul.f32 %v1136_v3, %v1136_v3 }
  0xd0   : > { %v500_v62 = vadd.f32 %v499_v60, %v498_v57  ;;  %v599_v63 = vadd.f32 %v598_v59, %v597_v58  ;;  %v420_v2 = vpop.f32.mrf.mxu2  ;;  %v618_v59 = vsel %vm447_vm2, %v568_v50, 0.0  ;;  %v570_v60 = vmul.f32 %v1081_v10, %v1081_v10 }
  0xd1   : > { %471 = vst.msk [vmem:[%s979_s26 + $0xb8] sm:$0xff] %vm447_vm2, %v420_v2  ;;  %v1161_v24 = vpop.f32.mrf.mxu3 }
  0xd2   : > { %v601_v4 = vadd.f32 %v600_v0, %v599_v63  ;;  %v502_v5 = vadd.f32 %v501_v36, %v500_v62  ;;  %479 = vst.msk [vmem:[%s979_s26 + $0xf8] sm:$0xff] %vm447_vm2, %v1161_v24  ;;  %v620_v63 = vsel %vm447_vm2, %v569_v34, 0.0  ;;  %v571_v0 = vmul.f32 %v1104_v31, %v1104_v31 }
  0xd3   : > { %v572_v36 = vmul.f32 %v420_v2, %v420_v2  ;;  %v541_v50 = vsel %vm447_vm2, %v1161_v24, 0.0 }
  0xd4   : > { %v504_v43 = vadd.f32 %v503_v7, %v502_v5  ;;  %v603_v9 = vadd.f32 %v602_v39, %v601_v4  ;;  %v622_v5 = vsel %vm447_vm2, %v570_v60, 0.0  ;;  %v525_v39 = vsel %vm447_vm2, %v420_v2, 0.0 }
  0xd5   : > { %v624_v10 = vsel %vm447_vm2, %v571_v0, 0.0 }
  0xd6   : > { %v506_v16 = vadd.f32 %v505_v13, %v504_v43  ;;  %v605_v47 = vadd.f32 %v604_v12, %v603_v9  ;;  %v573_v43 = vmul.f32 %v1006_v41, %v1006_v41  ;;  %v626_v9 = vsel %vm447_vm2, %v572_v36, 0.0 }
  0xd7   : > { %v531_v41 = vsel %vm447_vm2, %v1040_v49, 0.0 }
  0xd8   : > { %v607_v20 = vadd.f32 %v606_v17, %v605_v47  ;;  %v508_v21 = vadd.f32 %v507_v18, %v506_v16  ;;  %v628_v2 = vsel %vm447_vm2, %v573_v43, 0.0  ;;  %v529_v47 = vsel %vm447_vm2, %v1023_v45, 0.0 }
  0xd9   : > { %v575_v17 = vmul.f32 %v1040_v49, %v1040_v49  ;;  %v533_v45 = vsel %vm447_vm2, %v1057_v54, 0.0  ;;  %v535_v49 = vsel %vm447_vm2, %v1083_v11, 0.0 }
  0xda   : > { %v609_v25 = vadd.f32 %v608_v51, %v607_v20  ;;  %v510_v26 = vadd.f32 %v509_v19, %v508_v21  ;;  %v630_v20 = vsel %vm447_vm2, %v574_v15, 0.0  ;;  %v576_v21 = vmul.f32 %v1057_v54, %v1057_v54 }
  0xdb   : > { %v537_v54 = vsel %vm447_vm2, %v1106_v32, 0.0 }
  0xdc   : > { %v512_v28 = vadd.f32 %v511_v6, %v510_v26  ;;  %v611_v29 = vadd.f32 %v610_v23, %v609_v25  ;;  %v632_v23 = vsel %vm447_vm2, %v575_v17, 0.0  ;;  %v577_v25 = vmul.f32 %v1083_v11, %v1083_v11 }
  0xdd   : > { %v634_v27 = vsel %vm447_vm2, %v576_v21, 0.0 }
  0xde   : > { %v514_v38 = vadd.f32 %v513_v33, %v512_v28  ;;  %v613_v42 = vadd.f32 %v612_v30, %v611_v29  ;;  %v578_v28 = vmul.f32 %v1106_v32, %v1106_v32  ;;  %v636_v33 = vsel %vm447_vm2, %v577_v25, 0.0 }
  0xe0   : > { %v516_v52 = vadd.f32 %v515_v37, %v514_v38  ;;  %v615_v55 = vadd.f32 %v614_v46, %v613_v42  ;;  %v580_v38 = vmul.f32 %v1161_v24, %v1161_v24  ;;  %v638_v11 = vsel %vm447_vm2, %v578_v28, 0.0 }
  0xe1   : > { %v539_v37 = vsel %vm447_vm2, %v1136_v3, 0.0 }
  0xe2   : > { %v617_v57 = vadd.f32 %v616_v56, %v615_v55  ;;  %v518_v58 = vadd.f32 %v517_v40, %v516_v52  ;;  %v640_v55 = vsel %vm447_vm2, %v579_v35, 0.0  ;;  %v642_v56 = vsel %vm447_vm2, %v580_v38, 0.0 }
  0xe4   : > { %v520_v61 = vadd.f32 %v519_v44, %v518_v58  ;;  %v619_v62 = vadd.f32 %v618_v59, %v617_v57 }
  0xe6   : > { %v522_v1 = vadd.f32 %v521_v48, %v520_v61  ;;  %v621_v4 = vadd.f32 %v620_v63, %v619_v62 }
  0xe8   : > { %v623_v7 = vadd.f32 %v622_v5, %v621_v4  ;;  %v524_v8 = vadd.f32 %v523_v53, %v522_v1 }
  0xea   : > { %v625_v12 = vadd.f32 %v624_v10, %v623_v7  ;;  %v526_v13 = vadd.f32 %v525_v39, %v524_v8 }
  0xec   : > { %v528_v31 = vadd.f32 %v527_v14, %v526_v13  ;;  %v627_v16 = vadd.f32 %v626_v9, %v625_v12 }
  0xee   : > { %v530_v18 = vadd.f32 %v529_v47, %v528_v31  ;;  %v629_v19 = vadd.f32 %v628_v2, %v627_v16 }
  0xf0   : > { %v532_v22 = vadd.f32 %v531_v41, %v530_v18  ;;  %v631_v51 = vadd.f32 %v630_v20, %v629_v19 }
  0xf2   : > { %v633_v26 = vadd.f32 %v632_v23, %v631_v51  ;;  %v534_v6 = vadd.f32 %v533_v45, %v532_v22 }
  0xf4   : > { %v536_v29 = vadd.f32 %v535_v49, %v534_v6  ;;  %v635_v30 = vadd.f32 %v634_v27, %v633_v26 }
  0xf6   : > { %v538_v42 = vadd.f32 %v537_v54, %v536_v29  ;;  %v637_v46 = vadd.f32 %v636_v33, %v635_v30 }
  0xf8   : > { %v639_v52 = vadd.f32 %v638_v11, %v637_v46  ;;  %v540_v32 = vadd.f32 %v539_v37, %v538_v42 }
  0xfa   : > { %v641_v40 = vadd.f32 %v640_v55, %v639_v52  ;;  %v542_v34 = vadd.f32 %v541_v50, %v540_v32 }
  0xfc   : > { %v543_v57 = vrot.slane %v542_v34, 4  ;;  %v643_v58 = vadd.f32 %v642_v56, %v641_v40 }
  0xfe   : > { %v544_v59 = vadd.f32 %v543_v57, %v542_v34  ;;  %v644_v44 = vrot.slane %v643_v58, 4 }
 0x100   : > { %v545_v60 = vrot.slane %v544_v59, 2  ;;  %v645_v61 = vadd.f32 %v644_v44, %v643_v58 }
 0x102   : > { %v546_v3 = vadd.f32 %v545_v60, %v544_v59  ;;  %v646_v62 = vrot.slane %v645_v61, 2 }
 0x104   : > { %v547_v63 = vrot.slane %v546_v3, 1  ;;  %v647_v24 = vadd.f32 %v646_v62, %v645_v61 }
 0x106   : > { %v648_v48 = vrot.slane %v647_v24, 1  ;;  %v548_v0 = vadd.f32 %v547_v63, %v546_v3 }
 0x108   : > { %v649_v36 = vadd.f32 %v648_v48, %v647_v24 }
 0x10a   : > { %v651_v1 = vsel %vm650_vm3, %v548_v0, %v649_v36 }
 0x10b   : > { %653 = vst.msk [vmem:[%s199_s30] sm:$0x3] %vm652_vm4, %v651_v1 }
 0x10c PF: > { %s15_s12 = sadd.s32 1, %s862_s12  }
 0x10d   : > { %p12_p8 = scmp.ge.s32.totalorder %s15_s12, 4  }
 0x10f   :  { %14 = sbr.rel (!%p12_p8) target bundleno = 1 (0x1), region = 75 }
 0x114   :  { %690 = vsyncpa [#allocation3], 1 }
 0x115   :  { %692 = vsyncpa [#allocation3 + $0x1], 1 }

// kernel: _lambda_.7
= control target key start
LH: loop header
LB: loop body
LE: loop exit
PB: predicated region body
PF: predicated region fallthrough
CT: control target
= control target key end

     0   :  { %s448_s12 = smov 0   ;;  %s639_s0 = inlined_call_operand.vmem [shape: f32[512,8], index: 0, kind: input, shape index: {}]   ;;  %s640_s1 = inlined_call_operand.vmem [shape: f32[1,8], index: 1, kind: input, shape index: {}]   ;;  %s641_s2 = inlined_call_operand.vmem [shape: f32[1,8], index: 2, kind: input, shape index: {}]   ;;  %s642_s3 = inlined_call_operand.vmem [shape: f32[512,8], index: 3, kind: output, shape index: {}]  }
   0x1 LB: > { %s399_s13 = sadd.s32 4294967295, %s426_s12   ;;  %p403_p0 = scmp.ge.s32.totalorder %s426_s12, 1  ;;  %s426_s12 = sphi %s448_s12, %s13_s12  }
   0x2   : > { %p138_p1 = scmp.lt.s32.totalorder %s426_s12, 3 }
   0x4   : > { %p139_p2 = pnand %p403_p0, %p138_p1 }
   0x5   : > { %s404_s14 = sshll.u32 (!%p139_p2), %s399_s13, 5 }
   0x6   : > { %142 = sbr.rel (%p139_p2) target bundleno = 53 (0x35), region = 32  ;;  %p163_p3 = scmp.lt.s32.totalorder (!%p139_p2), %s404_s14, 63 }
   0xb   : > { %s644_s14 = smov (!%p163_p3, %s404_s14), 63  ;;  %v459_v0 = vld [vmem:[%s640_s1] ss:$0 sm:$0xff]  ;;  %vm310_vm0 = vcmask 64512  }
   0xc   : > { %s405_s17 = sshll.u32 %s644_s14, 3  ;;  %v469_v1 = vld [vmem:[%s641_s2] ss:$0 sm:$0xff] }
   0xd   : > { %s464_s20 = scalar_lea.vmem %s639_s0, %s405_s17  ;;  %s492_s25 = scalar_lea.vmem %s642_s3, %s405_s17 }
   0xe   : > { %v174_v2 = vld [vmem:[%s464_s20] sm:$0xff]  ;;  %v175_v3 = vld [vmem:[%s464_s20 + $0x8] sm:$0xff]  ;;  %v176_v4 = vld [vmem:[%s464_s20 + $0x10] sm:$0xff] }
   0xf   : > { %v210_v5 = vmul.f32 %v459_v0, %v174_v2  ;;  %v211_v6 = vmul.f32 %v459_v0, %v175_v3  ;;  %v212_v7 = vmul.f32 %v459_v0, %v176_v4  ;;  %v177_v8 = vld [vmem:[%s464_s20 + $0x18] sm:$0xff]  ;;  %v178_v9 = vld [vmem:[%s464_s20 + $0x20] sm:$0xff]  ;;  %v179_v10 = vld [vmem:[%s464_s20 + $0x28] sm:$0xff] }
  0x10   : > { %v213_v11 = vmul.f32 %v459_v0, %v177_v8  ;;  %v214_v12 = vmul.f32 %v459_v0, %v178_v9  ;;  %v215_v13 = vmul.f32 %v459_v0, %v179_v10  ;;  %v180_v14 = vld [vmem:[%s464_s20 + $0x30] sm:$0xff]  ;;  %v181_v15 = vld [vmem:[%s464_s20 + $0x38] sm:$0xff]  ;;  %v182_v24 = vld [vmem:[%s464_s20 + $0x40] sm:$0xff] }
  0x11   : > { %v246_v16 = vadd.f32 %v469_v1, %v210_v5  ;;  %v247_v17 = vadd.f32 %v469_v1, %v211_v6  ;;  %v248_v18 = vadd.f32 %v469_v1, %v212_v7  ;;  %v216_v19 = vmul.f32 %v459_v0, %v180_v14  ;;  %v183_v25 = vld [vmem:[%s464_s20 + $0x48] sm:$0xff]  ;;  %v184_v26 = vld [vmem:[%s464_s20 + $0x50] sm:$0xff]  ;;  %v185_v31 = vld [vmem:[%s464_s20 + $0x58] sm:$0xff] }
  0x12   : > { %v249_v20 = vadd.f32 %v469_v1, %v213_v11  ;;  %v250_v21 = vadd.f32 %v469_v1, %v214_v12  ;;  %v251_v22 = vadd.f32 %v469_v1, %v215_v13  ;;  %v217_v23 = vmul.f32 %v459_v0, %v181_v15  ;;  %v186_v32 = vld [vmem:[%s464_s20 + $0x60] sm:$0xff]  ;;  %v187_v33 = vld [vmem:[%s464_s20 + $0x68] sm:$0xff]  ;;  %v188_v37 = vld [vmem:[%s464_s20 + $0x70] sm:$0xff] }
  0x13   : > { %v278_v27 = vmax.f32 %v246_v16, 0.0  ;;  %v279_v28 = vmax.f32 %v247_v17, 0.0  ;;  %v280_v29 = vmax.f32 %v248_v18, 0.0  ;;  %v252_v30 = vadd.f32 %v469_v1, %v216_v19  ;;  %v189_v42 = vld [vmem:[%s464_s20 + $0x78] sm:$0xff]  ;;  %v190_v54 = vld [vmem:[%s464_s20 + $0x80] sm:$0xff]  ;;  %v191_v55 = vld [vmem:[%s464_s20 + $0x88] sm:$0xff] }
  0x14   : > { %v281_v34 = vmax.f32 %v249_v20, 0.0  ;;  %v282_v35 = vmax.f32 %v250_v21, 0.0  ;;  %v253_v36 = vadd.f32 %v469_v1, %v217_v23  ;;  %v283_v38 = vmax.f32 %v251_v22, 0.0  ;;  %v192_v56 = vld [vmem:[%s464_s20 + $0x90] sm:$0xff]  ;;  %v193_v59 = vld [vmem:[%s464_s20 + $0x98] sm:$0xff]  ;;  %v194_v63 = vld [vmem:[%s464_s20 + $0xa0] sm:$0xff] }
  0x15   : > { %311 = vst.msk [vmem:[%s492_s25] sm:$0xff] %vm310_vm0, %v278_v27  ;;  %v218_v39 = vmul.f32 %v459_v0, %v182_v24  ;;  %v219_v40 = vmul.f32 %v459_v0, %v183_v25  ;;  %v220_v41 = vmul.f32 %v459_v0, %v184_v26  ;;  %v284_v43 = vmax.f32 %v252_v30, 0.0  ;;  %v195_v6 = vld [vmem:[%s464_s20 + $0xa8] sm:$0xff]  ;;  %v196_v10 = vld [vmem:[%s464_s20 + $0xb0] sm:$0xff]  ;;  %v197_v14 = vld [vmem:[%s464_s20 + $0xb8] sm:$0xff] }
  0x16   : > { %312 = vst.msk [vmem:[%s492_s25 + $0x8] sm:$0xff] %vm310_vm0, %v279_v28  ;;  %v221_v44 = vmul.f32 %v459_v0, %v185_v31  ;;  %v222_v45 = vmul.f32 %v459_v0, %v186_v32  ;;  %v223_v46 = vmul.f32 %v459_v0, %v187_v33  ;;  %v224_v50 = vmul.f32 %v459_v0, %v188_v37  ;;  %v198_v18 = vld [vmem:[%s464_s20 + $0xc0] sm:$0xff]  ;;  %v199_v22 = vld [vmem:[%s464_s20 + $0xc8] sm:$0xff]  ;;  %v200_v26 = vld [vmem:[%s464_s20 + $0xd0] sm:$0xff] }
  0x17   : > { %313 = vst.msk [vmem:[%s492_s25 + $0x10] sm:$0xff] %vm310_vm0, %v280_v29  ;;  %v254_v47 = vadd.f32 %v469_v1, %v218_v39  ;;  %v255_v48 = vadd.f32 %v469_v1, %v219_v40  ;;  %v256_v49 = vadd.f32 %v469_v1, %v220_v41  ;;  %v285_v51 = vmax.f32 %v253_v36, 0.0  ;;  %v201_v30 = vld [vmem:[%s464_s20 + $0xd8] sm:$0xff] }
  0x18   : > { %314 = vst.msk [vmem:[%s492_s25 + $0x18] sm:$0xff] %vm310_vm0, %v281_v34  ;;  %v257_v52 = vadd.f32 %v469_v1, %v221_v44  ;;  %v225_v53 = vmul.f32 %v459_v0, %v189_v42  ;;  %v258_v58 = vadd.f32 %v469_v1, %v222_v45  ;;  %v259_v62 = vadd.f32 %v469_v1, %v223_v46  ;;  %v202_v34 = vld [vmem:[%s464_s20 + $0xe0] sm:$0xff]  ;;  %v204_v42 = vld [vmem:[%s464_s20 + $0xf0] sm:$0xff]  ;;  %v205_v46 = vld [vmem:[%s464_s20 + $0xf8] sm:$0xff] }
  0x19   : > { %315 = vst.msk [vmem:[%s492_s25 + $0x20] sm:$0xff] %vm310_vm0, %v282_v35  ;;  %v286_v57 = vmax.f32 %v254_v47, 0.0  ;;  %v287_v60 = vmax.f32 %v255_v48, 0.0  ;;  %v288_v61 = vmax.f32 %v256_v49, 0.0  ;;  %v260_v2 = vadd.f32 %v469_v1, %v224_v50 }
  0x1a   : > { %316 = vst.msk [vmem:[%s492_s25 + $0x28] sm:$0xff] %vm310_vm0, %v283_v38  ;;  %v226_v3 = vmul.f32 %v459_v0, %v190_v54  ;;  %v227_v4 = vmul.f32 %v459_v0, %v191_v55  ;;  %v228_v5 = vmul.f32 %v459_v0, %v192_v56  ;;  %v289_v7 = vmax.f32 %v257_v52, 0.0  ;;  %v203_v38 = vld [vmem:[%s464_s20 + $0xe8] sm:$0xff] }
  0x1b   : > { %317 = vst.msk [vmem:[%s492_s25 + $0x30] sm:$0xff] %vm310_vm0, %v284_v43  ;;  %v261_v8 = vadd.f32 %v469_v1, %v225_v53  ;;  %v229_v9 = vmul.f32 %v459_v0, %v193_v59  ;;  %v290_v11 = vmax.f32 %v258_v58, 0.0  ;;  %v230_v13 = vmul.f32 %v459_v0, %v194_v63 }
  0x1c   : > { %318 = vst.msk [vmem:[%s492_s25 + $0x38] sm:$0xff] %vm310_vm0, %v285_v51  ;;  %v262_v12 = vadd.f32 %v469_v1, %v226_v3  ;;  %v291_v15 = vmax.f32 %v259_v62, 0.0  ;;  %v263_v16 = vadd.f32 %v469_v1, %v227_v4  ;;  %v231_v17 = vmul.f32 %v459_v0, %v195_v6 }
  0x1d   : > { %319 = vst.msk [vmem:[%s492_s25 + $0x40] sm:$0xff] %vm310_vm0, %v286_v57  ;;  %v292_v19 = vmax.f32 %v260_v2, 0.0  ;;  %v264_v20 = vadd.f32 %v469_v1, %v228_v5  ;;  %v232_v21 = vmul.f32 %v459_v0, %v196_v10  ;;  %v293_v23 = vmax.f32 %v261_v8, 0.0 }
  0x1e   : > { %320 = vst.msk [vmem:[%s492_s25 + $0x48] sm:$0xff] %vm310_vm0, %v287_v60  ;;  %v265_v24 = vadd.f32 %v469_v1, %v229_v9  ;;  %v233_v25 = vmul.f32 %v459_v0, %v197_v14  ;;  %v294_v27 = vmax.f32 %v262_v12, 0.0  ;;  %v266_v28 = vadd.f32 %v469_v1, %v230_v13 }
  0x1f   : > { %321 = vst.msk [vmem:[%s492_s25 + $0x50] sm:$0xff] %vm310_vm0, %v288_v61  ;;  %v234_v29 = vmul.f32 %v459_v0, %v198_v18  ;;  %v295_v31 = vmax.f32 %v263_v16, 0.0  ;;  %v267_v32 = vadd.f32 %v469_v1, %v231_v17  ;;  %v235_v33 = vmul.f32 %v459_v0, %v199_v22 }
  0x20   : > { %322 = vst.msk [vmem:[%s492_s25 + $0x58] sm:$0xff] %vm310_vm0, %v289_v7  ;;  %v296_v35 = vmax.f32 %v264_v20, 0.0  ;;  %v268_v36 = vadd.f32 %v469_v1, %v232_v21  ;;  %v236_v37 = vmul.f32 %v459_v0, %v200_v26  ;;  %v297_v39 = vmax.f32 %v265_v24, 0.0 }
  0x21   : > { %323 = vst.msk [vmem:[%s492_s25 + $0x60] sm:$0xff] %vm310_vm0, %v290_v11  ;;  %v269_v40 = vadd.f32 %v469_v1, %v233_v25  ;;  %v237_v41 = vmul.f32 %v459_v0, %v201_v30  ;;  %v298_v43 = vmax.f32 %v266_v28, 0.0  ;;  %v270_v44 = vadd.f32 %v469_v1, %v234_v29 }
  0x22   : > { %324 = vst.msk [vmem:[%s492_s25 + $0x68] sm:$0xff] %vm310_vm0, %v291_v15  ;;  %v238_v45 = vmul.f32 %v459_v0, %v202_v34  ;;  %v299_v47 = vmax.f32 %v267_v32, 0.0  ;;  %v271_v48 = vadd.f32 %v469_v1, %v235_v33  ;;  %v239_v49 = vmul.f32 %v459_v0, %v203_v38 }
  0x23   : > { %325 = vst.msk [vmem:[%s492_s25 + $0x70] sm:$0xff] %vm310_vm0, %v292_v19  ;;  %v300_v50 = vmax.f32 %v268_v36, 0.0  ;;  %v272_v51 = vadd.f32 %v469_v1, %v236_v37  ;;  %v240_v52 = vmul.f32 %v459_v0, %v204_v42  ;;  %v301_v53 = vmax.f32 %v269_v40, 0.0 }
  0x24   : > { %326 = vst.msk [vmem:[%s492_s25 + $0x78] sm:$0xff] %vm310_vm0, %v293_v23  ;;  %v273_v54 = vadd.f32 %v469_v1, %v237_v41  ;;  %v241_v55 = vmul.f32 %v459_v0, %v205_v46  ;;  %v302_v56 = vmax.f32 %v270_v44, 0.0  ;;  %v274_v57 = vadd.f32 %v469_v1, %v238_v45 }
  0x25   : > { %327 = vst.msk [vmem:[%s492_s25 + $0x80] sm:$0xff] %vm310_vm0, %v294_v27  ;;  %v303_v58 = vmax.f32 %v271_v48, 0.0  ;;  %v275_v59 = vadd.f32 %v469_v1, %v239_v49  ;;  %v304_v60 = vmax.f32 %v272_v51, 0.0  ;;  %v276_v0 = vadd.f32 %v469_v1, %v240_v52 }
  0x26   : > { %328 = vst.msk [vmem:[%s492_s25 + $0x88] sm:$0xff] %vm310_vm0, %v295_v31  ;;  %v305_v61 = vmax.f32 %v273_v54, 0.0  ;;  %v277_v62 = vadd.f32 %v469_v1, %v241_v55  ;;  %v306_v63 = vmax.f32 %v274_v57, 0.0 }
  0x27   : > { %329 = vst.msk [vmem:[%s492_s25 + $0x90] sm:$0xff] %vm310_vm0, %v296_v35  ;;  %v307_v2 = vmax.f32 %v275_v59, 0.0  ;;  %v308_v3 = vmax.f32 %v276_v0, 0.0 }
  0x28   : > { %330 = vst.msk [vmem:[%s492_s25 + $0x98] sm:$0xff] %vm310_vm0, %v297_v39  ;;  %v309_v4 = vmax.f32 %v277_v62, 0.0 }
  0x29   : > { %331 = vst.msk [vmem:[%s492_s25 + $0xa0] sm:$0xff] %vm310_vm0, %v298_v43 }
  0x2a   : > { %332 = vst.msk [vmem:[%s492_s25 + $0xa8] sm:$0xff] %vm310_vm0, %v299_v47 }
  0x2b   : > { %333 = vst.msk [vmem:[%s492_s25 + $0xb0] sm:$0xff] %vm310_vm0, %v300_v50 }
  0x2c   : > { %334 = vst.msk [vmem:[%s492_s25 + $0xb8] sm:$0xff] %vm310_vm0, %v301_v53 }
  0x2d   : > { %335 = vst.msk [vmem:[%s492_s25 + $0xc0] sm:$0xff] %vm310_vm0, %v302_v56 }
  0x2e   : > { %336 = vst.msk [vmem:[%s492_s25 + $0xc8] sm:$0xff] %vm310_vm0, %v303_v58 }
  0x2f   : > { %337 = vst.msk [vmem:[%s492_s25 + $0xd0] sm:$0xff] %vm310_vm0, %v304_v60 }
  0x30   : > { %338 = vst.msk [vmem:[%s492_s25 + $0xd8] sm:$0xff] %vm310_vm0, %v305_v61 }
  0x31   : > { %339 = vst.msk [vmem:[%s492_s25 + $0xe0] sm:$0xff] %vm310_vm0, %v306_v63 }
  0x32   : > { %340 = vst.msk [vmem:[%s492_s25 + $0xe8] sm:$0xff] %vm310_vm0, %v307_v2 }
  0x33   : > { %341 = vst.msk [vmem:[%s492_s25 + $0xf0] sm:$0xff] %vm310_vm0, %v308_v3 }
  0x34   : > { %342 = vst.msk [vmem:[%s492_s25 + $0xf8] sm:$0xff] %vm310_vm0, %v309_v4 }
  0x35 PF: > { %s13_s12 = sadd.s32 1, %s426_s12  }
  0x36   : > { %p10_p4 = scmp.ge.s32.totalorder %s13_s12, 4  }
  0x38   :  { %12 = sbr.rel (!%p10_p4) target bundleno = 1 (0x1), region = 62 }

// kernel: _lambda_.8
= control target key start
LH: loop header
LB: loop body
LE: loop exit
PB: predicated region body
PF: predicated region fallthrough
CT: control target
= control target key end

     0   :  { %s826_s12 = smov 0   ;;  %s1201_s0 = inlined_call_operand.vmem [shape: f32[512,36], index: 0, kind: input, shape index: {}]   ;;  %s1202_s1 = inlined_call_operand.vmem [shape: f32[36,8], index: 1, kind: input, shape index: {}]   ;;  %s1203_s2 = inlined_call_operand.vmem [shape: f32[512,8], index: 2, kind: output, shape index: {0}]   ;;  %s1204_s3 = inlined_call_operand.vmem [shape: f32[2,2,8], index: 3, kind: output, shape index: {1}]  }
   0x1 LB: > { %s832_s13 = sadd.s32 4294967295, %s804_s12   ;;  %p734_p0 = scmp.ge.s32.totalorder %s804_s12, 1  ;;  %s804_s12 = sphi %s826_s12, %s14_s12  }
   0x2   : > { %p141_p1 = scmp.lt.s32.totalorder %s804_s12, 3 }
   0x4   : > { %p142_p2 = pnand %p734_p0, %p141_p1 }
   0x5   : > { %s735_s18 = sshll.u32 (!%p142_p2), %s832_s13, 5  ;;  %p181_p4 = scmp.lt.s32.totalorder (!%p142_p2), %s832_s13, 1 }
   0x6   : > { %145 = sbr.rel (%p142_p2) target bundleno = 270 (0x10e), region = 28  ;;  %p170_p3 = scmp.lt.s32.totalorder (!%p142_p2), %s735_s18, 63 }
   0xb   : > { %v221_v0 = vld [vmem:[%s1202_s1 + $0x20] sm:$0xf]  ;;  %vm319_vm0 = vcmask 1043456   ;;  %v220_v1 = vld [vmem:[%s1202_s1 + $0x18] sm:$0xff]  ;;  %v219_v2 = vld [vmem:[%s1202_s1 + $0x10] sm:$0xff]  ;;  %s1206_s18 = smov (!%p170_p3, %s735_s18), 63 }
   0xc   : > { %740 = vmatpush.msk.msra.mxu0 %vm319_vm0, %v221_v0  ;;  %775 = vmatpush.msk.msra.mxu1 %vm319_vm0, %v221_v0  ;;  %v218_v3 = vld [vmem:[%s1202_s1 + $0x8] sm:$0xff]  ;;  %s736_s23 = sshll.u32 %s1206_s18, 3  ;;  %v217_v4 = vld [vmem:[%s1202_s1] sm:$0xff]  ;;  %vm222_vm1 = vcmask 293888   ;;  %vm436_vm2 = vcmask 64512   ;;  %s1208_s13 = smov (!%p181_p4, %s832_s13), 1 }
   0xd   : > { %776 = vmatpush.msk.msra.mxu2 %vm319_vm0, %v221_v0  ;;  %777 = vmatpush.msk.msra.mxu3 %vm319_vm0, %v221_v0  ;;  %s860_s28 = scalar_lea.vmem %s1201_s0, %s736_s23  ;;  %s931_s4 = scalar_lea.vmem %s1203_s2, %s736_s23  ;;  %vm639_vm3 = vcmask 1040384   ;;  %vm641_vm4 = vcmask 58368  }
   0xe   : > { %335 = vmatpush.msra.mxu0 %v220_v1  ;;  %778 = vmatpush.msra.mxu1 %v220_v1  ;;  %v185_v5 = vld [vmem:[%s860_s28] sm:$0xff]  ;;  %v186_v8 = vld [vmem:[%s860_s28 + $0x8] sm:$0xff]  ;;  %v187_v12 = vld [vmem:[%s860_s28 + $0x10] sm:$0xff]  ;;  %s739_s5 = sshll.u32 %s1208_s13, 1 }
   0xf   : > { %779 = vmatpush.msra.mxu2 %v220_v1  ;;  %780 = vmatpush.msra.mxu3 %v220_v1  ;;  %v193_v6 = vld [vmem:[%s860_s28 + $0x40] sm:$0xff]  ;;  %v194_v9 = vld [vmem:[%s860_s28 + $0x48] sm:$0xff]  ;;  %v195_v13 = vld [vmem:[%s860_s28 + $0x50] sm:$0xff]  ;;  %s184_s8 = scalar_lea.vmem %s1204_s3, %s739_s5 }
  0x10   : > { %336 = vmatpush.msra.mxu0 %v219_v2  ;;  %781 = vmatpush.msra.mxu1 %v219_v2  ;;  %v201_v7 = vld [vmem:[%s860_s28 + $0x80] sm:$0xff]  ;;  %v202_v10 = vld [vmem:[%s860_s28 + $0x88] sm:$0xff]  ;;  %v203_v14 = vld [vmem:[%s860_s28 + $0x90] sm:$0xff] }
  0x11   : > { %782 = vmatpush.msra.mxu2 %v219_v2  ;;  %783 = vmatpush.msra.mxu3 %v219_v2  ;;  %v209_v11 = vld [vmem:[%s860_s28 + $0xc0] sm:$0xff]  ;;  %v210_v15 = vld [vmem:[%s860_s28 + $0xc8] sm:$0xff]  ;;  %v188_v16 = vld [vmem:[%s860_s28 + $0x18] sm:$0xff] }
  0x12   : > { %337 = vmatpush.msra.mxu0 %v218_v3  ;;  %784 = vmatpush.msra.mxu1 %v218_v3  ;;  %v196_v17 = vld [vmem:[%s860_s28 + $0x58] sm:$0xff]  ;;  %v211_v19 = vld [vmem:[%s860_s28 + $0xd0] sm:$0xff]  ;;  %v189_v20 = vld [vmem:[%s860_s28 + $0x20] sm:$0xff] }
  0x13   : > { %785 = vmatpush.msra.mxu2 %v218_v3  ;;  %786 = vmatpush.msra.mxu3 %v218_v3  ;;  %v204_v18 = vld [vmem:[%s860_s28 + $0x98] sm:$0xff]  ;;  %v197_v21 = vld [vmem:[%s860_s28 + $0x60] sm:$0xff]  ;;  %v190_v24 = vld [vmem:[%s860_s28 + $0x28] sm:$0xff] }
  0x14   : > { %338 = vmatpush.msra.mxu0 %v217_v4  ;;  %787 = vmatpush.msra.mxu1 %v217_v4  ;;  %v212_v22 = vld [vmem:[%s860_s28 + $0xd8] sm:$0xff]  ;;  %v205_v23 = vld [vmem:[%s860_s28 + $0xa0] sm:$0xff]  ;;  %v198_v25 = vld [vmem:[%s860_s28 + $0x68] sm:$0xff] }
  0x15   : > { %741 = vmatmul.msk.f32.vlgmr.msra.gmra.mxu0 %vm222_vm1, %v185_v5  ;;  %749 = vmatmul.msk.f32.vlgmr.msra.gmra.mxu1 %vm222_vm1, %v193_v6  ;;  %v213_v26 = vld [vmem:[%s860_s28 + $0xe0] sm:$0xff]  ;;  %v206_v27 = vld [vmem:[%s860_s28 + $0xa8] sm:$0xff]  ;;  %v191_v28 = vld [vmem:[%s860_s28 + $0x30] sm:$0xff] }
  0x16   : > { %788 = vmatpush.msra.mxu2 %v217_v4  ;;  %789 = vmatpush.msra.mxu3 %v217_v4  ;;  %v199_v29 = vld [vmem:[%s860_s28 + $0x70] sm:$0xff]  ;;  %v214_v30 = vld [vmem:[%s860_s28 + $0xe8] sm:$0xff]  ;;  %v192_v32 = vld [vmem:[%s860_s28 + $0x38] sm:$0xff] }
  0x17   : > { %757 = vmatmul.msk.f32.vlgmr.msra.gmra.mxu2 %vm222_vm1, %v201_v7  ;;  %765 = vmatmul.msk.f32.vlgmr.msra.gmra.mxu3 %vm222_vm1, %v209_v11  ;;  %v207_v31 = vld [vmem:[%s860_s28 + $0xb0] sm:$0xff]  ;;  %v200_v33 = vld [vmem:[%s860_s28 + $0x78] sm:$0xff] }
  0x18   : > { %v215_v34 = vld [vmem:[%s860_s28 + $0xf0] sm:$0xff]  ;;  %v208_v35 = vld [vmem:[%s860_s28 + $0xb8] sm:$0xff] }
  0x19   : > { %v216_v36 = vld [vmem:[%s860_s28 + $0xf8] sm:$0xff] }
  0x1d   : > { %742 = vmatmul.msk.f32.gmra.mxu0 %vm222_vm1, %v186_v8  ;;  %750 = vmatmul.msk.f32.gmra.mxu1 %vm222_vm1, %v194_v9 }
  0x1f   : > { %758 = vmatmul.msk.f32.gmra.mxu2 %vm222_vm1, %v202_v10  ;;  %766 = vmatmul.msk.f32.gmra.mxu3 %vm222_vm1, %v210_v15 }
  0x25   : > { %743 = vmatmul.msk.f32.gmra.mxu0 %vm222_vm1, %v187_v12  ;;  %751 = vmatmul.msk.f32.gmra.mxu1 %vm222_vm1, %v195_v13 }
  0x27   : > { %759 = vmatmul.msk.f32.gmra.mxu2 %vm222_vm1, %v203_v14  ;;  %767 = vmatmul.msk.f32.gmra.mxu3 %vm222_vm1, %v211_v19 }
  0x2d   : > { %744 = vmatmul.msk.f32.gmra.mxu0 %vm222_vm1, %v188_v16  ;;  %752 = vmatmul.msk.f32.gmra.mxu1 %vm222_vm1, %v196_v17 }
  0x2f   : > { %760 = vmatmul.msk.f32.gmra.mxu2 %vm222_vm1, %v204_v18  ;;  %768 = vmatmul.msk.f32.gmra.mxu3 %vm222_vm1, %v212_v22 }
  0x35   : > { %745 = vmatmul.msk.f32.gmra.mxu0 %vm222_vm1, %v189_v20  ;;  %753 = vmatmul.msk.f32.gmra.mxu1 %vm222_vm1, %v197_v21 }
  0x37   : > { %761 = vmatmul.msk.f32.gmra.mxu2 %vm222_vm1, %v205_v23  ;;  %769 = vmatmul.msk.f32.gmra.mxu3 %vm222_vm1, %v213_v26 }
  0x3d   : > { %746 = vmatmul.msk.f32.gmra.mxu0 %vm222_vm1, %v190_v24  ;;  %754 = vmatmul.msk.f32.gmra.mxu1 %vm222_vm1, %v198_v25 }
  0x3f   : > { %762 = vmatmul.msk.f32.gmra.mxu2 %vm222_vm1, %v206_v27  ;;  %770 = vmatmul.msk.f32.gmra.mxu3 %vm222_vm1, %v214_v30 }
  0x45   : > { %747 = vmatmul.msk.f32.gmra.mxu0 %vm222_vm1, %v191_v28  ;;  %755 = vmatmul.msk.f32.gmra.mxu1 %vm222_vm1, %v199_v29 }
  0x47   : > { %763 = vmatmul.msk.f32.gmra.mxu2 %vm222_vm1, %v207_v31  ;;  %771 = vmatmul.msk.f32.gmra.mxu3 %vm222_vm1, %v215_v34 }
  0x4d   : > { %748 = vmatmul.msk.f32.gmra.mxu0 %vm222_vm1, %v192_v32  ;;  %756 = vmatmul.msk.f32.gmra.mxu1 %vm222_vm1, %v200_v33 }
  0x4f   : > { %764 = vmatmul.msk.f32.gmra.mxu2 %vm222_vm1, %v208_v35  ;;  %772 = vmatmul.msk.f32.gmra.mxu3 %vm222_vm1, %v216_v36 }
  0x92   : > { %v340_v37 = vpop.f32.mrf.mxu0  ;;  %v933_v38 = vpop.f32.mrf.mxu1 }
  0x93   : > { %437 = vst.msk [vmem:[%s931_s4] sm:$0xff] %vm436_vm2, %v340_v37  ;;  %v538_v59 = vmul.f32 %v340_v37, %v340_v37  ;;  %v469_v62 = vsel %vm436_vm2, %v340_v37, 0.0  ;;  %v546_v32 = vmul.f32 %v933_v38, %v933_v38 }
  0x94   : > { %445 = vst.msk [vmem:[%s931_s4 + $0x40] sm:$0xff] %vm436_vm2, %v933_v38 }
  0x95   : > { %v570_v3 = vsel %vm436_vm2, %v538_v59, 0.0  ;;  %v585_v59 = vsel %vm436_vm2, %v546_v32, 0.0 }
  0x9a   : > { %v343_v39 = vpop.f32.mrf.mxu0  ;;  %v940_v40 = vpop.f32.mrf.mxu1 }
  0x9b   : > { %438 = vst.msk [vmem:[%s931_s4 + $0x8] sm:$0xff] %vm436_vm2, %v343_v39  ;;  %v944_v41 = vpop.f32.mrf.mxu2  ;;  %v958_v45 = vpop.f32.mrf.mxu3  ;;  %v539_v56 = vmul.f32 %v343_v39, %v343_v39  ;;  %v470_v60 = vsel %vm436_vm2, %v343_v39, 0.0 }
  0x9c   : > { %446 = vst.msk [vmem:[%s931_s4 + $0x48] sm:$0xff] %vm436_vm2, %v940_v40  ;;  %v471_v2 = vadd.f32 %v470_v60, %v469_v62  ;;  %v486_v60 = vsel %vm436_vm2, %v940_v40, 0.0 }
  0x9d   : > { %453 = vst.msk [vmem:[%s931_s4 + $0x80] sm:$0xff] %vm436_vm2, %v944_v41  ;;  %v571_v63 = vsel %vm436_vm2, %v539_v56, 0.0 }
  0x9e   : > { %461 = vst.msk [vmem:[%s931_s4 + $0xc0] sm:$0xff] %vm436_vm2, %v958_v45  ;;  %v572_v7 = vadd.f32 %v571_v63, %v570_v3 }
  0xa2   : > { %v346_v42 = vpop.f32.mrf.mxu0  ;;  %v952_v43 = vpop.f32.mrf.mxu1 }
  0xa3   : > { %439 = vst.msk [vmem:[%s931_s4 + $0x10] sm:$0xff] %vm436_vm2, %v346_v42  ;;  %v956_v44 = vpop.f32.mrf.mxu2  ;;  %v975_v49 = vpop.f32.mrf.mxu3  ;;  %v540_v61 = vmul.f32 %v346_v42, %v346_v42  ;;  %v472_v0 = vsel %vm436_vm2, %v346_v42, 0.0  ;;  %v484_v42 = vsel %vm436_vm2, %v933_v38, 0.0  ;;  %v548_v38 = vmul.f32 %v952_v43, %v952_v43 }
  0xa4   : > { %447 = vst.msk [vmem:[%s931_s4 + $0x50] sm:$0xff] %vm436_vm2, %v952_v43  ;;  %v473_v8 = vadd.f32 %v472_v0, %v471_v2  ;;  %v488_v0 = vsel %vm436_vm2, %v952_v43, 0.0 }
  0xa5   : > { %454 = vst.msk [vmem:[%s931_s4 + $0x88] sm:$0xff] %vm436_vm2, %v956_v44  ;;  %v573_v4 = vsel %vm436_vm2, %v540_v61, 0.0 }
  0xa6   : > { %462 = vst.msk [vmem:[%s931_s4 + $0xc8] sm:$0xff] %vm436_vm2, %v975_v49  ;;  %v574_v16 = vadd.f32 %v573_v4, %v572_v7  ;;  %v589_v4 = vsel %vm436_vm2, %v548_v38, 0.0 }
  0xaa   : > { %v349_v46 = vpop.f32.mrf.mxu0  ;;  %v969_v47 = vpop.f32.mrf.mxu1 }
  0xab   : > { %440 = vst.msk [vmem:[%s931_s4 + $0x18] sm:$0xff] %vm436_vm2, %v349_v46  ;;  %v973_v48 = vpop.f32.mrf.mxu2  ;;  %v992_v53 = vpop.f32.mrf.mxu3  ;;  %v541_v1 = vmul.f32 %v349_v46, %v349_v46  ;;  %v474_v5 = vsel %vm436_vm2, %v349_v46, 0.0  ;;  %v547_v46 = vmul.f32 %v940_v40, %v940_v40  ;;  %v490_v40 = vsel %vm436_vm2, %v969_v47, 0.0 }
  0xac   : > { %448 = vst.msk [vmem:[%s931_s4 + $0x58] sm:$0xff] %vm436_vm2, %v969_v47  ;;  %v475_v17 = vadd.f32 %v474_v5, %v473_v8 }
  0xad   : > { %455 = vst.msk [vmem:[%s931_s4 + $0x90] sm:$0xff] %vm436_vm2, %v973_v48  ;;  %v575_v11 = vsel %vm436_vm2, %v541_v1, 0.0  ;;  %v587_v63 = vsel %vm436_vm2, %v547_v46, 0.0  ;;  %v549_v1 = vmul.f32 %v969_v47, %v969_v47 }
  0xae   : > { %463 = vst.msk [vmem:[%s931_s4 + $0xd0] sm:$0xff] %vm436_vm2, %v992_v53  ;;  %v576_v21 = vadd.f32 %v575_v11, %v574_v16 }
  0xaf   : > { %v591_v43 = vsel %vm436_vm2, %v549_v1, 0.0 }
  0xb2   : > { %v352_v50 = vpop.f32.mrf.mxu0  ;;  %v986_v51 = vpop.f32.mrf.mxu1 }
  0xb3   : > { %441 = vst.msk [vmem:[%s931_s4 + $0x20] sm:$0xff] %vm436_vm2, %v352_v50  ;;  %v990_v52 = vpop.f32.mrf.mxu2  ;;  %v1009_v58 = vpop.f32.mrf.mxu3  ;;  %v542_v6 = vmul.f32 %v352_v50, %v352_v50  ;;  %v476_v12 = vsel %vm436_vm2, %v352_v50, 0.0  ;;  %v550_v5 = vmul.f32 %v986_v51, %v986_v51  ;;  %v492_v11 = vsel %vm436_vm2, %v986_v51, 0.0 }
  0xb4   : > { %449 = vst.msk [vmem:[%s931_s4 + $0x60] sm:$0xff] %vm436_vm2, %v986_v51  ;;  %v477_v22 = vadd.f32 %v476_v12, %v475_v17 }
  0xb5   : > { %456 = vst.msk [vmem:[%s931_s4 + $0x98] sm:$0xff] %vm436_vm2, %v990_v52  ;;  %v577_v18 = vsel %vm436_vm2, %v542_v6, 0.0  ;;  %v593_v16 = vsel %vm436_vm2, %v550_v5, 0.0 }
  0xb6   : > { %464 = vst.msk [vmem:[%s931_s4 + $0xd8] sm:$0xff] %vm436_vm2, %v1009_v58  ;;  %v578_v25 = vadd.f32 %v577_v18, %v576_v21 }
  0xba   : > { %v355_v54 = vpop.f32.mrf.mxu0  ;;  %v1003_v55 = vpop.f32.mrf.mxu1 }
  0xbb   : > { %442 = vst.msk [vmem:[%s931_s4 + $0x28] sm:$0xff] %vm436_vm2, %v355_v54  ;;  %v1007_v57 = vpop.f32.mrf.mxu2  ;;  %v543_v13 = vmul.f32 %v355_v54, %v355_v54  ;;  %v1035_v15 = vpop.f32.mrf.mxu3  ;;  %v478_v19 = vsel %vm436_vm2, %v355_v54, 0.0  ;;  %v551_v12 = vmul.f32 %v1003_v55, %v1003_v55  ;;  %v494_v17 = vsel %vm436_vm2, %v1003_v55, 0.0 }
  0xbc   : > { %450 = vst.msk [vmem:[%s931_s4 + $0x68] sm:$0xff] %vm436_vm2, %v1003_v55  ;;  %v479_v26 = vadd.f32 %v478_v19, %v477_v22  ;;  %v558_v38 = vmul.f32 %v1007_v57, %v1007_v57 }
  0xbd   : > { %457 = vst.msk [vmem:[%s931_s4 + $0xa0] sm:$0xff] %vm436_vm2, %v1007_v57  ;;  %v579_v23 = vsel %vm436_vm2, %v543_v13, 0.0  ;;  %v595_v21 = vsel %vm436_vm2, %v551_v12, 0.0 }
  0xbe   : > { %465 = vst.msk [vmem:[%s931_s4 + $0xe0] sm:$0xff] %vm436_vm2, %v1035_v15  ;;  %v580_v28 = vadd.f32 %v579_v23, %v578_v25 }
  0xc2   : > { %v358_v9 = vpop.f32.mrf.mxu0  ;;  %v1027_v10 = vpop.f32.mrf.mxu1 }
  0xc3   : > { %443 = vst.msk [vmem:[%s931_s4 + $0x30] sm:$0xff] %vm436_vm2, %v358_v9  ;;  %v1033_v14 = vpop.f32.mrf.mxu2  ;;  %v544_v20 = vmul.f32 %v358_v9, %v358_v9  ;;  %v480_v24 = vsel %vm436_vm2, %v358_v9, 0.0  ;;  %v1058_v36 = vpop.f32.mrf.mxu3  ;;  %v552_v18 = vmul.f32 %v1027_v10, %v1027_v10  ;;  %v496_v22 = vsel %vm436_vm2, %v1027_v10, 0.0 }
  0xc4   : > { %451 = vst.msk [vmem:[%s931_s4 + $0x70] sm:$0xff] %vm436_vm2, %v1027_v10  ;;  %v481_v29 = vadd.f32 %v480_v24, %v479_v26  ;;  %v554_v26 = vmul.f32 %v944_v41, %v944_v41  ;;  %v500_v10 = vsel %vm436_vm2, %v944_v41, 0.0  ;;  %v504_v41 = vsel %vm436_vm2, %v973_v48, 0.0 }
  0xc5   : > { %458 = vst.msk [vmem:[%s931_s4 + $0xa8] sm:$0xff] %vm436_vm2, %v1033_v14  ;;  %v581_v27 = vsel %vm436_vm2, %v544_v20, 0.0  ;;  %v597_v55 = vsel %vm436_vm2, %v552_v18, 0.0  ;;  %v516_v18 = vsel %vm436_vm2, %v958_v45, 0.0 }
  0xc6   : > { %v582_v37 = vadd.f32 %v581_v27, %v580_v28  ;;  %466 = vst.msk [vmem:[%s931_s4 + $0xe8] sm:$0xff] %vm436_vm2, %v1058_v36 }
  0xca   : > { %v361_v30 = vpop.f32.mrf.mxu0  ;;  %v385_v31 = vpop.f32.mrf.mxu1 }
  0xcb   : > { %444 = vst.msk [vmem:[%s931_s4 + $0x38] sm:$0xff] %vm436_vm2, %v361_v30  ;;  %v482_v33 = vsel %vm436_vm2, %v361_v30, 0.0  ;;  %v545_v34 = vmul.f32 %v361_v30, %v361_v30  ;;  %v1056_v35 = vpop.f32.mrf.mxu2  ;;  %v1088_v7 = vpop.f32.mrf.mxu3  ;;  %v553_v19 = vmul.f32 %v385_v31, %v385_v31  ;;  %v498_v23 = vsel %vm436_vm2, %v385_v31, 0.0 }
  0xcc   : > { %v483_v39 = vadd.f32 %v482_v33, %v481_v29  ;;  %452 = vst.msk [vmem:[%s931_s4 + $0x78] sm:$0xff] %vm436_vm2, %v385_v31  ;;  %v555_v31 = vmul.f32 %v956_v44, %v956_v44 }
  0xcd   : > { %v583_v50 = vsel %vm436_vm2, %v545_v34, 0.0  ;;  %459 = vst.msk [vmem:[%s931_s4 + $0xb0] sm:$0xff] %vm436_vm2, %v1056_v35  ;;  %v599_v27 = vsel %vm436_vm2, %v553_v19, 0.0  ;;  %v601_v34 = vsel %vm436_vm2, %v554_v26, 0.0  ;;  %v563_v19 = vmul.f32 %v975_v49, %v975_v49 }
  0xce   : > { %v485_v54 = vadd.f32 %v484_v42, %v483_v39  ;;  %v584_v56 = vadd.f32 %v583_v50, %v582_v37  ;;  %467 = vst.msk [vmem:[%s931_s4 + $0xf0] sm:$0xff] %vm436_vm2, %v1088_v7  ;;  %v502_v37 = vsel %vm436_vm2, %v956_v44, 0.0  ;;  %v556_v39 = vmul.f32 %v973_v48, %v973_v48 }
  0xcf   : > { %v603_v50 = vsel %vm436_vm2, %v555_v31, 0.0  ;;  %v506_v44 = vsel %vm436_vm2, %v990_v52, 0.0  ;;  %v508_v48 = vsel %vm436_vm2, %v1007_v57, 0.0  ;;  %v512_v57 = vsel %vm436_vm2, %v1056_v35, 0.0 }
  0xd0   : > { %v487_v61 = vadd.f32 %v486_v60, %v485_v54  ;;  %v586_v62 = vadd.f32 %v585_v59, %v584_v56  ;;  %v557_v54 = vmul.f32 %v990_v52, %v990_v52  ;;  %v605_v60 = vsel %vm436_vm2, %v556_v39, 0.0 }
  0xd1   : > { %v510_v52 = vsel %vm436_vm2, %v1033_v14, 0.0  ;;  %v568_v39 = vmul.f32 %v1088_v7, %v1088_v7 }
  0xd2   : > { %v489_v2 = vadd.f32 %v488_v0, %v487_v61  ;;  %v588_v3 = vadd.f32 %v587_v63, %v586_v62  ;;  %v607_v63 = vsel %vm436_vm2, %v557_v54, 0.0  ;;  %v559_v0 = vmul.f32 %v1033_v14, %v1033_v14 }
  0xd3   : > { %v409_v6 = vpop.f32.mrf.mxu2  ;;  %v1113_v28 = vpop.f32.mrf.mxu3 }
  0xd4   : > { %v590_v8 = vadd.f32 %v589_v4, %v588_v3  ;;  %v491_v9 = vadd.f32 %v490_v40, %v489_v2  ;;  %460 = vst.msk [vmem:[%s931_s4 + $0xb8] sm:$0xff] %vm436_vm2, %v409_v6  ;;  %v609_v3 = vsel %vm436_vm2, %v558_v38, 0.0  ;;  %v560_v4 = vmul.f32 %v1056_v35, %v1056_v35 }
  0xd5   : > { %468 = vst.msk [vmem:[%s931_s4 + $0xf8] sm:$0xff] %vm436_vm2, %v1113_v28  ;;  %v561_v40 = vmul.f32 %v409_v6, %v409_v6  ;;  %v530_v54 = vsel %vm436_vm2, %v1113_v28, 0.0 }
  0xd6   : > { %v493_v47 = vadd.f32 %v492_v11, %v491_v9  ;;  %v592_v13 = vadd.f32 %v591_v43, %v590_v8  ;;  %v611_v9 = vsel %vm436_vm2, %v559_v0, 0.0  ;;  %v514_v43 = vsel %vm436_vm2, %v409_v6, 0.0 }
  0xd7   : > { %v613_v14 = vsel %vm436_vm2, %v560_v4, 0.0 }
  0xd8   : > { %v495_v20 = vadd.f32 %v494_v17, %v493_v47  ;;  %v594_v51 = vadd.f32 %v593_v16, %v592_v13  ;;  %v562_v47 = vmul.f32 %v958_v45, %v958_v45  ;;  %v615_v13 = vsel %vm436_vm2, %v561_v40, 0.0 }
  0xd9   : > { %v520_v45 = vsel %vm436_vm2, %v992_v53, 0.0 }
  0xda   : > { %v596_v24 = vadd.f32 %v595_v21, %v594_v51  ;;  %v497_v25 = vadd.f32 %v496_v22, %v495_v20  ;;  %v617_v6 = vsel %vm436_vm2, %v562_v47, 0.0  ;;  %v518_v51 = vsel %vm436_vm2, %v975_v49, 0.0 }
  0xdb   : > { %v564_v21 = vmul.f32 %v992_v53, %v992_v53  ;;  %v522_v49 = vsel %vm436_vm2, %v1009_v58, 0.0  ;;  %v524_v53 = vsel %vm436_vm2, %v1035_v15, 0.0 }
  0xdc   : > { %v598_v29 = vadd.f32 %v597_v55, %v596_v24  ;;  %v499_v30 = vadd.f32 %v498_v23, %v497_v25  ;;  %v619_v24 = vsel %vm436_vm2, %v563_v19, 0.0  ;;  %v565_v25 = vmul.f32 %v1009_v58, %v1009_v58 }
  0xdd   : > { %v526_v58 = vsel %vm436_vm2, %v1058_v36, 0.0 }
  0xde   : > { %v501_v32 = vadd.f32 %v500_v10, %v499_v30  ;;  %v600_v33 = vadd.f32 %v599_v27, %v598_v29  ;;  %v621_v27 = vsel %vm436_vm2, %v564_v21, 0.0  ;;  %v566_v29 = vmul.f32 %v1035_v15, %v1035_v15 }
  0xdf   : > { %v623_v31 = vsel %vm436_vm2, %v565_v25, 0.0 }
  0xe0   : > { %v503_v42 = vadd.f32 %v502_v37, %v501_v32  ;;  %v602_v46 = vadd.f32 %v601_v34, %v600_v33  ;;  %v567_v32 = vmul.f32 %v1058_v36, %v1058_v36  ;;  %v625_v37 = vsel %vm436_vm2, %v566_v29, 0.0 }
  0xe2   : > { %v505_v56 = vadd.f32 %v504_v41, %v503_v42  ;;  %v604_v59 = vadd.f32 %v603_v50, %v602_v46  ;;  %v569_v42 = vmul.f32 %v1113_v28, %v1113_v28  ;;  %v627_v15 = vsel %vm436_vm2, %v567_v32, 0.0 }
  0xe3   : > { %v528_v41 = vsel %vm436_vm2, %v1088_v7, 0.0 }
  0xe4   : > { %v606_v61 = vadd.f32 %v605_v60, %v604_v59  ;;  %v507_v62 = vadd.f32 %v506_v44, %v505_v56  ;;  %v629_v59 = vsel %vm436_vm2, %v568_v39, 0.0  ;;  %v631_v60 = vsel %vm436_vm2, %v569_v42, 0.0 }
  0xe6   : > { %v509_v1 = vadd.f32 %v508_v48, %v507_v62  ;;  %v608_v2 = vadd.f32 %v607_v63, %v606_v61 }
  0xe8   : > { %v511_v5 = vadd.f32 %v510_v52, %v509_v1  ;;  %v610_v8 = vadd.f32 %v609_v3, %v608_v2 }
  0xea   : > { %v612_v11 = vadd.f32 %v611_v9, %v610_v8  ;;  %v513_v12 = vadd.f32 %v512_v57, %v511_v5 }
  0xec   : > { %v614_v16 = vadd.f32 %v613_v14, %v612_v11  ;;  %v515_v17 = vadd.f32 %v514_v43, %v513_v12 }
  0xee   : > { %v517_v35 = vadd.f32 %v516_v18, %v515_v17  ;;  %v616_v20 = vadd.f32 %v615_v13, %v614_v16 }
  0xf0   : > { %v519_v22 = vadd.f32 %v518_v51, %v517_v35  ;;  %v618_v23 = vadd.f32 %v617_v6, %v616_v20 }
  0xf2   : > { %v521_v26 = vadd.f32 %v520_v45, %v519_v22  ;;  %v620_v55 = vadd.f32 %v619_v24, %v618_v23 }
  0xf4   : > { %v622_v30 = vadd.f32 %v621_v27, %v620_v55  ;;  %v523_v10 = vadd.f32 %v522_v49, %v521_v26 }
  0xf6   : > { %v525_v33 = vadd.f32 %v524_v53, %v523_v10  ;;  %v624_v34 = vadd.f32 %v623_v31, %v622_v30 }
  0xf8   : > { %v527_v46 = vadd.f32 %v526_v58, %v525_v33  ;;  %v626_v50 = vadd.f32 %v625_v37, %v624_v34 }
  0xfa   : > { %v628_v56 = vadd.f32 %v627_v15, %v626_v50  ;;  %v529_v36 = vadd.f32 %v528_v41, %v527_v46 }
  0xfc   : > { %v630_v44 = vadd.f32 %v629_v59, %v628_v56  ;;  %v531_v38 = vadd.f32 %v530_v54, %v529_v36 }
  0xfe   : > { %v532_v61 = vrot.slane %v531_v38, 4  ;;  %v632_v62 = vadd.f32 %v631_v60, %v630_v44 }
 0x100   : > { %v533_v63 = vadd.f32 %v532_v61, %v531_v38  ;;  %v633_v48 = vrot.slane %v632_v62, 4 }
 0x102   : > { %v534_v0 = vrot.slane %v533_v63, 2  ;;  %v634_v1 = vadd.f32 %v633_v48, %v632_v62 }
 0x104   : > { %v535_v7 = vadd.f32 %v534_v0, %v533_v63  ;;  %v635_v2 = vrot.slane %v634_v1, 2 }
 0x106   : > { %v536_v3 = vrot.slane %v535_v7, 1  ;;  %v636_v28 = vadd.f32 %v635_v2, %v634_v1 }
 0x108   : > { %v637_v52 = vrot.slane %v636_v28, 1  ;;  %v537_v4 = vadd.f32 %v536_v3, %v535_v7 }
 0x10a   : > { %v638_v40 = vadd.f32 %v637_v52, %v636_v28 }
 0x10c   : > { %v640_v5 = vsel %vm639_vm3, %v537_v4, %v638_v40 }
 0x10d   : > { %642 = vst.msk [vmem:[%s184_s8] sm:$0x3] %vm641_vm4, %v640_v5 }
 0x10e PF: > { %s14_s12 = sadd.s32 1, %s804_s12  }
 0x10f   : > { %p11_p5 = scmp.ge.s32.totalorder %s14_s12, 4  }
 0x111   :  { %13 = sbr.rel (!%p11_p5) target bundleno = 1 (0x1), region = 70 }

// kernel: _lambda_.9
= control target key start
LH: loop header
LB: loop body
LE: loop exit
PB: predicated region body
PF: predicated region fallthrough
CT: control target
= control target key end

     0   :  { %s858_s12 = smov 0   ;;  %s1257_s0 = inlined_call_operand.vmem [shape: f32[512,100], index: 0, kind: input, shape index: {}]   ;;  %s1258_s1 = inlined_call_operand.vmem [shape: f32[100,8], index: 1, kind: input, shape index: {}]   ;;  %s1259_s2 = inlined_call_operand.vmem [shape: f32[512,8], index: 2, kind: output, shape index: {0}]   ;;  %s1260_s3 = inlined_call_operand.vmem [shape: f32[2,2,8], index: 3, kind: output, shape index: {1}]  }
   0x1 LB: > { %s864_s13 = sadd.s32 4294967295, %s836_s12   ;;  %p742_p0 = scmp.ge.s32.totalorder %s836_s12, 1  ;;  %s836_s12 = sphi %s858_s12, %s14_s12  }
   0x2   : > { %p141_p1 = scmp.lt.s32.totalorder %s836_s12, 3 }
   0x4   : > { %p142_p2 = pnand %p742_p0, %p141_p1 }
   0x5   : > { %s743_s24 = sshll.u32 (!%p142_p2), %s864_s13, 5  ;;  %p181_p4 = scmp.lt.s32.totalorder (!%p142_p2), %s864_s13, 1 }
   0x6   : > { %145 = sbr.rel (%p142_p2) target bundleno = 286 (0x11e), region = 28  ;;  %p170_p3 = scmp.lt.s32.totalorder (!%p142_p2), %s743_s24, 63 }
   0xb   : > { %v229_v0 = vld [vmem:[%s1258_s1 + $0x60] sm:$0xf]  ;;  %vm327_vm0 = vcmask 1043456   ;;  %v228_v1 = vld [vmem:[%s1258_s1 + $0x58] sm:$0xff]  ;;  %v227_v2 = vld [vmem:[%s1258_s1 + $0x50] sm:$0xff]  ;;  %s1262_s24 = smov (!%p170_p3, %s743_s24), 63 }
   0xc   : > { %748 = vmatpush.msk.msra.mxu0 %vm327_vm0, %v229_v0  ;;  %783 = vmatpush.msk.msra.mxu1 %vm327_vm0, %v229_v0  ;;  %v226_v3 = vld [vmem:[%s1258_s1 + $0x48] sm:$0xff]  ;;  %v225_v4 = vld [vmem:[%s1258_s1 + $0x40] sm:$0xff]  ;;  %v224_v5 = vld [vmem:[%s1258_s1 + $0x38] sm:$0xff]  ;;  %s744_s8 = sshll.u32 %s1262_s24, 3  ;;  %vm230_vm1 = vcmask 818176   ;;  %vm444_vm2 = vcmask 64512  }
   0xd   : > { %784 = vmatpush.msk.msra.mxu2 %vm327_vm0, %v229_v0  ;;  %785 = vmatpush.msk.msra.mxu3 %vm327_vm0, %v229_v0  ;;  %v223_v6 = vld [vmem:[%s1258_s1 + $0x30] sm:$0xff]  ;;  %v222_v7 = vld [vmem:[%s1258_s1 + $0x28] sm:$0xff]  ;;  %v221_v8 = vld [vmem:[%s1258_s1 + $0x20] sm:$0xff]  ;;  %s913_s17 = scalar_lea.vmem %s1257_s0, %s744_s8  ;;  %s987_s22 = scalar_lea.vmem %s1259_s2, %s744_s8  ;;  %vm647_vm3 = vcmask 1040384   ;;  %vm649_vm4 = vcmask 58368  }
   0xe   : > { %335 = vmatpush.msra.mxu0 %v228_v1  ;;  %786 = vmatpush.msra.mxu1 %v228_v1  ;;  %v220_v9 = vld [vmem:[%s1258_s1 + $0x18] sm:$0xff]  ;;  %v219_v10 = vld [vmem:[%s1258_s1 + $0x10] sm:$0xff]  ;;  %v218_v11 = vld [vmem:[%s1258_s1 + $0x8] sm:$0xff]  ;;  %s1264_s13 = smov (!%p181_p4, %s864_s13), 1 }
   0xf   : > { %787 = vmatpush.msra.mxu2 %v228_v1  ;;  %788 = vmatpush.msra.mxu3 %v228_v1  ;;  %v217_v12 = vld [vmem:[%s1258_s1] sm:$0xff]  ;;  %v186_v16 = vld [vmem:[%s913_s17 + $0x8] sm:$0xff]  ;;  %v187_v20 = vld [vmem:[%s913_s17 + $0x10] sm:$0xff]  ;;  %s747_s23 = sshll.u32 %s1264_s13, 1 }
  0x10   : > { %336 = vmatpush.msra.mxu0 %v227_v2  ;;  %789 = vmatpush.msra.mxu1 %v227_v2  ;;  %v185_v13 = vld [vmem:[%s913_s17] sm:$0xff]  ;;  %v194_v17 = vld [vmem:[%s913_s17 + $0x48] sm:$0xff]  ;;  %v195_v21 = vld [vmem:[%s913_s17 + $0x50] sm:$0xff]  ;;  %s184_s26 = scalar_lea.vmem %s1260_s3, %s747_s23 }
  0x11   : > { %790 = vmatpush.msra.mxu2 %v227_v2  ;;  %791 = vmatpush.msra.mxu3 %v227_v2  ;;  %v193_v14 = vld [vmem:[%s913_s17 + $0x40] sm:$0xff]  ;;  %v202_v18 = vld [vmem:[%s913_s17 + $0x88] sm:$0xff]  ;;  %v203_v22 = vld [vmem:[%s913_s17 + $0x90] sm:$0xff] }
  0x12   : > { %337 = vmatpush.msra.mxu0 %v226_v3  ;;  %792 = vmatpush.msra.mxu1 %v226_v3  ;;  %v201_v15 = vld [vmem:[%s913_s17 + $0x80] sm:$0xff]  ;;  %v210_v23 = vld [vmem:[%s913_s17 + $0xc8] sm:$0xff]  ;;  %v188_v24 = vld [vmem:[%s913_s17 + $0x18] sm:$0xff] }
  0x13   : > { %793 = vmatpush.msra.mxu2 %v226_v3  ;;  %794 = vmatpush.msra.mxu3 %v226_v3  ;;  %v209_v19 = vld [vmem:[%s913_s17 + $0xc0] sm:$0xff]  ;;  %v196_v25 = vld [vmem:[%s913_s17 + $0x58] sm:$0xff]  ;;  %v211_v27 = vld [vmem:[%s913_s17 + $0xd0] sm:$0xff] }
  0x14   : > { %338 = vmatpush.msra.mxu0 %v225_v4  ;;  %795 = vmatpush.msra.mxu1 %v225_v4  ;;  %v204_v26 = vld [vmem:[%s913_s17 + $0x98] sm:$0xff]  ;;  %v189_v28 = vld [vmem:[%s913_s17 + $0x20] sm:$0xff]  ;;  %v190_v32 = vld [vmem:[%s913_s17 + $0x28] sm:$0xff] }
  0x15   : > { %796 = vmatpush.msra.mxu2 %v225_v4  ;;  %797 = vmatpush.msra.mxu3 %v225_v4  ;;  %v197_v29 = vld [vmem:[%s913_s17 + $0x60] sm:$0xff]  ;;  %v212_v30 = vld [vmem:[%s913_s17 + $0xd8] sm:$0xff]  ;;  %v198_v33 = vld [vmem:[%s913_s17 + $0x68] sm:$0xff] }
  0x16   : > { %339 = vmatpush.msra.mxu0 %v224_v5  ;;  %798 = vmatpush.msra.mxu1 %v224_v5  ;;  %v205_v31 = vld [vmem:[%s913_s17 + $0xa0] sm:$0xff]  ;;  %v206_v35 = vld [vmem:[%s913_s17 + $0xa8] sm:$0xff]  ;;  %v191_v36 = vld [vmem:[%s913_s17 + $0x30] sm:$0xff] }
  0x17   : > { %799 = vmatpush.msra.mxu2 %v224_v5  ;;  %800 = vmatpush.msra.mxu3 %v224_v5  ;;  %v213_v34 = vld [vmem:[%s913_s17 + $0xe0] sm:$0xff]  ;;  %v199_v37 = vld [vmem:[%s913_s17 + $0x70] sm:$0xff]  ;;  %v214_v38 = vld [vmem:[%s913_s17 + $0xe8] sm:$0xff] }
  0x18   : > { %340 = vmatpush.msra.mxu0 %v223_v6  ;;  %801 = vmatpush.msra.mxu1 %v223_v6  ;;  %v207_v39 = vld [vmem:[%s913_s17 + $0xb0] sm:$0xff]  ;;  %v192_v40 = vld [vmem:[%s913_s17 + $0x38] sm:$0xff] }
  0x19   : > { %802 = vmatpush.msra.mxu2 %v223_v6  ;;  %803 = vmatpush.msra.mxu3 %v223_v6  ;;  %v200_v41 = vld [vmem:[%s913_s17 + $0x78] sm:$0xff]  ;;  %v215_v42 = vld [vmem:[%s913_s17 + $0xf0] sm:$0xff] }
  0x1a   : > { %341 = vmatpush.msra.mxu0 %v222_v7  ;;  %804 = vmatpush.msra.mxu1 %v222_v7  ;;  %v208_v43 = vld [vmem:[%s913_s17 + $0xb8] sm:$0xff] }
  0x1b   : > { %805 = vmatpush.msra.mxu2 %v222_v7  ;;  %806 = vmatpush.msra.mxu3 %v222_v7  ;;  %v216_v44 = vld [vmem:[%s913_s17 + $0xf8] sm:$0xff] }
  0x1c   : > { %342 = vmatpush.msra.mxu0 %v221_v8  ;;  %807 = vmatpush.msra.mxu1 %v221_v8 }
  0x1d   : > { %808 = vmatpush.msra.mxu2 %v221_v8  ;;  %809 = vmatpush.msra.mxu3 %v221_v8 }
  0x1e   : > { %343 = vmatpush.msra.mxu0 %v220_v9  ;;  %810 = vmatpush.msra.mxu1 %v220_v9 }
  0x1f   : > { %811 = vmatpush.msra.mxu2 %v220_v9  ;;  %812 = vmatpush.msra.mxu3 %v220_v9 }
  0x20   : > { %344 = vmatpush.msra.mxu0 %v219_v10  ;;  %813 = vmatpush.msra.mxu1 %v219_v10 }
  0x21   : > { %814 = vmatpush.msra.mxu2 %v219_v10  ;;  %815 = vmatpush.msra.mxu3 %v219_v10 }
  0x22   : > { %345 = vmatpush.msra.mxu0 %v218_v11  ;;  %816 = vmatpush.msra.mxu1 %v218_v11 }
  0x23   : > { %817 = vmatpush.msra.mxu2 %v218_v11  ;;  %818 = vmatpush.msra.mxu3 %v218_v11 }
  0x24   : > { %346 = vmatpush.msra.mxu0 %v217_v12  ;;  %819 = vmatpush.msra.mxu1 %v217_v12 }
  0x25   : > { %749 = vmatmul.msk.f32.vlgmr.msra.gmra.mxu0 %vm230_vm1, %v185_v13  ;;  %757 = vmatmul.msk.f32.vlgmr.msra.gmra.mxu1 %vm230_vm1, %v193_v14 }
  0x26   : > { %820 = vmatpush.msra.mxu2 %v217_v12  ;;  %821 = vmatpush.msra.mxu3 %v217_v12 }
  0x27   : > { %765 = vmatmul.msk.f32.vlgmr.msra.gmra.mxu2 %vm230_vm1, %v201_v15  ;;  %773 = vmatmul.msk.f32.vlgmr.msra.gmra.mxu3 %vm230_vm1, %v209_v19 }
  0x2d   : > { %750 = vmatmul.msk.f32.gmra.mxu0 %vm230_vm1, %v186_v16  ;;  %758 = vmatmul.msk.f32.gmra.mxu1 %vm230_vm1, %v194_v17 }
  0x2f   : > { %766 = vmatmul.msk.f32.gmra.mxu2 %vm230_vm1, %v202_v18  ;;  %774 = vmatmul.msk.f32.gmra.mxu3 %vm230_vm1, %v210_v23 }
  0x35   : > { %751 = vmatmul.msk.f32.gmra.mxu0 %vm230_vm1, %v187_v20  ;;  %759 = vmatmul.msk.f32.gmra.mxu1 %vm230_vm1, %v195_v21 }
  0x37   : > { %767 = vmatmul.msk.f32.gmra.mxu2 %vm230_vm1, %v203_v22  ;;  %775 = vmatmul.msk.f32.gmra.mxu3 %vm230_vm1, %v211_v27 }
  0x3d   : > { %752 = vmatmul.msk.f32.gmra.mxu0 %vm230_vm1, %v188_v24  ;;  %760 = vmatmul.msk.f32.gmra.mxu1 %vm230_vm1, %v196_v25 }
  0x3f   : > { %768 = vmatmul.msk.f32.gmra.mxu2 %vm230_vm1, %v204_v26  ;;  %776 = vmatmul.msk.f32.gmra.mxu3 %vm230_vm1, %v212_v30 }
  0x45   : > { %753 = vmatmul.msk.f32.gmra.mxu0 %vm230_vm1, %v189_v28  ;;  %761 = vmatmul.msk.f32.gmra.mxu1 %vm230_vm1, %v197_v29 }
  0x47   : > { %769 = vmatmul.msk.f32.gmra.mxu2 %vm230_vm1, %v205_v31  ;;  %777 = vmatmul.msk.f32.gmra.mxu3 %vm230_vm1, %v213_v34 }
  0x4d   : > { %754 = vmatmul.msk.f32.gmra.mxu0 %vm230_vm1, %v190_v32  ;;  %762 = vmatmul.msk.f32.gmra.mxu1 %vm230_vm1, %v198_v33 }
  0x4f   : > { %770 = vmatmul.msk.f32.gmra.mxu2 %vm230_vm1, %v206_v35  ;;  %778 = vmatmul.msk.f32.gmra.mxu3 %vm230_vm1, %v214_v38 }
  0x55   : > { %755 = vmatmul.msk.f32.gmra.mxu0 %vm230_vm1, %v191_v36  ;;  %763 = vmatmul.msk.f32.gmra.mxu1 %vm230_vm1, %v199_v37 }
  0x57   : > { %771 = vmatmul.msk.f32.gmra.mxu2 %vm230_vm1, %v207_v39  ;;  %779 = vmatmul.msk.f32.gmra.mxu3 %vm230_vm1, %v215_v42 }
  0x5d   : > { %756 = vmatmul.msk.f32.gmra.mxu0 %vm230_vm1, %v192_v40  ;;  %764 = vmatmul.msk.f32.gmra.mxu1 %vm230_vm1, %v200_v41 }
  0x5f   : > { %772 = vmatmul.msk.f32.gmra.mxu2 %vm230_vm1, %v208_v43  ;;  %780 = vmatmul.msk.f32.gmra.mxu3 %vm230_vm1, %v216_v44 }
  0xa2   : > { %v348_v45 = vpop.f32.mrf.mxu0  ;;  %v989_v46 = vpop.f32.mrf.mxu1 }
  0xa3   : > { %445 = vst.msk [vmem:[%s987_s22] sm:$0xff] %vm444_vm2, %v348_v45  ;;  %v546_v3 = vmul.f32 %v348_v45, %v348_v45  ;;  %v477_v6 = vsel %vm444_vm2, %v348_v45, 0.0  ;;  %v554_v40 = vmul.f32 %v989_v46, %v989_v46 }
  0xa4   : > { %453 = vst.msk [vmem:[%s987_s22 + $0x40] sm:$0xff] %vm444_vm2, %v989_v46 }
  0xa5   : > { %v578_v11 = vsel %vm444_vm2, %v546_v3, 0.0  ;;  %v593_v3 = vsel %vm444_vm2, %v554_v40, 0.0 }
  0xaa   : > { %v351_v47 = vpop.f32.mrf.mxu0  ;;  %v996_v48 = vpop.f32.mrf.mxu1 }
  0xab   : > { %446 = vst.msk [vmem:[%s987_s22 + $0x8] sm:$0xff] %vm444_vm2, %v351_v47  ;;  %v1000_v49 = vpop.f32.mrf.mxu2  ;;  %v1014_v53 = vpop.f32.mrf.mxu3  ;;  %v547_v0 = vmul.f32 %v351_v47, %v351_v47  ;;  %v478_v4 = vsel %vm444_vm2, %v351_v47, 0.0 }
  0xac   : > { %454 = vst.msk [vmem:[%s987_s22 + $0x48] sm:$0xff] %vm444_vm2, %v996_v48  ;;  %v479_v10 = vadd.f32 %v478_v4, %v477_v6  ;;  %v494_v4 = vsel %vm444_vm2, %v996_v48, 0.0 }
  0xad   : > { %461 = vst.msk [vmem:[%s987_s22 + $0x80] sm:$0xff] %vm444_vm2, %v1000_v49  ;;  %v579_v7 = vsel %vm444_vm2, %v547_v0, 0.0 }
  0xae   : > { %469 = vst.msk [vmem:[%s987_s22 + $0xc0] sm:$0xff] %vm444_vm2, %v1014_v53  ;;  %v580_v15 = vadd.f32 %v579_v7, %v578_v11 }
  0xb2   : > { %v354_v50 = vpop.f32.mrf.mxu0  ;;  %v1008_v51 = vpop.f32.mrf.mxu1 }
  0xb3   : > { %447 = vst.msk [vmem:[%s987_s22 + $0x10] sm:$0xff] %vm444_vm2, %v354_v50  ;;  %v1012_v52 = vpop.f32.mrf.mxu2  ;;  %v1031_v57 = vpop.f32.mrf.mxu3  ;;  %v548_v5 = vmul.f32 %v354_v50, %v354_v50  ;;  %v480_v8 = vsel %vm444_vm2, %v354_v50, 0.0  ;;  %v492_v50 = vsel %vm444_vm2, %v989_v46, 0.0  ;;  %v556_v46 = vmul.f32 %v1008_v51, %v1008_v51 }
  0xb4   : > { %455 = vst.msk [vmem:[%s987_s22 + $0x50] sm:$0xff] %vm444_vm2, %v1008_v51  ;;  %v481_v16 = vadd.f32 %v480_v8, %v479_v10  ;;  %v496_v8 = vsel %vm444_vm2, %v1008_v51, 0.0 }
  0xb5   : > { %462 = vst.msk [vmem:[%s987_s22 + $0x88] sm:$0xff] %vm444_vm2, %v1012_v52  ;;  %v581_v12 = vsel %vm444_vm2, %v548_v5, 0.0 }
  0xb6   : > { %470 = vst.msk [vmem:[%s987_s22 + $0xc8] sm:$0xff] %vm444_vm2, %v1031_v57  ;;  %v582_v24 = vadd.f32 %v581_v12, %v580_v15  ;;  %v597_v12 = vsel %vm444_vm2, %v556_v46, 0.0 }
  0xba   : > { %v357_v54 = vpop.f32.mrf.mxu0  ;;  %v1025_v55 = vpop.f32.mrf.mxu1 }
  0xbb   : > { %448 = vst.msk [vmem:[%s987_s22 + $0x18] sm:$0xff] %vm444_vm2, %v357_v54  ;;  %v1029_v56 = vpop.f32.mrf.mxu2  ;;  %v1048_v61 = vpop.f32.mrf.mxu3  ;;  %v549_v9 = vmul.f32 %v357_v54, %v357_v54  ;;  %v482_v13 = vsel %vm444_vm2, %v357_v54, 0.0  ;;  %v555_v54 = vmul.f32 %v996_v48, %v996_v48  ;;  %v498_v48 = vsel %vm444_vm2, %v1025_v55, 0.0 }
  0xbc   : > { %456 = vst.msk [vmem:[%s987_s22 + $0x58] sm:$0xff] %vm444_vm2, %v1025_v55  ;;  %v483_v25 = vadd.f32 %v482_v13, %v481_v16 }
  0xbd   : > { %463 = vst.msk [vmem:[%s987_s22 + $0x90] sm:$0xff] %vm444_vm2, %v1029_v56  ;;  %v583_v19 = vsel %vm444_vm2, %v549_v9, 0.0  ;;  %v595_v7 = vsel %vm444_vm2, %v555_v54, 0.0  ;;  %v557_v9 = vmul.f32 %v1025_v55, %v1025_v55 }
  0xbe   : > { %471 = vst.msk [vmem:[%s987_s22 + $0xd0] sm:$0xff] %vm444_vm2, %v1048_v61  ;;  %v584_v29 = vadd.f32 %v583_v19, %v582_v24 }
  0xbf   : > { %v599_v51 = vsel %vm444_vm2, %v557_v9, 0.0 }
  0xc2   : > { %v360_v58 = vpop.f32.mrf.mxu0  ;;  %v1042_v59 = vpop.f32.mrf.mxu1 }
  0xc3   : > { %449 = vst.msk [vmem:[%s987_s22 + $0x20] sm:$0xff] %vm444_vm2, %v360_v58  ;;  %v1046_v60 = vpop.f32.mrf.mxu2  ;;  %v1065_v2 = vpop.f32.mrf.mxu3  ;;  %v550_v14 = vmul.f32 %v360_v58, %v360_v58  ;;  %v484_v20 = vsel %vm444_vm2, %v360_v58, 0.0  ;;  %v558_v13 = vmul.f32 %v1042_v59, %v1042_v59  ;;  %v500_v19 = vsel %vm444_vm2, %v1042_v59, 0.0 }
  0xc4   : > { %457 = vst.msk [vmem:[%s987_s22 + $0x60] sm:$0xff] %vm444_vm2, %v1042_v59  ;;  %v485_v30 = vadd.f32 %v484_v20, %v483_v25 }
  0xc5   : > { %464 = vst.msk [vmem:[%s987_s22 + $0x98] sm:$0xff] %vm444_vm2, %v1046_v60  ;;  %v585_v26 = vsel %vm444_vm2, %v550_v14, 0.0  ;;  %v601_v24 = vsel %vm444_vm2, %v558_v13, 0.0 }
  0xc6   : > { %472 = vst.msk [vmem:[%s987_s22 + $0xd8] sm:$0xff] %vm444_vm2, %v1065_v2  ;;  %v586_v33 = vadd.f32 %v585_v26, %v584_v29 }
  0xca   : > { %v363_v62 = vpop.f32.mrf.mxu0  ;;  %v1059_v63 = vpop.f32.mrf.mxu1 }
  0xcb   : > { %450 = vst.msk [vmem:[%s987_s22 + $0x28] sm:$0xff] %vm444_vm2, %v363_v62  ;;  %v1063_v1 = vpop.f32.mrf.mxu2  ;;  %v551_v21 = vmul.f32 %v363_v62, %v363_v62  ;;  %v1091_v23 = vpop.f32.mrf.mxu3  ;;  %v486_v27 = vsel %vm444_vm2, %v363_v62, 0.0  ;;  %v559_v20 = vmul.f32 %v1059_v63, %v1059_v63  ;;  %v502_v25 = vsel %vm444_vm2, %v1059_v63, 0.0 }
  0xcc   : > { %458 = vst.msk [vmem:[%s987_s22 + $0x68] sm:$0xff] %vm444_vm2, %v1059_v63  ;;  %v487_v34 = vadd.f32 %v486_v27, %v485_v30  ;;  %v566_v46 = vmul.f32 %v1063_v1, %v1063_v1 }
  0xcd   : > { %465 = vst.msk [vmem:[%s987_s22 + $0xa0] sm:$0xff] %vm444_vm2, %v1063_v1  ;;  %v587_v31 = vsel %vm444_vm2, %v551_v21, 0.0  ;;  %v603_v29 = vsel %vm444_vm2, %v559_v20, 0.0 }
  0xce   : > { %473 = vst.msk [vmem:[%s987_s22 + $0xe0] sm:$0xff] %vm444_vm2, %v1091_v23  ;;  %v588_v36 = vadd.f32 %v587_v31, %v586_v33 }
  0xd2   : > { %v366_v17 = vpop.f32.mrf.mxu0  ;;  %v1083_v18 = vpop.f32.mrf.mxu1 }
  0xd3   : > { %451 = vst.msk [vmem:[%s987_s22 + $0x30] sm:$0xff] %vm444_vm2, %v366_v17  ;;  %v1089_v22 = vpop.f32.mrf.mxu2  ;;  %v552_v28 = vmul.f32 %v366_v17, %v366_v17  ;;  %v488_v32 = vsel %vm444_vm2, %v366_v17, 0.0  ;;  %v1114_v44 = vpop.f32.mrf.mxu3  ;;  %v560_v26 = vmul.f32 %v1083_v18, %v1083_v18  ;;  %v504_v30 = vsel %vm444_vm2, %v1083_v18, 0.0 }
  0xd4   : > { %459 = vst.msk [vmem:[%s987_s22 + $0x70] sm:$0xff] %vm444_vm2, %v1083_v18  ;;  %v489_v37 = vadd.f32 %v488_v32, %v487_v34  ;;  %v562_v34 = vmul.f32 %v1000_v49, %v1000_v49  ;;  %v508_v18 = vsel %vm444_vm2, %v1000_v49, 0.0  ;;  %v512_v49 = vsel %vm444_vm2, %v1029_v56, 0.0 }
  0xd5   : > { %466 = vst.msk [vmem:[%s987_s22 + $0xa8] sm:$0xff] %vm444_vm2, %v1089_v22  ;;  %v589_v35 = vsel %vm444_vm2, %v552_v28, 0.0  ;;  %v605_v63 = vsel %vm444_vm2, %v560_v26, 0.0  ;;  %v524_v26 = vsel %vm444_vm2, %v1014_v53, 0.0 }
  0xd6   : > { %v590_v45 = vadd.f32 %v589_v35, %v588_v36  ;;  %474 = vst.msk [vmem:[%s987_s22 + $0xe8] sm:$0xff] %vm444_vm2, %v1114_v44 }
  0xda   : > { %v369_v38 = vpop.f32.mrf.mxu0  ;;  %v393_v39 = vpop.f32.mrf.mxu1 }
  0xdb   : > { %452 = vst.msk [vmem:[%s987_s22 + $0x38] sm:$0xff] %vm444_vm2, %v369_v38  ;;  %v490_v41 = vsel %vm444_vm2, %v369_v38, 0.0  ;;  %v553_v42 = vmul.f32 %v369_v38, %v369_v38  ;;  %v1112_v43 = vpop.f32.mrf.mxu2  ;;  %v1144_v15 = vpop.f32.mrf.mxu3  ;;  %v561_v27 = vmul.f32 %v393_v39, %v393_v39  ;;  %v506_v31 = vsel %vm444_vm2, %v393_v39, 0.0 }
  0xdc   : > { %v491_v47 = vadd.f32 %v490_v41, %v489_v37  ;;  %460 = vst.msk [vmem:[%s987_s22 + $0x78] sm:$0xff] %vm444_vm2, %v393_v39  ;;  %v563_v39 = vmul.f32 %v1012_v52, %v1012_v52 }
  0xdd   : > { %v591_v58 = vsel %vm444_vm2, %v553_v42, 0.0  ;;  %467 = vst.msk [vmem:[%s987_s22 + $0xb0] sm:$0xff] %vm444_vm2, %v1112_v43  ;;  %v607_v35 = vsel %vm444_vm2, %v561_v27, 0.0  ;;  %v609_v42 = vsel %vm444_vm2, %v562_v34, 0.0  ;;  %v571_v27 = vmul.f32 %v1031_v57, %v1031_v57 }
  0xde   : > { %v493_v62 = vadd.f32 %v492_v50, %v491_v47  ;;  %v592_v0 = vadd.f32 %v591_v58, %v590_v45  ;;  %475 = vst.msk [vmem:[%s987_s22 + $0xf0] sm:$0xff] %vm444_vm2, %v1144_v15  ;;  %v510_v45 = vsel %vm444_vm2, %v1012_v52, 0.0  ;;  %v564_v47 = vmul.f32 %v1029_v56, %v1029_v56 }
  0xdf   : > { %v611_v58 = vsel %vm444_vm2, %v563_v39, 0.0  ;;  %v514_v52 = vsel %vm444_vm2, %v1046_v60, 0.0  ;;  %v516_v56 = vsel %vm444_vm2, %v1063_v1, 0.0  ;;  %v520_v1 = vsel %vm444_vm2, %v1112_v43, 0.0 }
  0xe0   : > { %v495_v5 = vadd.f32 %v494_v4, %v493_v62  ;;  %v594_v6 = vadd.f32 %v593_v3, %v592_v0  ;;  %v565_v62 = vmul.f32 %v1046_v60, %v1046_v60  ;;  %v613_v4 = vsel %vm444_vm2, %v564_v47, 0.0 }
  0xe1   : > { %v518_v60 = vsel %vm444_vm2, %v1089_v22, 0.0  ;;  %v576_v47 = vmul.f32 %v1144_v15, %v1144_v15 }
  0xe2   : > { %v497_v10 = vadd.f32 %v496_v8, %v495_v5  ;;  %v596_v11 = vadd.f32 %v595_v7, %v594_v6  ;;  %v615_v7 = vsel %vm444_vm2, %v565_v62, 0.0  ;;  %v567_v8 = vmul.f32 %v1089_v22, %v1089_v22 }
  0xe3   : > { %v417_v14 = vpop.f32.mrf.mxu2  ;;  %v1169_v36 = vpop.f32.mrf.mxu3 }
  0xe4   : > { %v598_v16 = vadd.f32 %v597_v12, %v596_v11  ;;  %v499_v17 = vadd.f32 %v498_v48, %v497_v10  ;;  %468 = vst.msk [vmem:[%s987_s22 + $0xb8] sm:$0xff] %vm444_vm2, %v417_v14  ;;  %v617_v11 = vsel %vm444_vm2, %v566_v46, 0.0  ;;  %v568_v12 = vmul.f32 %v1112_v43, %v1112_v43 }
  0xe5   : > { %476 = vst.msk [vmem:[%s987_s22 + $0xf8] sm:$0xff] %vm444_vm2, %v1169_v36  ;;  %v569_v48 = vmul.f32 %v417_v14, %v417_v14  ;;  %v538_v62 = vsel %vm444_vm2, %v1169_v36, 0.0 }
  0xe6   : > { %v501_v55 = vadd.f32 %v500_v19, %v499_v17  ;;  %v600_v21 = vadd.f32 %v599_v51, %v598_v16  ;;  %v619_v17 = vsel %vm444_vm2, %v567_v8, 0.0  ;;  %v522_v51 = vsel %vm444_vm2, %v417_v14, 0.0 }
  0xe7   : > { %v621_v22 = vsel %vm444_vm2, %v568_v12, 0.0 }
  0xe8   : > { %v503_v28 = vadd.f32 %v502_v25, %v501_v55  ;;  %v602_v59 = vadd.f32 %v601_v24, %v600_v21  ;;  %v570_v55 = vmul.f32 %v1014_v53, %v1014_v53  ;;  %v623_v21 = vsel %vm444_vm2, %v569_v48, 0.0 }
  0xe9   : > { %v528_v53 = vsel %vm444_vm2, %v1048_v61, 0.0 }
  0xea   : > { %v604_v32 = vadd.f32 %v603_v29, %v602_v59  ;;  %v505_v33 = vadd.f32 %v504_v30, %v503_v28  ;;  %v625_v14 = vsel %vm444_vm2, %v570_v55, 0.0  ;;  %v526_v59 = vsel %vm444_vm2, %v1031_v57, 0.0 }
  0xeb   : > { %v572_v29 = vmul.f32 %v1048_v61, %v1048_v61  ;;  %v530_v57 = vsel %vm444_vm2, %v1065_v2, 0.0  ;;  %v532_v61 = vsel %vm444_vm2, %v1091_v23, 0.0 }
  0xec   : > { %v606_v37 = vadd.f32 %v605_v63, %v604_v32  ;;  %v507_v38 = vadd.f32 %v506_v31, %v505_v33  ;;  %v627_v32 = vsel %vm444_vm2, %v571_v27, 0.0  ;;  %v573_v33 = vmul.f32 %v1065_v2, %v1065_v2 }
  0xed   : > { %v534_v2 = vsel %vm444_vm2, %v1114_v44, 0.0 }
  0xee   : > { %v509_v40 = vadd.f32 %v508_v18, %v507_v38  ;;  %v608_v41 = vadd.f32 %v607_v35, %v606_v37  ;;  %v629_v35 = vsel %vm444_vm2, %v572_v29, 0.0  ;;  %v574_v37 = vmul.f32 %v1091_v23, %v1091_v23 }
  0xef   : > { %v631_v39 = vsel %vm444_vm2, %v573_v33, 0.0 }
  0xf0   : > { %v511_v50 = vadd.f32 %v510_v45, %v509_v40  ;;  %v610_v54 = vadd.f32 %v609_v42, %v608_v41  ;;  %v575_v40 = vmul.f32 %v1114_v44, %v1114_v44  ;;  %v633_v45 = vsel %vm444_vm2, %v574_v37, 0.0 }
  0xf2   : > { %v513_v0 = vadd.f32 %v512_v49, %v511_v50  ;;  %v612_v3 = vadd.f32 %v611_v58, %v610_v54  ;;  %v577_v50 = vmul.f32 %v1169_v36, %v1169_v36  ;;  %v635_v23 = vsel %vm444_vm2, %v575_v40, 0.0 }
  0xf3   : > { %v536_v49 = vsel %vm444_vm2, %v1144_v15, 0.0 }
  0xf4   : > { %v614_v5 = vadd.f32 %v613_v4, %v612_v3  ;;  %v515_v6 = vadd.f32 %v514_v52, %v513_v0  ;;  %v637_v3 = vsel %vm444_vm2, %v576_v47, 0.0  ;;  %v639_v4 = vsel %vm444_vm2, %v577_v50, 0.0 }
  0xf6   : > { %v517_v9 = vadd.f32 %v516_v56, %v515_v6  ;;  %v616_v10 = vadd.f32 %v615_v7, %v614_v5 }
  0xf8   : > { %v519_v13 = vadd.f32 %v518_v60, %v517_v9  ;;  %v618_v16 = vadd.f32 %v617_v11, %v616_v10 }
  0xfa   : > { %v620_v19 = vadd.f32 %v619_v17, %v618_v16  ;;  %v521_v20 = vadd.f32 %v520_v1, %v519_v13 }
  0xfc   : > { %v622_v24 = vadd.f32 %v621_v22, %v620_v19  ;;  %v523_v25 = vadd.f32 %v522_v51, %v521_v20 }
  0xfe   : > { %v525_v43 = vadd.f32 %v524_v26, %v523_v25  ;;  %v624_v28 = vadd.f32 %v623_v21, %v622_v24 }
 0x100   : > { %v527_v30 = vadd.f32 %v526_v59, %v525_v43  ;;  %v626_v31 = vadd.f32 %v625_v14, %v624_v28 }
 0x102   : > { %v529_v34 = vadd.f32 %v528_v53, %v527_v30  ;;  %v628_v63 = vadd.f32 %v627_v32, %v626_v31 }
 0x104   : > { %v630_v38 = vadd.f32 %v629_v35, %v628_v63  ;;  %v531_v18 = vadd.f32 %v530_v57, %v529_v34 }
 0x106   : > { %v533_v41 = vadd.f32 %v532_v61, %v531_v18  ;;  %v632_v42 = vadd.f32 %v631_v39, %v630_v38 }
 0x108   : > { %v535_v54 = vadd.f32 %v534_v2, %v533_v41  ;;  %v634_v58 = vadd.f32 %v633_v45, %v632_v42 }
 0x10a   : > { %v636_v0 = vadd.f32 %v635_v23, %v634_v58  ;;  %v537_v44 = vadd.f32 %v536_v49, %v535_v54 }
 0x10c   : > { %v638_v52 = vadd.f32 %v637_v3, %v636_v0  ;;  %v539_v46 = vadd.f32 %v538_v62, %v537_v44 }
 0x10e   : > { %v540_v5 = vrot.slane %v539_v46, 4  ;;  %v640_v6 = vadd.f32 %v639_v4, %v638_v52 }
 0x110   : > { %v541_v7 = vadd.f32 %v540_v5, %v539_v46  ;;  %v641_v56 = vrot.slane %v640_v6, 4 }
 0x112   : > { %v542_v8 = vrot.slane %v541_v7, 2  ;;  %v642_v9 = vadd.f32 %v641_v56, %v640_v6 }
 0x114   : > { %v543_v15 = vadd.f32 %v542_v8, %v541_v7  ;;  %v643_v10 = vrot.slane %v642_v9, 2 }
 0x116   : > { %v544_v11 = vrot.slane %v543_v15, 1  ;;  %v644_v36 = vadd.f32 %v643_v10, %v642_v9 }
 0x118   : > { %v645_v60 = vrot.slane %v644_v36, 1  ;;  %v545_v12 = vadd.f32 %v544_v11, %v543_v15 }
 0x11a   : > { %v646_v48 = vadd.f32 %v645_v60, %v644_v36 }
 0x11c   : > { %v648_v13 = vsel %vm647_vm3, %v545_v12, %v646_v48 }
 0x11d   : > { %650 = vst.msk [vmem:[%s184_s26] sm:$0x3] %vm649_vm4, %v648_v13 }
 0x11e PF: > { %s14_s12 = sadd.s32 1, %s836_s12  }
 0x11f   : > { %p11_p5 = scmp.ge.s32.totalorder %s14_s12, 4  }
 0x121   :  { %13 = sbr.rel (!%p11_p5) target bundleno = 1 (0x1), region = 70 }

// kernel: _lambda_.10
= control target key start
LH: loop header
LB: loop body
LE: loop exit
PB: predicated region body
PF: predicated region fallthrough
CT: control target
= control target key end

     0   :  { %s4007_s12 = smov 0   ;;  %s4009_s13 = smov 0   ;;  %s5178_s0 = inlined_call_operand.vmem [shape: f32[9,512,4], index: 0, kind: input, shape index: {}]   ;;  %s5179_s1 = inlined_call_operand.vmem [shape: f32[4,8], index: 1, kind: input, shape index: {}]   ;;  %s5180_s2 = inlined_call_operand.vmem [shape: f32[512,8], index: 2, kind: output, shape index: {0}]   ;;  %s5181_s3 = inlined_call_operand.vmem [shape: f32[2,2,8], index: 3, kind: output, shape index: {1}]  }
   0x1   :  { %s4011_s14 = smov 0  }
   0x2 LB: > { %s4023_s15 = sadd.s32 4294967295, %s3985_s14   ;;  %s4026_s16 = sadd.s32 1, %s3985_s14   ;;  %s3985_s14 = sphi %s4011_s14, %s5184_s14   ;;  %s3981_s13 = sphi %s4009_s13, %s5183_s13   ;;  %s3977_s12 = sphi %s4007_s12, %s5182_s12  }
   0x3   : > { %s18_s17 = ssub.s32 %s3985_s14, %s4026_s16  ;;  %s21_s18 = sadd.s32 1, %s3981_s13 }
   0x4   : > { %p19_p0 = scmp.eq.s32.totalorder %s18_s17, 0  ;;  %p28_p1 = scmp.ne.s32.totalorder %s3981_s13, %s3977_s12 }
   0x5   : > { %p29_p2 = scmp.eq.s32.totalorder %s3985_s14, 0  ;;  %p3635_p4 = scmp.ge.s32.totalorder %s3985_s14, 2 }
   0x6   : > { %s4035_s19 = scalar_select %p19_p0, %s3981_s13, %s21_s18  }
   0x7   : > { %p30_p3 = por %p29_p2, %p28_p1  ;;  %130 = sbr.rel (%p3635_p4) target bundleno = 304 (0x130), region = 20 }
   0xc   : > { %133 = sbr.rel (!%p30_p3) target bundleno = 304 (0x130), region = 24  ;;  %s135_s20 = sand.u32 (%p30_p3), 1, %s3981_s13  }
   0xd   : > { %s3933_s21 = sshll.u32 (%p30_p3), %s3985_s14, 8  ;;  %s3937_s22 = smul.u32 (%p30_p3), 2304, %s135_s20 }
   0xe   : > { %s4043_s25 = scalar_lea.vmem (%p30_p3), %s5178_s0, %s3933_s21 }
   0xf   : > { %v744_v0 = vld [vmem:[%s4043_s25] sm:$0xff] (%p30_p3)  ;;  %v746_v1 = vld [vmem:[%s4043_s25 + $0x8] sm:$0xff] (%p30_p3)  ;;  %v748_v2 = vld [vmem:[%s4043_s25 + $0x10] sm:$0xff] (%p30_p3)  ;;  %s4048_s26 = scalar_lea.vmem (%p30_p3), [#allocation2], %s3937_s22 }
  0x10   : > { %745 = vst [vmem:[%s4048_s26] sm:$0xff] (%p30_p3), %v744_v0  ;;  %v750_v3 = vld [vmem:[%s4043_s25 + $0x18] sm:$0xff] (%p30_p3)  ;;  %v752_v4 = vld [vmem:[%s4043_s25 + $0x20] sm:$0xff] (%p30_p3)  ;;  %v754_v5 = vld [vmem:[%s4043_s25 + $0x28] sm:$0xff] (%p30_p3) }
  0x11   : > { %747 = vst [vmem:[%s4048_s26 + $0x8] sm:$0xff] %v746_v1  ;;  %v756_v6 = vld [vmem:[%s4043_s25 + $0x30] sm:$0xff]  ;;  %v758_v7 = vld [vmem:[%s4043_s25 + $0x38] sm:$0xff]  ;;  %v760_v8 = vld [vmem:[%s4043_s25 + $0x40] sm:$0xff] }
  0x12   : > { %749 = vst [vmem:[%s4048_s26 + $0x10] sm:$0xff] %v748_v2  ;;  %v762_v9 = vld [vmem:[%s4043_s25 + $0x48] sm:$0xff]  ;;  %v764_v10 = vld [vmem:[%s4043_s25 + $0x50] sm:$0xff]  ;;  %v766_v11 = vld [vmem:[%s4043_s25 + $0x58] sm:$0xff] }
  0x13   : > { %751 = vst [vmem:[%s4048_s26 + $0x18] sm:$0xff] %v750_v3  ;;  %v768_v12 = vld [vmem:[%s4043_s25 + $0x60] sm:$0xff]  ;;  %v770_v13 = vld [vmem:[%s4043_s25 + $0x68] sm:$0xff]  ;;  %v772_v14 = vld [vmem:[%s4043_s25 + $0x70] sm:$0xff] }
  0x14   : > { %753 = vst [vmem:[%s4048_s26 + $0x20] sm:$0xff] %v752_v4  ;;  %v774_v15 = vld [vmem:[%s4043_s25 + $0x78] sm:$0xff]  ;;  %v776_v16 = vld [vmem:[%s4043_s25 + $0x80] sm:$0xff]  ;;  %v778_v17 = vld [vmem:[%s4043_s25 + $0x88] sm:$0xff] }
  0x15   : > { %755 = vst [vmem:[%s4048_s26 + $0x28] sm:$0xff] %v754_v5  ;;  %v780_v18 = vld [vmem:[%s4043_s25 + $0x90] sm:$0xff]  ;;  %v782_v19 = vld [vmem:[%s4043_s25 + $0x98] sm:$0xff]  ;;  %v784_v20 = vld [vmem:[%s4043_s25 + $0xa0] sm:$0xff] }
  0x16   : > { %757 = vst [vmem:[%s4048_s26 + $0x30] sm:$0xff] %v756_v6  ;;  %v786_v21 = vld [vmem:[%s4043_s25 + $0xa8] sm:$0xff]  ;;  %v788_v22 = vld [vmem:[%s4043_s25 + $0xb0] sm:$0xff]  ;;  %v790_v23 = vld [vmem:[%s4043_s25 + $0xb8] sm:$0xff] }
  0x17   : > { %759 = vst [vmem:[%s4048_s26 + $0x38] sm:$0xff] %v758_v7  ;;  %v792_v24 = vld [vmem:[%s4043_s25 + $0xc0] sm:$0xff]  ;;  %v794_v25 = vld [vmem:[%s4043_s25 + $0xc8] sm:$0xff]  ;;  %v796_v26 = vld [vmem:[%s4043_s25 + $0xd0] sm:$0xff] }
  0x18   : > { %761 = vst [vmem:[%s4048_s26 + $0x40] sm:$0xff] %v760_v8  ;;  %v798_v27 = vld [vmem:[%s4043_s25 + $0xd8] sm:$0xff]  ;;  %v800_v28 = vld [vmem:[%s4043_s25 + $0xe0] sm:$0xff]  ;;  %v802_v29 = vld [vmem:[%s4043_s25 + $0xe8] sm:$0xff] }
  0x19   : > { %763 = vst [vmem:[%s4048_s26 + $0x48] sm:$0xff] %v762_v9  ;;  %v804_v30 = vld [vmem:[%s4043_s25 + $0xf0] sm:$0xff]  ;;  %v806_v31 = vld [vmem:[%s4043_s25 + $0xf8] sm:$0xff]  ;;  %v808_v32 = vld [vmem:[%s4043_s25 + $0x200] sm:$0xff] }
  0x1a   : > { %765 = vst [vmem:[%s4048_s26 + $0x50] sm:$0xff] %v764_v10  ;;  %v810_v33 = vld [vmem:[%s4043_s25 + $0x208] sm:$0xff]  ;;  %v812_v34 = vld [vmem:[%s4043_s25 + $0x210] sm:$0xff]  ;;  %v814_v35 = vld [vmem:[%s4043_s25 + $0x218] sm:$0xff] }
  0x1b   : > { %767 = vst [vmem:[%s4048_s26 + $0x58] sm:$0xff] %v766_v11  ;;  %v816_v36 = vld [vmem:[%s4043_s25 + $0x220] sm:$0xff]  ;;  %v818_v37 = vld [vmem:[%s4043_s25 + $0x228] sm:$0xff]  ;;  %v820_v38 = vld [vmem:[%s4043_s25 + $0x230] sm:$0xff] }
  0x1c   : > { %769 = vst [vmem:[%s4048_s26 + $0x60] sm:$0xff] %v768_v12  ;;  %v822_v39 = vld [vmem:[%s4043_s25 + $0x238] sm:$0xff]  ;;  %v824_v40 = vld [vmem:[%s4043_s25 + $0x240] sm:$0xff]  ;;  %v826_v41 = vld [vmem:[%s4043_s25 + $0x248] sm:$0xff] }
  0x1d   : > { %771 = vst [vmem:[%s4048_s26 + $0x68] sm:$0xff] %v770_v13  ;;  %v828_v42 = vld [vmem:[%s4043_s25 + $0x250] sm:$0xff]  ;;  %v830_v43 = vld [vmem:[%s4043_s25 + $0x258] sm:$0xff]  ;;  %v832_v44 = vld [vmem:[%s4043_s25 + $0x260] sm:$0xff] }
  0x1e   : > { %773 = vst [vmem:[%s4048_s26 + $0x70] sm:$0xff] %v772_v14  ;;  %v834_v45 = vld [vmem:[%s4043_s25 + $0x268] sm:$0xff]  ;;  %v836_v46 = vld [vmem:[%s4043_s25 + $0x270] sm:$0xff]  ;;  %v838_v47 = vld [vmem:[%s4043_s25 + $0x278] sm:$0xff] }
  0x1f   : > { %775 = vst [vmem:[%s4048_s26 + $0x78] sm:$0xff] %v774_v15  ;;  %v840_v48 = vld [vmem:[%s4043_s25 + $0x280] sm:$0xff]  ;;  %v842_v49 = vld [vmem:[%s4043_s25 + $0x288] sm:$0xff]  ;;  %v844_v50 = vld [vmem:[%s4043_s25 + $0x290] sm:$0xff] }
  0x20   : > { %777 = vst [vmem:[%s4048_s26 + $0x80] sm:$0xff] %v776_v16  ;;  %v846_v51 = vld [vmem:[%s4043_s25 + $0x298] sm:$0xff]  ;;  %v848_v52 = vld [vmem:[%s4043_s25 + $0x2a0] sm:$0xff]  ;;  %v850_v53 = vld [vmem:[%s4043_s25 + $0x2a8] sm:$0xff] }
  0x21   : > { %779 = vst [vmem:[%s4048_s26 + $0x88] sm:$0xff] %v778_v17  ;;  %v852_v54 = vld [vmem:[%s4043_s25 + $0x2b0] sm:$0xff]  ;;  %v854_v55 = vld [vmem:[%s4043_s25 + $0x2b8] sm:$0xff]  ;;  %v856_v56 = vld [vmem:[%s4043_s25 + $0x2c0] sm:$0xff] }
  0x22   : > { %781 = vst [vmem:[%s4048_s26 + $0x90] sm:$0xff] %v780_v18  ;;  %v858_v57 = vld [vmem:[%s4043_s25 + $0x2c8] sm:$0xff]  ;;  %v860_v58 = vld [vmem:[%s4043_s25 + $0x2d0] sm:$0xff]  ;;  %v862_v59 = vld [vmem:[%s4043_s25 + $0x2d8] sm:$0xff] }
  0x23   : > { %783 = vst [vmem:[%s4048_s26 + $0x98] sm:$0xff] %v782_v19  ;;  %v864_v60 = vld [vmem:[%s4043_s25 + $0x2e0] sm:$0xff]  ;;  %v866_v61 = vld [vmem:[%s4043_s25 + $0x2e8] sm:$0xff]  ;;  %v868_v62 = vld [vmem:[%s4043_s25 + $0x2f0] sm:$0xff] }
  0x24   : > { %785 = vst [vmem:[%s4048_s26 + $0xa0] sm:$0xff] %v784_v20  ;;  %v870_v63 = vld [vmem:[%s4043_s25 + $0x2f8] sm:$0xff]  ;;  %v872_v0 = vld [vmem:[%s4043_s25 + $0x400] sm:$0xff]  ;;  %v874_v1 = vld [vmem:[%s4043_s25 + $0x408] sm:$0xff] }
  0x25   : > { %787 = vst [vmem:[%s4048_s26 + $0xa8] sm:$0xff] %v786_v21  ;;  %v876_v2 = vld [vmem:[%s4043_s25 + $0x410] sm:$0xff]  ;;  %v878_v3 = vld [vmem:[%s4043_s25 + $0x418] sm:$0xff]  ;;  %v880_v4 = vld [vmem:[%s4043_s25 + $0x420] sm:$0xff] }
  0x26   : > { %789 = vst [vmem:[%s4048_s26 + $0xb0] sm:$0xff] %v788_v22  ;;  %v882_v5 = vld [vmem:[%s4043_s25 + $0x428] sm:$0xff]  ;;  %v884_v6 = vld [vmem:[%s4043_s25 + $0x430] sm:$0xff]  ;;  %v886_v7 = vld [vmem:[%s4043_s25 + $0x438] sm:$0xff] }
  0x27   : > { %791 = vst [vmem:[%s4048_s26 + $0xb8] sm:$0xff] %v790_v23  ;;  %v888_v8 = vld [vmem:[%s4043_s25 + $0x440] sm:$0xff]  ;;  %v890_v9 = vld [vmem:[%s4043_s25 + $0x448] sm:$0xff]  ;;  %v892_v10 = vld [vmem:[%s4043_s25 + $0x450] sm:$0xff] }
  0x28   : > { %793 = vst [vmem:[%s4048_s26 + $0xc0] sm:$0xff] %v792_v24  ;;  %v894_v11 = vld [vmem:[%s4043_s25 + $0x458] sm:$0xff]  ;;  %v896_v12 = vld [vmem:[%s4043_s25 + $0x460] sm:$0xff]  ;;  %v898_v13 = vld [vmem:[%s4043_s25 + $0x468] sm:$0xff] }
  0x29   : > { %795 = vst [vmem:[%s4048_s26 + $0xc8] sm:$0xff] %v794_v25  ;;  %v900_v14 = vld [vmem:[%s4043_s25 + $0x470] sm:$0xff]  ;;  %v902_v15 = vld [vmem:[%s4043_s25 + $0x478] sm:$0xff]  ;;  %v904_v16 = vld [vmem:[%s4043_s25 + $0x480] sm:$0xff] }
  0x2a   : > { %797 = vst [vmem:[%s4048_s26 + $0xd0] sm:$0xff] %v796_v26  ;;  %v906_v17 = vld [vmem:[%s4043_s25 + $0x488] sm:$0xff]  ;;  %v908_v18 = vld [vmem:[%s4043_s25 + $0x490] sm:$0xff]  ;;  %v910_v19 = vld [vmem:[%s4043_s25 + $0x498] sm:$0xff] }
  0x2b   : > { %799 = vst [vmem:[%s4048_s26 + $0xd8] sm:$0xff] %v798_v27  ;;  %v912_v20 = vld [vmem:[%s4043_s25 + $0x4a0] sm:$0xff]  ;;  %v914_v21 = vld [vmem:[%s4043_s25 + $0x4a8] sm:$0xff]  ;;  %v916_v22 = vld [vmem:[%s4043_s25 + $0x4b0] sm:$0xff] }
  0x2c   : > { %801 = vst [vmem:[%s4048_s26 + $0xe0] sm:$0xff] %v800_v28  ;;  %v918_v23 = vld [vmem:[%s4043_s25 + $0x4b8] sm:$0xff]  ;;  %v920_v24 = vld [vmem:[%s4043_s25 + $0x4c0] sm:$0xff]  ;;  %v922_v25 = vld [vmem:[%s4043_s25 + $0x4c8] sm:$0xff] }
  0x2d   : > { %803 = vst [vmem:[%s4048_s26 + $0xe8] sm:$0xff] %v802_v29  ;;  %v924_v26 = vld [vmem:[%s4043_s25 + $0x4d0] sm:$0xff]  ;;  %v926_v27 = vld [vmem:[%s4043_s25 + $0x4d8] sm:$0xff]  ;;  %v928_v28 = vld [vmem:[%s4043_s25 + $0x4e0] sm:$0xff] }
  0x2e   : > { %805 = vst [vmem:[%s4048_s26 + $0xf0] sm:$0xff] %v804_v30  ;;  %v930_v29 = vld [vmem:[%s4043_s25 + $0x4e8] sm:$0xff]  ;;  %v932_v30 = vld [vmem:[%s4043_s25 + $0x4f0] sm:$0xff] }
  0x2f   : > { %807 = vst [vmem:[%s4048_s26 + $0xf8] sm:$0xff] %v806_v31  ;;  %v934_v31 = vld [vmem:[%s4043_s25 + $0x4f8] sm:$0xff] }
  0x30   : > { %809 = vst [vmem:[%s4048_s26 + $0x100] sm:$0xff] %v808_v32  ;;  %v936_v32 = vld [vmem:[%s4043_s25 + $0x600] sm:$0xff] }
  0x31   : > { %811 = vst [vmem:[%s4048_s26 + $0x108] sm:$0xff] %v810_v33  ;;  %v938_v33 = vld [vmem:[%s4043_s25 + $0x608] sm:$0xff] }
  0x32   : > { %813 = vst [vmem:[%s4048_s26 + $0x110] sm:$0xff] %v812_v34  ;;  %v940_v34 = vld [vmem:[%s4043_s25 + $0x610] sm:$0xff] }
  0x33   : > { %815 = vst [vmem:[%s4048_s26 + $0x118] sm:$0xff] %v814_v35  ;;  %v942_v35 = vld [vmem:[%s4043_s25 + $0x618] sm:$0xff] }
  0x34   : > { %817 = vst [vmem:[%s4048_s26 + $0x120] sm:$0xff] %v816_v36  ;;  %v944_v36 = vld [vmem:[%s4043_s25 + $0x620] sm:$0xff] }
  0x35   : > { %819 = vst [vmem:[%s4048_s26 + $0x128] sm:$0xff] %v818_v37  ;;  %v946_v37 = vld [vmem:[%s4043_s25 + $0x628] sm:$0xff] }
  0x36   : > { %821 = vst [vmem:[%s4048_s26 + $0x130] sm:$0xff] %v820_v38  ;;  %v948_v38 = vld [vmem:[%s4043_s25 + $0x630] sm:$0xff] }
  0x37   : > { %823 = vst [vmem:[%s4048_s26 + $0x138] sm:$0xff] %v822_v39  ;;  %v950_v39 = vld [vmem:[%s4043_s25 + $0x638] sm:$0xff] }
  0x38   : > { %825 = vst [vmem:[%s4048_s26 + $0x140] sm:$0xff] %v824_v40  ;;  %v952_v40 = vld [vmem:[%s4043_s25 + $0x640] sm:$0xff] }
  0x39   : > { %827 = vst [vmem:[%s4048_s26 + $0x148] sm:$0xff] %v826_v41  ;;  %v954_v41 = vld [vmem:[%s4043_s25 + $0x648] sm:$0xff] }
  0x3a   : > { %829 = vst [vmem:[%s4048_s26 + $0x150] sm:$0xff] %v828_v42  ;;  %v956_v42 = vld [vmem:[%s4043_s25 + $0x650] sm:$0xff] }
  0x3b   : > { %831 = vst [vmem:[%s4048_s26 + $0x158] sm:$0xff] %v830_v43  ;;  %v958_v43 = vld [vmem:[%s4043_s25 + $0x658] sm:$0xff] }
  0x3c   : > { %833 = vst [vmem:[%s4048_s26 + $0x160] sm:$0xff] %v832_v44  ;;  %v960_v44 = vld [vmem:[%s4043_s25 + $0x660] sm:$0xff] }
  0x3d   : > { %835 = vst [vmem:[%s4048_s26 + $0x168] sm:$0xff] %v834_v45  ;;  %v962_v45 = vld [vmem:[%s4043_s25 + $0x668] sm:$0xff] }
  0x3e   : > { %837 = vst [vmem:[%s4048_s26 + $0x170] sm:$0xff] %v836_v46  ;;  %v964_v46 = vld [vmem:[%s4043_s25 + $0x670] sm:$0xff] }
  0x3f   : > { %839 = vst [vmem:[%s4048_s26 + $0x178] sm:$0xff] %v838_v47  ;;  %v966_v47 = vld [vmem:[%s4043_s25 + $0x678] sm:$0xff] }
  0x40   : > { %841 = vst [vmem:[%s4048_s26 + $0x180] sm:$0xff] %v840_v48  ;;  %v968_v48 = vld [vmem:[%s4043_s25 + $0x680] sm:$0xff] }
  0x41   : > { %843 = vst [vmem:[%s4048_s26 + $0x188] sm:$0xff] %v842_v49  ;;  %v970_v49 = vld [vmem:[%s4043_s25 + $0x688] sm:$0xff] }
  0x42   : > { %845 = vst [vmem:[%s4048_s26 + $0x190] sm:$0xff] %v844_v50  ;;  %v972_v50 = vld [vmem:[%s4043_s25 + $0x690] sm:$0xff] }
  0x43   : > { %847 = vst [vmem:[%s4048_s26 + $0x198] sm:$0xff] %v846_v51  ;;  %v974_v51 = vld [vmem:[%s4043_s25 + $0x698] sm:$0xff] }
  0x44   : > { %849 = vst [vmem:[%s4048_s26 + $0x1a0] sm:$0xff] %v848_v52  ;;  %v976_v52 = vld [vmem:[%s4043_s25 + $0x6a0] sm:$0xff] }
  0x45   : > { %851 = vst [vmem:[%s4048_s26 + $0x1a8] sm:$0xff] %v850_v53  ;;  %v978_v53 = vld [vmem:[%s4043_s25 + $0x6a8] sm:$0xff] }
  0x46   : > { %853 = vst [vmem:[%s4048_s26 + $0x1b0] sm:$0xff] %v852_v54  ;;  %v980_v54 = vld [vmem:[%s4043_s25 + $0x6b0] sm:$0xff] }
  0x47   : > { %855 = vst [vmem:[%s4048_s26 + $0x1b8] sm:$0xff] %v854_v55  ;;  %v982_v55 = vld [vmem:[%s4043_s25 + $0x6b8] sm:$0xff] }
  0x48   : > { %857 = vst [vmem:[%s4048_s26 + $0x1c0] sm:$0xff] %v856_v56  ;;  %v984_v56 = vld [vmem:[%s4043_s25 + $0x6c0] sm:$0xff] }
  0x49   : > { %859 = vst [vmem:[%s4048_s26 + $0x1c8] sm:$0xff] %v858_v57  ;;  %v986_v57 = vld [vmem:[%s4043_s25 + $0x6c8] sm:$0xff] }
  0x4a   : > { %861 = vst [vmem:[%s4048_s26 + $0x1d0] sm:$0xff] %v860_v58  ;;  %v988_v58 = vld [vmem:[%s4043_s25 + $0x6d0] sm:$0xff] }
  0x4b   : > { %863 = vst [vmem:[%s4048_s26 + $0x1d8] sm:$0xff] %v862_v59  ;;  %v990_v59 = vld [vmem:[%s4043_s25 + $0x6d8] sm:$0xff] }
  0x4c   : > { %865 = vst [vmem:[%s4048_s26 + $0x1e0] sm:$0xff] %v864_v60  ;;  %v992_v60 = vld [vmem:[%s4043_s25 + $0x6e0] sm:$0xff] }
  0x4d   : > { %867 = vst [vmem:[%s4048_s26 + $0x1e8] sm:$0xff] %v866_v61  ;;  %v994_v61 = vld [vmem:[%s4043_s25 + $0x6e8] sm:$0xff] }
  0x4e   : > { %869 = vst [vmem:[%s4048_s26 + $0x1f0] sm:$0xff] %v868_v62  ;;  %v996_v62 = vld [vmem:[%s4043_s25 + $0x6f0] sm:$0xff] }
  0x4f   : > { %871 = vst [vmem:[%s4048_s26 + $0x1f8] sm:$0xff] %v870_v63  ;;  %v998_v63 = vld [vmem:[%s4043_s25 + $0x6f8] sm:$0xff] }
  0x50   : > { %873 = vst [vmem:[%s4048_s26 + $0x200] sm:$0xff] %v872_v0  ;;  %v1000_v0 = vld [vmem:[%s4043_s25 + $0x800] sm:$0xff] }
  0x51   : > { %875 = vst [vmem:[%s4048_s26 + $0x208] sm:$0xff] %v874_v1  ;;  %v1002_v1 = vld [vmem:[%s4043_s25 + $0x808] sm:$0xff] }
  0x52   : > { %877 = vst [vmem:[%s4048_s26 + $0x210] sm:$0xff] %v876_v2  ;;  %v1004_v2 = vld [vmem:[%s4043_s25 + $0x810] sm:$0xff] }
  0x53   : > { %879 = vst [vmem:[%s4048_s26 + $0x218] sm:$0xff] %v878_v3  ;;  %v1006_v3 = vld [vmem:[%s4043_s25 + $0x818] sm:$0xff] }
  0x54   : > { %881 = vst [vmem:[%s4048_s26 + $0x220] sm:$0xff] %v880_v4  ;;  %v1008_v4 = vld [vmem:[%s4043_s25 + $0x820] sm:$0xff] }
  0x55   : > { %883 = vst [vmem:[%s4048_s26 + $0x228] sm:$0xff] %v882_v5  ;;  %v1010_v5 = vld [vmem:[%s4043_s25 + $0x828] sm:$0xff] }
  0x56   : > { %885 = vst [vmem:[%s4048_s26 + $0x230] sm:$0xff] %v884_v6  ;;  %v1012_v6 = vld [vmem:[%s4043_s25 + $0x830] sm:$0xff] }
  0x57   : > { %887 = vst [vmem:[%s4048_s26 + $0x238] sm:$0xff] %v886_v7  ;;  %v1014_v7 = vld [vmem:[%s4043_s25 + $0x838] sm:$0xff] }
  0x58   : > { %889 = vst [vmem:[%s4048_s26 + $0x240] sm:$0xff] %v888_v8  ;;  %v1016_v8 = vld [vmem:[%s4043_s25 + $0x840] sm:$0xff] }
  0x59   : > { %891 = vst [vmem:[%s4048_s26 + $0x248] sm:$0xff] %v890_v9  ;;  %v1018_v9 = vld [vmem:[%s4043_s25 + $0x848] sm:$0xff] }
  0x5a   : > { %893 = vst [vmem:[%s4048_s26 + $0x250] sm:$0xff] %v892_v10  ;;  %v1020_v10 = vld [vmem:[%s4043_s25 + $0x850] sm:$0xff] }
  0x5b   : > { %895 = vst [vmem:[%s4048_s26 + $0x258] sm:$0xff] %v894_v11  ;;  %v1022_v11 = vld [vmem:[%s4043_s25 + $0x858] sm:$0xff] }
  0x5c   : > { %897 = vst [vmem:[%s4048_s26 + $0x260] sm:$0xff] %v896_v12  ;;  %v1024_v12 = vld [vmem:[%s4043_s25 + $0x860] sm:$0xff] }
  0x5d   : > { %899 = vst [vmem:[%s4048_s26 + $0x268] sm:$0xff] %v898_v13  ;;  %v1026_v13 = vld [vmem:[%s4043_s25 + $0x868] sm:$0xff] }
  0x5e   : > { %901 = vst [vmem:[%s4048_s26 + $0x270] sm:$0xff] %v900_v14  ;;  %v1028_v14 = vld [vmem:[%s4043_s25 + $0x870] sm:$0xff] }
  0x5f   : > { %903 = vst [vmem:[%s4048_s26 + $0x278] sm:$0xff] %v902_v15  ;;  %v1030_v15 = vld [vmem:[%s4043_s25 + $0x878] sm:$0xff] }
  0x60   : > { %905 = vst [vmem:[%s4048_s26 + $0x280] sm:$0xff] %v904_v16  ;;  %v1032_v16 = vld [vmem:[%s4043_s25 + $0x880] sm:$0xff] }
  0x61   : > { %907 = vst [vmem:[%s4048_s26 + $0x288] sm:$0xff] %v906_v17  ;;  %v1034_v17 = vld [vmem:[%s4043_s25 + $0x888] sm:$0xff] }
  0x62   : > { %909 = vst [vmem:[%s4048_s26 + $0x290] sm:$0xff] %v908_v18  ;;  %v1036_v18 = vld [vmem:[%s4043_s25 + $0x890] sm:$0xff] }
  0x63   : > { %911 = vst [vmem:[%s4048_s26 + $0x298] sm:$0xff] %v910_v19  ;;  %v1038_v19 = vld [vmem:[%s4043_s25 + $0x898] sm:$0xff] }
  0x64   : > { %913 = vst [vmem:[%s4048_s26 + $0x2a0] sm:$0xff] %v912_v20  ;;  %v1040_v20 = vld [vmem:[%s4043_s25 + $0x8a0] sm:$0xff] }
  0x65   : > { %915 = vst [vmem:[%s4048_s26 + $0x2a8] sm:$0xff] %v914_v21  ;;  %v1042_v21 = vld [vmem:[%s4043_s25 + $0x8a8] sm:$0xff] }
  0x66   : > { %917 = vst [vmem:[%s4048_s26 + $0x2b0] sm:$0xff] %v916_v22  ;;  %v1044_v22 = vld [vmem:[%s4043_s25 + $0x8b0] sm:$0xff] }
  0x67   : > { %919 = vst [vmem:[%s4048_s26 + $0x2b8] sm:$0xff] %v918_v23  ;;  %v1046_v23 = vld [vmem:[%s4043_s25 + $0x8b8] sm:$0xff] }
  0x68   : > { %921 = vst [vmem:[%s4048_s26 + $0x2c0] sm:$0xff] %v920_v24  ;;  %v1048_v24 = vld [vmem:[%s4043_s25 + $0x8c0] sm:$0xff] }
  0x69   : > { %923 = vst [vmem:[%s4048_s26 + $0x2c8] sm:$0xff] %v922_v25  ;;  %v1050_v25 = vld [vmem:[%s4043_s25 + $0x8c8] sm:$0xff] }
  0x6a   : > { %925 = vst [vmem:[%s4048_s26 + $0x2d0] sm:$0xff] %v924_v26  ;;  %v1052_v26 = vld [vmem:[%s4043_s25 + $0x8d0] sm:$0xff] }
  0x6b   : > { %927 = vst [vmem:[%s4048_s26 + $0x2d8] sm:$0xff] %v926_v27  ;;  %v1054_v27 = vld [vmem:[%s4043_s25 + $0x8d8] sm:$0xff] }
  0x6c   : > { %929 = vst [vmem:[%s4048_s26 + $0x2e0] sm:$0xff] %v928_v28  ;;  %v1056_v28 = vld [vmem:[%s4043_s25 + $0x8e0] sm:$0xff] }
  0x6d   : > { %931 = vst [vmem:[%s4048_s26 + $0x2e8] sm:$0xff] %v930_v29  ;;  %v1058_v29 = vld [vmem:[%s4043_s25 + $0x8e8] sm:$0xff] }
  0x6e   : > { %933 = vst [vmem:[%s4048_s26 + $0x2f0] sm:$0xff] %v932_v30  ;;  %v1060_v30 = vld [vmem:[%s4043_s25 + $0x8f0] sm:$0xff] }
  0x6f   : > { %935 = vst [vmem:[%s4048_s26 + $0x2f8] sm:$0xff] %v934_v31  ;;  %v1062_v31 = vld [vmem:[%s4043_s25 + $0x8f8] sm:$0xff] }
  0x70   : > { %937 = vst [vmem:[%s4048_s26 + $0x300] sm:$0xff] %v936_v32  ;;  %v1064_v32 = vld [vmem:[%s4043_s25 + $0xa00] sm:$0xff] }
  0x71   : > { %939 = vst [vmem:[%s4048_s26 + $0x308] sm:$0xff] %v938_v33  ;;  %v1066_v33 = vld [vmem:[%s4043_s25 + $0xa08] sm:$0xff] }
  0x72   : > { %941 = vst [vmem:[%s4048_s26 + $0x310] sm:$0xff] %v940_v34  ;;  %v1068_v34 = vld [vmem:[%s4043_s25 + $0xa10] sm:$0xff] }
  0x73   : > { %943 = vst [vmem:[%s4048_s26 + $0x318] sm:$0xff] %v942_v35  ;;  %v1070_v35 = vld [vmem:[%s4043_s25 + $0xa18] sm:$0xff] }
  0x74   : > { %945 = vst [vmem:[%s4048_s26 + $0x320] sm:$0xff] %v944_v36  ;;  %v1072_v36 = vld [vmem:[%s4043_s25 + $0xa20] sm:$0xff] }
  0x75   : > { %947 = vst [vmem:[%s4048_s26 + $0x328] sm:$0xff] %v946_v37  ;;  %v1074_v37 = vld [vmem:[%s4043_s25 + $0xa28] sm:$0xff] }
  0x76   : > { %949 = vst [vmem:[%s4048_s26 + $0x330] sm:$0xff] %v948_v38  ;;  %v1076_v38 = vld [vmem:[%s4043_s25 + $0xa30] sm:$0xff] }
  0x77   : > { %951 = vst [vmem:[%s4048_s26 + $0x338] sm:$0xff] %v950_v39  ;;  %v1078_v39 = vld [vmem:[%s4043_s25 + $0xa38] sm:$0xff] }
  0x78   : > { %953 = vst [vmem:[%s4048_s26 + $0x340] sm:$0xff] %v952_v40  ;;  %v1080_v40 = vld [vmem:[%s4043_s25 + $0xa40] sm:$0xff] }
  0x79   : > { %955 = vst [vmem:[%s4048_s26 + $0x348] sm:$0xff] %v954_v41  ;;  %v1082_v41 = vld [vmem:[%s4043_s25 + $0xa48] sm:$0xff] }
  0x7a   : > { %957 = vst [vmem:[%s4048_s26 + $0x350] sm:$0xff] %v956_v42  ;;  %v1084_v42 = vld [vmem:[%s4043_s25 + $0xa50] sm:$0xff] }
  0x7b   : > { %959 = vst [vmem:[%s4048_s26 + $0x358] sm:$0xff] %v958_v43  ;;  %v1086_v43 = vld [vmem:[%s4043_s25 + $0xa58] sm:$0xff] }
  0x7c   : > { %961 = vst [vmem:[%s4048_s26 + $0x360] sm:$0xff] %v960_v44  ;;  %v1088_v44 = vld [vmem:[%s4043_s25 + $0xa60] sm:$0xff] }
  0x7d   : > { %963 = vst [vmem:[%s4048_s26 + $0x368] sm:$0xff] %v962_v45  ;;  %v1090_v45 = vld [vmem:[%s4043_s25 + $0xa68] sm:$0xff] }
  0x7e   : > { %965 = vst [vmem:[%s4048_s26 + $0x370] sm:$0xff] %v964_v46  ;;  %v1092_v46 = vld [vmem:[%s4043_s25 + $0xa70] sm:$0xff] }
  0x7f   : > { %967 = vst [vmem:[%s4048_s26 + $0x378] sm:$0xff] %v966_v47  ;;  %v1094_v47 = vld [vmem:[%s4043_s25 + $0xa78] sm:$0xff] }
  0x80   : > { %969 = vst [vmem:[%s4048_s26 + $0x380] sm:$0xff] %v968_v48  ;;  %v1096_v48 = vld [vmem:[%s4043_s25 + $0xa80] sm:$0xff] }
  0x81   : > { %971 = vst [vmem:[%s4048_s26 + $0x388] sm:$0xff] %v970_v49  ;;  %v1098_v49 = vld [vmem:[%s4043_s25 + $0xa88] sm:$0xff] }
  0x82   : > { %973 = vst [vmem:[%s4048_s26 + $0x390] sm:$0xff] %v972_v50  ;;  %v1100_v50 = vld [vmem:[%s4043_s25 + $0xa90] sm:$0xff] }
  0x83   : > { %975 = vst [vmem:[%s4048_s26 + $0x398] sm:$0xff] %v974_v51  ;;  %v1102_v51 = vld [vmem:[%s4043_s25 + $0xa98] sm:$0xff] }
  0x84   : > { %977 = vst [vmem:[%s4048_s26 + $0x3a0] sm:$0xff] %v976_v52  ;;  %v1104_v52 = vld [vmem:[%s4043_s25 + $0xaa0] sm:$0xff] }
  0x85   : > { %979 = vst [vmem:[%s4048_s26 + $0x3a8] sm:$0xff] %v978_v53  ;;  %v1106_v53 = vld [vmem:[%s4043_s25 + $0xaa8] sm:$0xff] }
  0x86   : > { %981 = vst [vmem:[%s4048_s26 + $0x3b0] sm:$0xff] %v980_v54  ;;  %v1108_v54 = vld [vmem:[%s4043_s25 + $0xab0] sm:$0xff] }
  0x87   : > { %983 = vst [vmem:[%s4048_s26 + $0x3b8] sm:$0xff] %v982_v55  ;;  %v1110_v55 = vld [vmem:[%s4043_s25 + $0xab8] sm:$0xff] }
  0x88   : > { %985 = vst [vmem:[%s4048_s26 + $0x3c0] sm:$0xff] %v984_v56  ;;  %v1112_v56 = vld [vmem:[%s4043_s25 + $0xac0] sm:$0xff] }
  0x89   : > { %987 = vst [vmem:[%s4048_s26 + $0x3c8] sm:$0xff] %v986_v57  ;;  %v1114_v57 = vld [vmem:[%s4043_s25 + $0xac8] sm:$0xff] }
  0x8a   : > { %989 = vst [vmem:[%s4048_s26 + $0x3d0] sm:$0xff] %v988_v58  ;;  %v1116_v58 = vld [vmem:[%s4043_s25 + $0xad0] sm:$0xff] }
  0x8b   : > { %991 = vst [vmem:[%s4048_s26 + $0x3d8] sm:$0xff] %v990_v59  ;;  %v1118_v59 = vld [vmem:[%s4043_s25 + $0xad8] sm:$0xff] }
  0x8c   : > { %993 = vst [vmem:[%s4048_s26 + $0x3e0] sm:$0xff] %v992_v60  ;;  %v1120_v60 = vld [vmem:[%s4043_s25 + $0xae0] sm:$0xff] }
  0x8d   : > { %995 = vst [vmem:[%s4048_s26 + $0x3e8] sm:$0xff] %v994_v61  ;;  %v1122_v61 = vld [vmem:[%s4043_s25 + $0xae8] sm:$0xff] }
  0x8e   : > { %997 = vst [vmem:[%s4048_s26 + $0x3f0] sm:$0xff] %v996_v62  ;;  %v1124_v62 = vld [vmem:[%s4043_s25 + $0xaf0] sm:$0xff] }
  0x8f   : > { %999 = vst [vmem:[%s4048_s26 + $0x3f8] sm:$0xff] %v998_v63  ;;  %v1126_v63 = vld [vmem:[%s4043_s25 + $0xaf8] sm:$0xff] }
  0x90   : > { %1001 = vst [vmem:[%s4048_s26 + $0x400] sm:$0xff] %v1000_v0  ;;  %v1128_v0 = vld [vmem:[%s4043_s25 + $0xc00] sm:$0xff] }
  0x91   : > { %1003 = vst [vmem:[%s4048_s26 + $0x408] sm:$0xff] %v1002_v1  ;;  %v1130_v1 = vld [vmem:[%s4043_s25 + $0xc08] sm:$0xff] }
  0x92   : > { %1005 = vst [vmem:[%s4048_s26 + $0x410] sm:$0xff] %v1004_v2  ;;  %v1132_v2 = vld [vmem:[%s4043_s25 + $0xc10] sm:$0xff] }
  0x93   : > { %1007 = vst [vmem:[%s4048_s26 + $0x418] sm:$0xff] %v1006_v3  ;;  %v1134_v3 = vld [vmem:[%s4043_s25 + $0xc18] sm:$0xff] }
  0x94   : > { %1009 = vst [vmem:[%s4048_s26 + $0x420] sm:$0xff] %v1008_v4  ;;  %v1136_v4 = vld [vmem:[%s4043_s25 + $0xc20] sm:$0xff] }
  0x95   : > { %1011 = vst [vmem:[%s4048_s26 + $0x428] sm:$0xff] %v1010_v5  ;;  %v1138_v5 = vld [vmem:[%s4043_s25 + $0xc28] sm:$0xff] }
  0x96   : > { %1013 = vst [vmem:[%s4048_s26 + $0x430] sm:$0xff] %v1012_v6  ;;  %v1140_v6 = vld [vmem:[%s4043_s25 + $0xc30] sm:$0xff] }
  0x97   : > { %1015 = vst [vmem:[%s4048_s26 + $0x438] sm:$0xff] %v1014_v7  ;;  %v1142_v7 = vld [vmem:[%s4043_s25 + $0xc38] sm:$0xff] }
  0x98   : > { %1017 = vst [vmem:[%s4048_s26 + $0x440] sm:$0xff] %v1016_v8  ;;  %v1144_v8 = vld [vmem:[%s4043_s25 + $0xc40] sm:$0xff] }
  0x99   : > { %1019 = vst [vmem:[%s4048_s26 + $0x448] sm:$0xff] %v1018_v9  ;;  %v1146_v9 = vld [vmem:[%s4043_s25 + $0xc48] sm:$0xff] }
  0x9a   : > { %1021 = vst [vmem:[%s4048_s26 + $0x450] sm:$0xff] %v1020_v10  ;;  %v1148_v10 = vld [vmem:[%s4043_s25 + $0xc50] sm:$0xff] }
  0x9b   : > { %1023 = vst [vmem:[%s4048_s26 + $0x458] sm:$0xff] %v1022_v11  ;;  %v1150_v11 = vld [vmem:[%s4043_s25 + $0xc58] sm:$0xff] }
  0x9c   : > { %1025 = vst [vmem:[%s4048_s26 + $0x460] sm:$0xff] %v1024_v12  ;;  %v1152_v12 = vld [vmem:[%s4043_s25 + $0xc60] sm:$0xff] }
  0x9d   : > { %1027 = vst [vmem:[%s4048_s26 + $0x468] sm:$0xff] %v1026_v13  ;;  %v1154_v13 = vld [vmem:[%s4043_s25 + $0xc68] sm:$0xff] }
  0x9e   : > { %1029 = vst [vmem:[%s4048_s26 + $0x470] sm:$0xff] %v1028_v14  ;;  %v1156_v14 = vld [vmem:[%s4043_s25 + $0xc70] sm:$0xff] }
  0x9f   : > { %1031 = vst [vmem:[%s4048_s26 + $0x478] sm:$0xff] %v1030_v15  ;;  %v1158_v15 = vld [vmem:[%s4043_s25 + $0xc78] sm:$0xff] }
  0xa0   : > { %1033 = vst [vmem:[%s4048_s26 + $0x480] sm:$0xff] %v1032_v16  ;;  %v1160_v16 = vld [vmem:[%s4043_s25 + $0xc80] sm:$0xff] }
  0xa1   : > { %1035 = vst [vmem:[%s4048_s26 + $0x488] sm:$0xff] %v1034_v17  ;;  %v1162_v17 = vld [vmem:[%s4043_s25 + $0xc88] sm:$0xff] }
  0xa2   : > { %1037 = vst [vmem:[%s4048_s26 + $0x490] sm:$0xff] %v1036_v18  ;;  %v1164_v18 = vld [vmem:[%s4043_s25 + $0xc90] sm:$0xff] }
  0xa3   : > { %1039 = vst [vmem:[%s4048_s26 + $0x498] sm:$0xff] %v1038_v19  ;;  %v1166_v19 = vld [vmem:[%s4043_s25 + $0xc98] sm:$0xff] }
  0xa4   : > { %1041 = vst [vmem:[%s4048_s26 + $0x4a0] sm:$0xff] %v1040_v20  ;;  %v1168_v20 = vld [vmem:[%s4043_s25 + $0xca0] sm:$0xff] }
  0xa5   : > { %1043 = vst [vmem:[%s4048_s26 + $0x4a8] sm:$0xff] %v1042_v21  ;;  %v1170_v21 = vld [vmem:[%s4043_s25 + $0xca8] sm:$0xff] }
  0xa6   : > { %1045 = vst [vmem:[%s4048_s26 + $0x4b0] sm:$0xff] %v1044_v22  ;;  %v1172_v22 = vld [vmem:[%s4043_s25 + $0xcb0] sm:$0xff] }
  0xa7   : > { %1047 = vst [vmem:[%s4048_s26 + $0x4b8] sm:$0xff] %v1046_v23  ;;  %v1174_v23 = vld [vmem:[%s4043_s25 + $0xcb8] sm:$0xff] }
  0xa8   : > { %1049 = vst [vmem:[%s4048_s26 + $0x4c0] sm:$0xff] %v1048_v24  ;;  %v1176_v24 = vld [vmem:[%s4043_s25 + $0xcc0] sm:$0xff] }
  0xa9   : > { %1051 = vst [vmem:[%s4048_s26 + $0x4c8] sm:$0xff] %v1050_v25  ;;  %v1178_v25 = vld [vmem:[%s4043_s25 + $0xcc8] sm:$0xff] }
  0xaa   : > { %1053 = vst [vmem:[%s4048_s26 + $0x4d0] sm:$0xff] %v1052_v26  ;;  %v1180_v26 = vld [vmem:[%s4043_s25 + $0xcd0] sm:$0xff] }
  0xab   : > { %1055 = vst [vmem:[%s4048_s26 + $0x4d8] sm:$0xff] %v1054_v27  ;;  %v1182_v27 = vld [vmem:[%s4043_s25 + $0xcd8] sm:$0xff] }
  0xac   : > { %1057 = vst [vmem:[%s4048_s26 + $0x4e0] sm:$0xff] %v1056_v28  ;;  %v1184_v28 = vld [vmem:[%s4043_s25 + $0xce0] sm:$0xff] }
  0xad   : > { %1059 = vst [vmem:[%s4048_s26 + $0x4e8] sm:$0xff] %v1058_v29  ;;  %v1186_v29 = vld [vmem:[%s4043_s25 + $0xce8] sm:$0xff] }
  0xae   : > { %1061 = vst [vmem:[%s4048_s26 + $0x4f0] sm:$0xff] %v1060_v30  ;;  %v1188_v30 = vld [vmem:[%s4043_s25 + $0xcf0] sm:$0xff] }
  0xaf   : > { %1063 = vst [vmem:[%s4048_s26 + $0x4f8] sm:$0xff] %v1062_v31  ;;  %v1190_v31 = vld [vmem:[%s4043_s25 + $0xcf8] sm:$0xff] }
  0xb0   : > { %1065 = vst [vmem:[%s4048_s26 + $0x500] sm:$0xff] %v1064_v32  ;;  %v1192_v32 = vld [vmem:[%s4043_s25 + $0xe00] sm:$0xff] }
  0xb1   : > { %1067 = vst [vmem:[%s4048_s26 + $0x508] sm:$0xff] %v1066_v33  ;;  %v1194_v33 = vld [vmem:[%s4043_s25 + $0xe08] sm:$0xff] }
  0xb2   : > { %1069 = vst [vmem:[%s4048_s26 + $0x510] sm:$0xff] %v1068_v34  ;;  %v1196_v34 = vld [vmem:[%s4043_s25 + $0xe10] sm:$0xff] }
  0xb3   : > { %1071 = vst [vmem:[%s4048_s26 + $0x518] sm:$0xff] %v1070_v35  ;;  %v1198_v35 = vld [vmem:[%s4043_s25 + $0xe18] sm:$0xff] }
  0xb4   : > { %1073 = vst [vmem:[%s4048_s26 + $0x520] sm:$0xff] %v1072_v36  ;;  %v1200_v36 = vld [vmem:[%s4043_s25 + $0xe20] sm:$0xff] }
  0xb5   : > { %1075 = vst [vmem:[%s4048_s26 + $0x528] sm:$0xff] %v1074_v37  ;;  %v1202_v37 = vld [vmem:[%s4043_s25 + $0xe28] sm:$0xff] }
  0xb6   : > { %1077 = vst [vmem:[%s4048_s26 + $0x530] sm:$0xff] %v1076_v38  ;;  %v1204_v38 = vld [vmem:[%s4043_s25 + $0xe30] sm:$0xff] }
  0xb7   : > { %1079 = vst [vmem:[%s4048_s26 + $0x538] sm:$0xff] %v1078_v39  ;;  %v1206_v39 = vld [vmem:[%s4043_s25 + $0xe38] sm:$0xff] }
  0xb8   : > { %1081 = vst [vmem:[%s4048_s26 + $0x540] sm:$0xff] %v1080_v40  ;;  %v1208_v40 = vld [vmem:[%s4043_s25 + $0xe40] sm:$0xff] }
  0xb9   : > { %1083 = vst [vmem:[%s4048_s26 + $0x548] sm:$0xff] %v1082_v41  ;;  %v1210_v41 = vld [vmem:[%s4043_s25 + $0xe48] sm:$0xff] }
  0xba   : > { %1085 = vst [vmem:[%s4048_s26 + $0x550] sm:$0xff] %v1084_v42  ;;  %v1212_v42 = vld [vmem:[%s4043_s25 + $0xe50] sm:$0xff] }
  0xbb   : > { %1087 = vst [vmem:[%s4048_s26 + $0x558] sm:$0xff] %v1086_v43  ;;  %v1214_v43 = vld [vmem:[%s4043_s25 + $0xe58] sm:$0xff] }
  0xbc   : > { %1089 = vst [vmem:[%s4048_s26 + $0x560] sm:$0xff] %v1088_v44  ;;  %v1216_v44 = vld [vmem:[%s4043_s25 + $0xe60] sm:$0xff] }
  0xbd   : > { %1091 = vst [vmem:[%s4048_s26 + $0x568] sm:$0xff] %v1090_v45  ;;  %v1218_v45 = vld [vmem:[%s4043_s25 + $0xe68] sm:$0xff] }
  0xbe   : > { %1093 = vst [vmem:[%s4048_s26 + $0x570] sm:$0xff] %v1092_v46  ;;  %v1220_v46 = vld [vmem:[%s4043_s25 + $0xe70] sm:$0xff] }
  0xbf   : > { %1095 = vst [vmem:[%s4048_s26 + $0x578] sm:$0xff] %v1094_v47  ;;  %v1222_v47 = vld [vmem:[%s4043_s25 + $0xe78] sm:$0xff] }
  0xc0   : > { %1097 = vst [vmem:[%s4048_s26 + $0x580] sm:$0xff] %v1096_v48  ;;  %v1224_v48 = vld [vmem:[%s4043_s25 + $0xe80] sm:$0xff] }
  0xc1   : > { %1099 = vst [vmem:[%s4048_s26 + $0x588] sm:$0xff] %v1098_v49  ;;  %v1226_v49 = vld [vmem:[%s4043_s25 + $0xe88] sm:$0xff] }
  0xc2   : > { %1101 = vst [vmem:[%s4048_s26 + $0x590] sm:$0xff] %v1100_v50  ;;  %v1228_v50 = vld [vmem:[%s4043_s25 + $0xe90] sm:$0xff] }
  0xc3   : > { %1103 = vst [vmem:[%s4048_s26 + $0x598] sm:$0xff] %v1102_v51  ;;  %v1230_v51 = vld [vmem:[%s4043_s25 + $0xe98] sm:$0xff] }
  0xc4   : > { %1105 = vst [vmem:[%s4048_s26 + $0x5a0] sm:$0xff] %v1104_v52  ;;  %v1232_v52 = vld [vmem:[%s4043_s25 + $0xea0] sm:$0xff] }
  0xc5   : > { %1107 = vst [vmem:[%s4048_s26 + $0x5a8] sm:$0xff] %v1106_v53  ;;  %v1234_v53 = vld [vmem:[%s4043_s25 + $0xea8] sm:$0xff] }
  0xc6   : > { %1109 = vst [vmem:[%s4048_s26 + $0x5b0] sm:$0xff] %v1108_v54  ;;  %v1236_v54 = vld [vmem:[%s4043_s25 + $0xeb0] sm:$0xff] }
  0xc7   : > { %1111 = vst [vmem:[%s4048_s26 + $0x5b8] sm:$0xff] %v1110_v55  ;;  %v1238_v55 = vld [vmem:[%s4043_s25 + $0xeb8] sm:$0xff] }
  0xc8   : > { %1113 = vst [vmem:[%s4048_s26 + $0x5c0] sm:$0xff] %v1112_v56  ;;  %v1240_v56 = vld [vmem:[%s4043_s25 + $0xec0] sm:$0xff] }
  0xc9   : > { %1115 = vst [vmem:[%s4048_s26 + $0x5c8] sm:$0xff] %v1114_v57  ;;  %v1242_v57 = vld [vmem:[%s4043_s25 + $0xec8] sm:$0xff] }
  0xca   : > { %1117 = vst [vmem:[%s4048_s26 + $0x5d0] sm:$0xff] %v1116_v58  ;;  %v1244_v58 = vld [vmem:[%s4043_s25 + $0xed0] sm:$0xff] }
  0xcb   : > { %1119 = vst [vmem:[%s4048_s26 + $0x5d8] sm:$0xff] %v1118_v59  ;;  %v1246_v59 = vld [vmem:[%s4043_s25 + $0xed8] sm:$0xff] }
  0xcc   : > { %1121 = vst [vmem:[%s4048_s26 + $0x5e0] sm:$0xff] %v1120_v60  ;;  %v1248_v60 = vld [vmem:[%s4043_s25 + $0xee0] sm:$0xff] }
  0xcd   : > { %1123 = vst [vmem:[%s4048_s26 + $0x5e8] sm:$0xff] %v1122_v61  ;;  %v1250_v61 = vld [vmem:[%s4043_s25 + $0xee8] sm:$0xff] }
  0xce   : > { %1125 = vst [vmem:[%s4048_s26 + $0x5f0] sm:$0xff] %v1124_v62  ;;  %v1252_v62 = vld [vmem:[%s4043_s25 + $0xef0] sm:$0xff] }
  0xcf   : > { %1127 = vst [vmem:[%s4048_s26 + $0x5f8] sm:$0xff] %v1126_v63  ;;  %v1254_v63 = vld [vmem:[%s4043_s25 + $0xef8] sm:$0xff] }
  0xd0   : > { %1129 = vst [vmem:[%s4048_s26 + $0x600] sm:$0xff] %v1128_v0  ;;  %v1256_v0 = vld [vmem:[%s4043_s25 + $0x1000] sm:$0xff] }
  0xd1   : > { %1131 = vst [vmem:[%s4048_s26 + $0x608] sm:$0xff] %v1130_v1  ;;  %v1258_v1 = vld [vmem:[%s4043_s25 + $0x1008] sm:$0xff] }
  0xd2   : > { %1133 = vst [vmem:[%s4048_s26 + $0x610] sm:$0xff] %v1132_v2  ;;  %v1260_v2 = vld [vmem:[%s4043_s25 + $0x1010] sm:$0xff] }
  0xd3   : > { %1135 = vst [vmem:[%s4048_s26 + $0x618] sm:$0xff] %v1134_v3  ;;  %v1262_v3 = vld [vmem:[%s4043_s25 + $0x1018] sm:$0xff] }
  0xd4   : > { %1137 = vst [vmem:[%s4048_s26 + $0x620] sm:$0xff] %v1136_v4  ;;  %v1264_v4 = vld [vmem:[%s4043_s25 + $0x1020] sm:$0xff] }
  0xd5   : > { %1139 = vst [vmem:[%s4048_s26 + $0x628] sm:$0xff] %v1138_v5  ;;  %v1266_v5 = vld [vmem:[%s4043_s25 + $0x1028] sm:$0xff] }
  0xd6   : > { %1141 = vst [vmem:[%s4048_s26 + $0x630] sm:$0xff] %v1140_v6  ;;  %v1268_v6 = vld [vmem:[%s4043_s25 + $0x1030] sm:$0xff] }
  0xd7   : > { %1143 = vst [vmem:[%s4048_s26 + $0x638] sm:$0xff] %v1142_v7  ;;  %v1270_v7 = vld [vmem:[%s4043_s25 + $0x1038] sm:$0xff] }
  0xd8   : > { %1145 = vst [vmem:[%s4048_s26 + $0x640] sm:$0xff] %v1144_v8  ;;  %v1272_v8 = vld [vmem:[%s4043_s25 + $0x1040] sm:$0xff] }
  0xd9   : > { %1147 = vst [vmem:[%s4048_s26 + $0x648] sm:$0xff] %v1146_v9  ;;  %v1274_v9 = vld [vmem:[%s4043_s25 + $0x1048] sm:$0xff] }
  0xda   : > { %1149 = vst [vmem:[%s4048_s26 + $0x650] sm:$0xff] %v1148_v10  ;;  %v1276_v10 = vld [vmem:[%s4043_s25 + $0x1050] sm:$0xff] }
  0xdb   : > { %1151 = vst [vmem:[%s4048_s26 + $0x658] sm:$0xff] %v1150_v11  ;;  %v1278_v11 = vld [vmem:[%s4043_s25 + $0x1058] sm:$0xff] }
  0xdc   : > { %1153 = vst [vmem:[%s4048_s26 + $0x660] sm:$0xff] %v1152_v12  ;;  %v1280_v12 = vld [vmem:[%s4043_s25 + $0x1060] sm:$0xff] }
  0xdd   : > { %1155 = vst [vmem:[%s4048_s26 + $0x668] sm:$0xff] %v1154_v13  ;;  %v1282_v13 = vld [vmem:[%s4043_s25 + $0x1068] sm:$0xff] }
  0xde   : > { %1157 = vst [vmem:[%s4048_s26 + $0x670] sm:$0xff] %v1156_v14  ;;  %v1284_v14 = vld [vmem:[%s4043_s25 + $0x1070] sm:$0xff] }
  0xdf   : > { %1159 = vst [vmem:[%s4048_s26 + $0x678] sm:$0xff] %v1158_v15  ;;  %v1286_v15 = vld [vmem:[%s4043_s25 + $0x1078] sm:$0xff] }
  0xe0   : > { %1161 = vst [vmem:[%s4048_s26 + $0x680] sm:$0xff] %v1160_v16  ;;  %v1288_v16 = vld [vmem:[%s4043_s25 + $0x1080] sm:$0xff] }
  0xe1   : > { %1163 = vst [vmem:[%s4048_s26 + $0x688] sm:$0xff] %v1162_v17  ;;  %v1290_v17 = vld [vmem:[%s4043_s25 + $0x1088] sm:$0xff] }
  0xe2   : > { %1165 = vst [vmem:[%s4048_s26 + $0x690] sm:$0xff] %v1164_v18  ;;  %v1292_v18 = vld [vmem:[%s4043_s25 + $0x1090] sm:$0xff] }
  0xe3   : > { %1167 = vst [vmem:[%s4048_s26 + $0x698] sm:$0xff] %v1166_v19  ;;  %v1294_v19 = vld [vmem:[%s4043_s25 + $0x1098] sm:$0xff] }
  0xe4   : > { %1169 = vst [vmem:[%s4048_s26 + $0x6a0] sm:$0xff] %v1168_v20  ;;  %v1296_v20 = vld [vmem:[%s4043_s25 + $0x10a0] sm:$0xff] }
  0xe5   : > { %1171 = vst [vmem:[%s4048_s26 + $0x6a8] sm:$0xff] %v1170_v21  ;;  %v1298_v21 = vld [vmem:[%s4043_s25 + $0x10a8] sm:$0xff] }
  0xe6   : > { %1173 = vst [vmem:[%s4048_s26 + $0x6b0] sm:$0xff] %v1172_v22  ;;  %v1300_v22 = vld [vmem:[%s4043_s25 + $0x10b0] sm:$0xff] }
  0xe7   : > { %1175 = vst [vmem:[%s4048_s26 + $0x6b8] sm:$0xff] %v1174_v23  ;;  %v1302_v23 = vld [vmem:[%s4043_s25 + $0x10b8] sm:$0xff] }
  0xe8   : > { %1177 = vst [vmem:[%s4048_s26 + $0x6c0] sm:$0xff] %v1176_v24  ;;  %v1304_v24 = vld [vmem:[%s4043_s25 + $0x10c0] sm:$0xff] }
  0xe9   : > { %1179 = vst [vmem:[%s4048_s26 + $0x6c8] sm:$0xff] %v1178_v25  ;;  %v1306_v25 = vld [vmem:[%s4043_s25 + $0x10c8] sm:$0xff] }
  0xea   : > { %1181 = vst [vmem:[%s4048_s26 + $0x6d0] sm:$0xff] %v1180_v26  ;;  %v1308_v26 = vld [vmem:[%s4043_s25 + $0x10d0] sm:$0xff] }
  0xeb   : > { %1183 = vst [vmem:[%s4048_s26 + $0x6d8] sm:$0xff] %v1182_v27  ;;  %v1310_v27 = vld [vmem:[%s4043_s25 + $0x10d8] sm:$0xff] }
  0xec   : > { %1185 = vst [vmem:[%s4048_s26 + $0x6e0] sm:$0xff] %v1184_v28  ;;  %v1312_v28 = vld [vmem:[%s4043_s25 + $0x10e0] sm:$0xff] }
  0xed   : > { %1187 = vst [vmem:[%s4048_s26 + $0x6e8] sm:$0xff] %v1186_v29  ;;  %v1314_v29 = vld [vmem:[%s4043_s25 + $0x10e8] sm:$0xff] }
  0xee   : > { %1189 = vst [vmem:[%s4048_s26 + $0x6f0] sm:$0xff] %v1188_v30  ;;  %v1316_v30 = vld [vmem:[%s4043_s25 + $0x10f0] sm:$0xff] }
  0xef   : > { %1191 = vst [vmem:[%s4048_s26 + $0x6f8] sm:$0xff] %v1190_v31  ;;  %v1318_v31 = vld [vmem:[%s4043_s25 + $0x10f8] sm:$0xff] }
  0xf0   : > { %1193 = vst [vmem:[%s4048_s26 + $0x700] sm:$0xff] %v1192_v32 }
  0xf1   : > { %1195 = vst [vmem:[%s4048_s26 + $0x708] sm:$0xff] %v1194_v33 }
  0xf2   : > { %1197 = vst [vmem:[%s4048_s26 + $0x710] sm:$0xff] %v1196_v34 }
  0xf3   : > { %1199 = vst [vmem:[%s4048_s26 + $0x718] sm:$0xff] %v1198_v35 }
  0xf4   : > { %1201 = vst [vmem:[%s4048_s26 + $0x720] sm:$0xff] %v1200_v36 }
  0xf5   : > { %1203 = vst [vmem:[%s4048_s26 + $0x728] sm:$0xff] %v1202_v37 }
  0xf6   : > { %1205 = vst [vmem:[%s4048_s26 + $0x730] sm:$0xff] %v1204_v38 }
  0xf7   : > { %1207 = vst [vmem:[%s4048_s26 + $0x738] sm:$0xff] %v1206_v39 }
  0xf8   : > { %1209 = vst [vmem:[%s4048_s26 + $0x740] sm:$0xff] %v1208_v40 }
  0xf9   : > { %1211 = vst [vmem:[%s4048_s26 + $0x748] sm:$0xff] %v1210_v41 }
  0xfa   : > { %1213 = vst [vmem:[%s4048_s26 + $0x750] sm:$0xff] %v1212_v42 }
  0xfb   : > { %1215 = vst [vmem:[%s4048_s26 + $0x758] sm:$0xff] %v1214_v43 }
  0xfc   : > { %1217 = vst [vmem:[%s4048_s26 + $0x760] sm:$0xff] %v1216_v44 }
  0xfd   : > { %1219 = vst [vmem:[%s4048_s26 + $0x768] sm:$0xff] %v1218_v45 }
  0xfe   : > { %1221 = vst [vmem:[%s4048_s26 + $0x770] sm:$0xff] %v1220_v46 }
  0xff   : > { %1223 = vst [vmem:[%s4048_s26 + $0x778] sm:$0xff] %v1222_v47 }
 0x100   : > { %1225 = vst [vmem:[%s4048_s26 + $0x780] sm:$0xff] %v1224_v48 }
 0x101   : > { %1227 = vst [vmem:[%s4048_s26 + $0x788] sm:$0xff] %v1226_v49 }
 0x102   : > { %1229 = vst [vmem:[%s4048_s26 + $0x790] sm:$0xff] %v1228_v50 }
 0x103   : > { %1231 = vst [vmem:[%s4048_s26 + $0x798] sm:$0xff] %v1230_v51 }
 0x104   : > { %1233 = vst [vmem:[%s4048_s26 + $0x7a0] sm:$0xff] %v1232_v52 }
 0x105   : > { %1235 = vst [vmem:[%s4048_s26 + $0x7a8] sm:$0xff] %v1234_v53 }
 0x106   : > { %1237 = vst [vmem:[%s4048_s26 + $0x7b0] sm:$0xff] %v1236_v54 }
 0x107   : > { %1239 = vst [vmem:[%s4048_s26 + $0x7b8] sm:$0xff] %v1238_v55 }
 0x108   : > { %1241 = vst [vmem:[%s4048_s26 + $0x7c0] sm:$0xff] %v1240_v56 }
 0x109   : > { %1243 = vst [vmem:[%s4048_s26 + $0x7c8] sm:$0xff] %v1242_v57 }
 0x10a   : > { %1245 = vst [vmem:[%s4048_s26 + $0x7d0] sm:$0xff] %v1244_v58 }
 0x10b   : > { %1247 = vst [vmem:[%s4048_s26 + $0x7d8] sm:$0xff] %v1246_v59 }
 0x10c   : > { %1249 = vst [vmem:[%s4048_s26 + $0x7e0] sm:$0xff] %v1248_v60 }
 0x10d   : > { %1251 = vst [vmem:[%s4048_s26 + $0x7e8] sm:$0xff] %v1250_v61 }
 0x10e   : > { %1253 = vst [vmem:[%s4048_s26 + $0x7f0] sm:$0xff] %v1252_v62 }
 0x10f   : > { %1255 = vst [vmem:[%s4048_s26 + $0x7f8] sm:$0xff] %v1254_v63 }
 0x110   : > { %1257 = vst [vmem:[%s4048_s26 + $0x800] sm:$0xff] %v1256_v0 }
 0x111   : > { %1259 = vst [vmem:[%s4048_s26 + $0x808] sm:$0xff] %v1258_v1 }
 0x112   : > { %1261 = vst [vmem:[%s4048_s26 + $0x810] sm:$0xff] %v1260_v2 }
 0x113   : > { %1263 = vst [vmem:[%s4048_s26 + $0x818] sm:$0xff] %v1262_v3 }
 0x114   : > { %1265 = vst [vmem:[%s4048_s26 + $0x820] sm:$0xff] %v1264_v4 }
 0x115   : > { %1267 = vst [vmem:[%s4048_s26 + $0x828] sm:$0xff] %v1266_v5 }
 0x116   : > { %1269 = vst [vmem:[%s4048_s26 + $0x830] sm:$0xff] %v1268_v6 }
 0x117   : > { %1271 = vst [vmem:[%s4048_s26 + $0x838] sm:$0xff] %v1270_v7 }
 0x118   : > { %1273 = vst [vmem:[%s4048_s26 + $0x840] sm:$0xff] %v1272_v8 }
 0x119   : > { %1275 = vst [vmem:[%s4048_s26 + $0x848] sm:$0xff] %v1274_v9 }
 0x11a   : > { %1277 = vst [vmem:[%s4048_s26 + $0x850] sm:$0xff] %v1276_v10 }
 0x11b   : > { %1279 = vst [vmem:[%s4048_s26 + $0x858] sm:$0xff] %v1278_v11 }
 0x11c   : > { %1281 = vst [vmem:[%s4048_s26 + $0x860] sm:$0xff] %v1280_v12 }
 0x11d   : > { %1283 = vst [vmem:[%s4048_s26 + $0x868] sm:$0xff] %v1282_v13 }
 0x11e   : > { %1285 = vst [vmem:[%s4048_s26 + $0x870] sm:$0xff] %v1284_v14 }
 0x11f   : > { %1287 = vst [vmem:[%s4048_s26 + $0x878] sm:$0xff] %v1286_v15 }
 0x120   : > { %1289 = vst [vmem:[%s4048_s26 + $0x880] sm:$0xff] %v1288_v16 }
 0x121   : > { %1291 = vst [vmem:[%s4048_s26 + $0x888] sm:$0xff] %v1290_v17 }
 0x122   : > { %1293 = vst [vmem:[%s4048_s26 + $0x890] sm:$0xff] %v1292_v18 }
 0x123   : > { %1295 = vst [vmem:[%s4048_s26 + $0x898] sm:$0xff] %v1294_v19 }
 0x124   : > { %1297 = vst [vmem:[%s4048_s26 + $0x8a0] sm:$0xff] %v1296_v20 }
 0x125   : > { %1299 = vst [vmem:[%s4048_s26 + $0x8a8] sm:$0xff] %v1298_v21 }
 0x126   : > { %1301 = vst [vmem:[%s4048_s26 + $0x8b0] sm:$0xff] %v1300_v22 }
 0x127   : > { %1303 = vst [vmem:[%s4048_s26 + $0x8b8] sm:$0xff] %v1302_v23 }
 0x128   : > { %1305 = vst [vmem:[%s4048_s26 + $0x8c0] sm:$0xff] %v1304_v24 }
 0x129   : > { %1307 = vst [vmem:[%s4048_s26 + $0x8c8] sm:$0xff] %v1306_v25 }
 0x12a   : > { %1309 = vst [vmem:[%s4048_s26 + $0x8d0] sm:$0xff] %v1308_v26 }
 0x12b   : > { %1311 = vst [vmem:[%s4048_s26 + $0x8d8] sm:$0xff] %v1310_v27 }
 0x12c   : > { %1313 = vst [vmem:[%s4048_s26 + $0x8e0] sm:$0xff] %v1312_v28 }
 0x12d   : > { %1315 = vst [vmem:[%s4048_s26 + $0x8e8] sm:$0xff] %v1314_v29 }
 0x12e   : > { %1317 = vst [vmem:[%s4048_s26 + $0x8f0] sm:$0xff] %v1316_v30 }
 0x12f   : > { %1319 = vst [vmem:[%s4048_s26 + $0x8f8] sm:$0xff] %v1318_v31 }
 0x130 PF: > { %p3638_p5 = scmp.ge.s32.totalorder %s3985_s14, 1  ;;  %p2511_p6 = scmp.lt.s32.totalorder %s3985_s14, 3 }
 0x132   : > { %p2512_p7 = pnand %p3638_p5, %p2511_p6 }
 0x133   : > { %s2518_s29 = sand.u32 (!%p2512_p7), 1, %s3977_s12   ;;  %s3639_s5 = sshll.u32 (!%p2512_p7), %s4023_s15, 5 }
 0x134   : > { %2515 = sbr.rel (%p2512_p7) target bundleno = 583 (0x247), region = 76  ;;  %p2547_p8 = scmp.lt.s32.totalorder (!%p2512_p7), %s3639_s5, 63 }
 0x135   : > { %s3938_s30 = smul.u32 (!%p2512_p7), 2304, %s2518_s29  ;;  %p2552_p9 = scmp.lt.s32.totalorder (!%p2512_p7), %s4023_s15, 1 }
 0x137   : > { %s4629_s4 = scalar_lea.vmem (!%p2512_p7), [#allocation2], %s3938_s30 }
 0x139   : > { %v3108_v32 = vld [vmem:[%s5179_s1] sm:$0xf]  ;;  %vm3206_vm0 = vcmask 1043456   ;;  %v2557_v39 = vld [vmem:[%s4629_s4 + $0x8] sm:$0xff]  ;;  %v2558_v48 = vld [vmem:[%s4629_s4 + $0x10] sm:$0xff]  ;;  %vm3109_vm1 = vcmask 31744  }
 0x13a   : > { %3898 = vmatpush.msk.msra.mxu0 %vm3206_vm0, %v3108_v32  ;;  %3934 = vmatpush.msk.msra.mxu1 %vm3206_vm0, %v3108_v32  ;;  %v2556_v33 = vld [vmem:[%s4629_s4] sm:$0xff]  ;;  %v3643_v40 = vld [vmem:[%s4629_s4 + $0x108] sm:$0xff]  ;;  %v3644_v49 = vld [vmem:[%s4629_s4 + $0x110] sm:$0xff]  ;;  %s5186_s5 = smov (!%p2547_p8, %s3639_s5), 63  ;;  %vm3323_vm2 = vcmask 64512   ;;  %s5188_s15 = smov (!%p2552_p9, %s4023_s15), 1 }
 0x13b   : > { %3935 = vmatpush.msk.msra.mxu2 %vm3206_vm0, %v3108_v32  ;;  %3936 = vmatpush.msk.msra.mxu3 %vm3206_vm0, %v3108_v32  ;;  %v3642_v34 = vld [vmem:[%s4629_s4 + $0x100] sm:$0xff]  ;;  %v3675_v41 = vld [vmem:[%s4629_s4 + $0x208] sm:$0xff]  ;;  %v2622_v43 = vmax.f32 %v2557_v39, %v3643_v40  ;;  %v3676_v50 = vld [vmem:[%s4629_s4 + $0x210] sm:$0xff]  ;;  %v2623_v53 = vmax.f32 %v2558_v48, %v3644_v49  ;;  %s3640_s6 = sshll.u32 %s5186_s5, 3  ;;  %s3641_s10 = sshll.u32 %s5188_s15, 1  ;;  %vm3526_vm3 = vcmask 1040384  }
 0x13c   : > { %v3674_v35 = vld [vmem:[%s4629_s4 + $0x200] sm:$0xff]  ;;  %v2621_v36 = vmax.f32 %v2556_v33, %v3642_v34  ;;  %v3707_v46 = vld [vmem:[%s4629_s4 + $0x308] sm:$0xff]  ;;  %v3708_v57 = vld [vmem:[%s4629_s4 + $0x310] sm:$0xff]  ;;  %s4955_s9 = scalar_lea.vmem %s5180_s2, %s3640_s6  ;;  %s2555_s14 = scalar_lea.vmem %s5181_s3, %s3641_s10  ;;  %vm3528_vm4 = vcmask 58368  }
 0x13d   : > { %v3706_v37 = vld [vmem:[%s4629_s4 + $0x300] sm:$0xff]  ;;  %v2687_v47 = vmax.f32 %v2622_v43, %v3675_v41  ;;  %v3739_v52 = vld [vmem:[%s4629_s4 + $0x408] sm:$0xff]  ;;  %v2688_v59 = vmax.f32 %v2623_v53, %v3676_v50  ;;  %v3740_v1 = vld [vmem:[%s4629_s4 + $0x410] sm:$0xff] }
 0x13e   : > { %v2686_v38 = vmax.f32 %v2621_v36, %v3674_v35  ;;  %v3738_v42 = vld [vmem:[%s4629_s4 + $0x400] sm:$0xff]  ;;  %v3771_v56 = vld [vmem:[%s4629_s4 + $0x508] sm:$0xff]  ;;  %v2559_v10 = vld [vmem:[%s4629_s4 + $0x18] sm:$0xff] }
 0x13f   : > { %v3770_v45 = vld [vmem:[%s4629_s4 + $0x500] sm:$0xff]  ;;  %v2752_v55 = vmax.f32 %v2687_v47, %v3707_v46  ;;  %v3803_v5 = vld [vmem:[%s4629_s4 + $0x608] sm:$0xff]  ;;  %v2753_v6 = vmax.f32 %v2688_v59, %v3708_v57  ;;  %v3645_v11 = vld [vmem:[%s4629_s4 + $0x118] sm:$0xff] }
 0x140   : > { %v2751_v44 = vmax.f32 %v2686_v38, %v3706_v37  ;;  %v3802_v54 = vld [vmem:[%s4629_s4 + $0x600] sm:$0xff]  ;;  %v3677_v12 = vld [vmem:[%s4629_s4 + $0x218] sm:$0xff]  ;;  %v3835_v14 = vld [vmem:[%s4629_s4 + $0x708] sm:$0xff]  ;;  %v2624_v17 = vmax.f32 %v2559_v10, %v3645_v11 }
 0x141   : > { %v2564_v60 = vld [vmem:[%s4629_s4 + $0x40] sm:$0xff]  ;;  %v2817_v0 = vmax.f32 %v2752_v55, %v3739_v52  ;;  %v2818_v15 = vmax.f32 %v2753_v6, %v3740_v1  ;;  %v3772_v19 = vld [vmem:[%s4629_s4 + $0x510] sm:$0xff]  ;;  %v3709_v22 = vld [vmem:[%s4629_s4 + $0x318] sm:$0xff] }
 0x142   : > { %v2816_v51 = vmax.f32 %v2751_v44, %v3738_v42  ;;  %v3650_v61 = vld [vmem:[%s4629_s4 + $0x140] sm:$0xff]  ;;  %v2689_v24 = vmax.f32 %v2624_v17, %v3677_v12  ;;  %v2565_v25 = vld [vmem:[%s4629_s4 + $0x48] sm:$0xff]  ;;  %v3804_v29 = vld [vmem:[%s4629_s4 + $0x610] sm:$0xff] }
 0x143   : > { %v3682_v62 = vld [vmem:[%s4629_s4 + $0x240] sm:$0xff]  ;;  %v2629_v2 = vmax.f32 %v2564_v60, %v3650_v61  ;;  %v2882_v8 = vmax.f32 %v2817_v0, %v3771_v56  ;;  %v3651_v26 = vld [vmem:[%s4629_s4 + $0x148] sm:$0xff]  ;;  %v2883_v33 = vmax.f32 %v2818_v15, %v3772_v19  ;;  %v3741_v36 = vld [vmem:[%s4629_s4 + $0x418] sm:$0xff] }
 0x144   : > { %v2881_v58 = vmax.f32 %v2816_v51, %v3770_v45  ;;  %v3834_v63 = vld [vmem:[%s4629_s4 + $0x700] sm:$0xff]  ;;  %v3683_v27 = vld [vmem:[%s4629_s4 + $0x248] sm:$0xff]  ;;  %v2630_v31 = vmax.f32 %v2565_v25, %v3651_v26  ;;  %v2754_v35 = vmax.f32 %v2689_v24, %v3709_v22  ;;  %v3773_v49 = vld [vmem:[%s4629_s4 + $0x518] sm:$0xff] }
 0x145   : > { %v3866_v4 = vld [vmem:[%s4629_s4 + $0x800] sm:$0xff]  ;;  %v2694_v9 = vmax.f32 %v2629_v2, %v3682_v62  ;;  %v2947_v18 = vmax.f32 %v2882_v8, %v3803_v5  ;;  %v3867_v28 = vld [vmem:[%s4629_s4 + $0x808] sm:$0xff]  ;;  %v3836_v59 = vld [vmem:[%s4629_s4 + $0x710] sm:$0xff] }
 0x146   : > { %v2946_v3 = vmax.f32 %v2881_v58, %v3802_v54  ;;  %v3714_v7 = vld [vmem:[%s4629_s4 + $0x340] sm:$0xff]  ;;  %v3715_v37 = vld [vmem:[%s4629_s4 + $0x348] sm:$0xff]  ;;  %v2695_v39 = vmax.f32 %v2630_v31, %v3683_v27  ;;  %v2819_v48 = vmax.f32 %v2754_v35, %v3741_v36  ;;  %v2948_v54 = vmax.f32 %v2883_v33, %v3804_v29  ;;  %v3652_v10 = vld [vmem:[%s4629_s4 + $0x150] sm:$0xff] }
 0x147   : > { %v3746_v16 = vld [vmem:[%s4629_s4 + $0x440] sm:$0xff]  ;;  %v2759_v20 = vmax.f32 %v2694_v9, %v3714_v7  ;;  %v3012_v32 = vmax.f32 %v2947_v18, %v3835_v14  ;;  %v3747_v45 = vld [vmem:[%s4629_s4 + $0x448] sm:$0xff]  ;;  %v2566_v9 = vld [vmem:[%s4629_s4 + $0x50] sm:$0xff] }
 0x148   : > { %v3011_v13 = vmax.f32 %v2946_v3, %v3834_v63  ;;  %v3778_v21 = vld [vmem:[%s4629_s4 + $0x540] sm:$0xff]  ;;  %v2760_v50 = vmax.f32 %v2695_v39, %v3715_v37  ;;  %v3779_v51 = vld [vmem:[%s4629_s4 + $0x548] sm:$0xff]  ;;  %v2884_v6 = vmax.f32 %v2819_v48, %v3773_v49  ;;  %v3684_v11 = vld [vmem:[%s4629_s4 + $0x250] sm:$0xff]  ;;  %v3013_v12 = vmax.f32 %v2948_v54, %v3836_v59 }
 0x149   : > { %v2824_v30 = vmax.f32 %v2759_v20, %v3746_v16  ;;  %v3810_v34 = vld [vmem:[%s4629_s4 + $0x640] sm:$0xff]  ;;  %v3077_v53 = vmax.f32 %v3012_v32, %v3867_v28  ;;  %v3811_v0 = vld [vmem:[%s4629_s4 + $0x648] sm:$0xff]  ;;  %v2631_v17 = vmax.f32 %v2566_v9, %v3652_v10  ;;  %v3716_v22 = vld [vmem:[%s4629_s4 + $0x350] sm:$0xff] }
 0x14a   : > { %v3076_v23 = vmax.f32 %v3011_v13, %v3866_v4  ;;  %v2572_v40 = vld [vmem:[%s4629_s4 + $0x80] sm:$0xff]  ;;  %v2825_v61 = vmax.f32 %v2760_v50, %v3747_v45  ;;  %v3868_v4 = vld [vmem:[%s4629_s4 + $0x810] sm:$0xff]  ;;  %v3805_v13 = vld [vmem:[%s4629_s4 + $0x618] sm:$0xff] }
 0x14b   : > { %v2889_v38 = vmax.f32 %v2824_v30, %v3778_v21  ;;  %v3658_v41 = vld [vmem:[%s4629_s4 + $0x180] sm:$0xff]  ;;  %v3843_v14 = vld [vmem:[%s4629_s4 + $0x748] sm:$0xff]  ;;  %v2696_v25 = vmax.f32 %v2631_v17, %v3684_v11  ;;  %v2949_v29 = vmax.f32 %v2884_v6, %v3805_v13  ;;  %v3748_v33 = vld [vmem:[%s4629_s4 + $0x450] sm:$0xff]  ;;  %v3078_v35 = vmax.f32 %v3013_v12, %v3868_v4 }
 0x14c   : > { %3899 = vmatmul.msk.f32.vlgmr.msra.gmra.mxu0 %vm3109_vm1, %v3076_v23  ;;  %v3690_v42 = vld [vmem:[%s4629_s4 + $0x280] sm:$0xff]  ;;  %v2637_v46 = vmax.f32 %v2572_v40, %v3658_v41  ;;  %v2890_v7 = vmax.f32 %v2825_v61, %v3779_v51  ;;  %v3875_v15 = vld [vmem:[%s4629_s4 + $0x848] sm:$0xff]  ;;  %v3837_v23 = vld [vmem:[%s4629_s4 + $0x718] sm:$0xff] }
 0x14d   : > { %v3842_v43 = vld [vmem:[%s4629_s4 + $0x740] sm:$0xff]  ;;  %v2954_v47 = vmax.f32 %v2889_v38, %v3810_v34  ;;  %v2573_v26 = vld [vmem:[%s4629_s4 + $0x88] sm:$0xff]  ;;  %v2761_v39 = vmax.f32 %v2696_v25, %v3716_v22  ;;  %v3780_v40 = vld [vmem:[%s4629_s4 + $0x550] sm:$0xff] }
 0x14e   : > { %v3874_v44 = vld [vmem:[%s4629_s4 + $0x840] sm:$0xff]  ;;  %v2702_v55 = vmax.f32 %v2637_v46, %v3690_v42  ;;  %v2955_v18 = vmax.f32 %v2890_v7, %v3811_v0  ;;  %v3659_v27 = vld [vmem:[%s4629_s4 + $0x188] sm:$0xff]  ;;  %v2567_v61 = vld [vmem:[%s4629_s4 + $0x58] sm:$0xff] }
 0x14f   : > { %v3722_v52 = vld [vmem:[%s4629_s4 + $0x380] sm:$0xff]  ;;  %v3019_v60 = vmax.f32 %v2954_v47, %v3842_v43  ;;  %v3691_v28 = vld [vmem:[%s4629_s4 + $0x288] sm:$0xff]  ;;  %v2638_v34 = vmax.f32 %v2573_v26, %v3659_v27  ;;  %v3869_v47 = vld [vmem:[%s4629_s4 + $0x818] sm:$0xff]  ;;  %v2826_v49 = vmax.f32 %v2761_v39, %v3748_v33 }
 0x150   : > { %v2560_v56 = vld [vmem:[%s4629_s4 + $0x20] sm:$0xff]  ;;  %v2767_v1 = vmax.f32 %v2702_v55, %v3722_v52  ;;  %v3020_v30 = vmax.f32 %v2955_v18, %v3843_v14  ;;  %v3723_v41 = vld [vmem:[%s4629_s4 + $0x388] sm:$0xff]  ;;  %v3014_v52 = vmax.f32 %v2949_v29, %v3837_v23  ;;  %v3876_v6 = vld [vmem:[%s4629_s4 + $0x850] sm:$0xff] }
 0x151   : > { %v3646_v57 = vld [vmem:[%s4629_s4 + $0x120] sm:$0xff]  ;;  %v3084_v5 = vmax.f32 %v3019_v60, %v3874_v44  ;;  %v2703_v43 = vmax.f32 %v2638_v34, %v3691_v28  ;;  %v2561_v44 = vld [vmem:[%s4629_s4 + $0x28] sm:$0xff]  ;;  %v2891_v59 = vmax.f32 %v2826_v49, %v3780_v40  ;;  %v3717_v9 = vld [vmem:[%s4629_s4 + $0x358] sm:$0xff] }
 0x152   : > { %v3678_v58 = vld [vmem:[%s4629_s4 + $0x220] sm:$0xff]  ;;  %v2625_v63 = vmax.f32 %v2560_v56, %v3646_v57  ;;  %v3085_v42 = vmax.f32 %v3020_v30, %v3875_v15  ;;  %v3647_v45 = vld [vmem:[%s4629_s4 + $0x128] sm:$0xff]  ;;  %v3079_v10 = vmax.f32 %v3014_v52, %v3869_v47  ;;  %v2574_v14 = vld [vmem:[%s4629_s4 + $0x90] sm:$0xff] }
 0x153   : > { %v3754_v62 = vld [vmem:[%s4629_s4 + $0x480] sm:$0xff]  ;;  %3907 = vmatmul.msk.f32.vlgmr.msra.gmra.mxu1 %vm3109_vm1, %v3084_v5  ;;  %v3679_v46 = vld [vmem:[%s4629_s4 + $0x228] sm:$0xff]  ;;  %v2626_v51 = vmax.f32 %v2561_v44, %v3647_v45  ;;  %v2768_v54 = vmax.f32 %v2703_v43, %v3723_v41  ;;  %v3660_v15 = vld [vmem:[%s4629_s4 + $0x190] sm:$0xff] }
 0x154   : > { %v3786_v2 = vld [vmem:[%s4629_s4 + $0x580] sm:$0xff]  ;;  %v2690_v8 = vmax.f32 %v2625_v63, %v3678_v58  ;;  %3900 = vmatmul.msk.f32.gmra.mxu0 %vm3109_vm1, %v3077_v53  ;;  %v2832_v16 = vmax.f32 %v2767_v1, %v3754_v62  ;;  %v3755_v50 = vld [vmem:[%s4629_s4 + $0x488] sm:$0xff]  ;;  %v3812_v53 = vld [vmem:[%s4629_s4 + $0x650] sm:$0xff]  ;;  %v2639_v23 = vmax.f32 %v2574_v14, %v3660_v15 }
 0x155   : > { %v3710_v3 = vld [vmem:[%s4629_s4 + $0x320] sm:$0xff]  ;;  %v3787_v55 = vld [vmem:[%s4629_s4 + $0x588] sm:$0xff]  ;;  %v2691_v60 = vmax.f32 %v2626_v51, %v3679_v46  ;;  %v3653_v62 = vld [vmem:[%s4629_s4 + $0x158] sm:$0xff]  ;;  %v2956_v5 = vmax.f32 %v2891_v59, %v3812_v53 }
 0x156   : > { %v3818_v19 = vld [vmem:[%s4629_s4 + $0x680] sm:$0xff]  ;;  %v2755_v20 = vmax.f32 %v2690_v8, %v3710_v3  ;;  %v2897_v24 = vmax.f32 %v2832_v16, %v3786_v2  ;;  %v3711_v56 = vld [vmem:[%s4629_s4 + $0x328] sm:$0xff]  ;;  %v3685_v63 = vld [vmem:[%s4629_s4 + $0x258] sm:$0xff]  ;;  %v2833_v2 = vmax.f32 %v2768_v54, %v3755_v50  ;;  %v2632_v4 = vmax.f32 %v2567_v61, %v3653_v62 }
 0x157   : > { %v3742_v21 = vld [vmem:[%s4629_s4 + $0x420] sm:$0xff]  ;;  %v3844_v1 = vld [vmem:[%s4629_s4 + $0x750] sm:$0xff]  ;;  %v3743_v3 = vld [vmem:[%s4629_s4 + $0x428] sm:$0xff]  ;;  %v2756_v8 = vmax.f32 %v2691_v60, %v3711_v56 }
 0x158   : > { %v3850_v31 = vld [vmem:[%s4629_s4 + $0x780] sm:$0xff]  ;;  %v2962_v36 = vmax.f32 %v2897_v24, %v3818_v19  ;;  %v2820_v37 = vmax.f32 %v2755_v20, %v3742_v21  ;;  %v3819_v7 = vld [vmem:[%s4629_s4 + $0x688] sm:$0xff]  ;;  %v2898_v12 = vmax.f32 %v2833_v2, %v3787_v55  ;;  %v2697_v13 = vmax.f32 %v2632_v4, %v3685_v63  ;;  %v3692_v16 = vld [vmem:[%s4629_s4 + $0x290] sm:$0xff] }
 0x159   : > { %v3882_v32 = vld [vmem:[%s4629_s4 + $0x880] sm:$0xff]  ;;  %v3021_v18 = vmax.f32 %v2956_v5, %v3844_v1  ;;  %v3851_v19 = vld [vmem:[%s4629_s4 + $0x788] sm:$0xff]  ;;  %v2821_v21 = vmax.f32 %v2756_v8, %v3743_v3  ;;  %v3749_v22 = vld [vmem:[%s4629_s4 + $0x458] sm:$0xff]  ;;  %v2704_v30 = vmax.f32 %v2639_v23, %v3692_v16 }
 0x15a   : > { %v3774_v38 = vld [vmem:[%s4629_s4 + $0x520] sm:$0xff]  ;;  %v3027_v48 = vmax.f32 %v2962_v36, %v3850_v31  ;;  %v3883_v20 = vld [vmem:[%s4629_s4 + $0x888] sm:$0xff]  ;;  %v2963_v24 = vmax.f32 %v2898_v12, %v3819_v7  ;;  %v2762_v26 = vmax.f32 %v2697_v13, %v3717_v9  ;;  %v3781_v27 = vld [vmem:[%s4629_s4 + $0x558] sm:$0xff] }
 0x15b   : > { %v2885_v58 = vmax.f32 %v2820_v37, %v3774_v38  ;;  %3908 = vmatmul.msk.f32.gmra.mxu1 %vm3109_vm1, %v3085_v42  ;;  %v3806_v0 = vld [vmem:[%s4629_s4 + $0x620] sm:$0xff]  ;;  %v3775_v25 = vld [vmem:[%s4629_s4 + $0x528] sm:$0xff]  ;;  %v3724_v28 = vld [vmem:[%s4629_s4 + $0x390] sm:$0xff]  ;;  %v3086_v29 = vmax.f32 %v3021_v18, %v3876_v6 }
 0x15c   : > { %3901 = vmatmul.msk.f32.gmra.mxu0 %vm3109_vm1, %v3078_v35  ;;  %v3092_v57 = vmax.f32 %v3027_v48, %v3882_v32  ;;  %v3838_v11 = vld [vmem:[%s4629_s4 + $0x720] sm:$0xff]  ;;  %v3028_v35 = vmax.f32 %v2963_v24, %v3851_v19  ;;  %v3807_v36 = vld [vmem:[%s4629_s4 + $0x628] sm:$0xff]  ;;  %v2827_v37 = vmax.f32 %v2762_v26, %v3749_v22  ;;  %v3756_v38 = vld [vmem:[%s4629_s4 + $0x490] sm:$0xff]  ;;  %v2886_v41 = vmax.f32 %v2821_v21, %v3775_v25 }
 0x15d   : > { %v2950_v17 = vmax.f32 %v2885_v58, %v3806_v0  ;;  %v2580_v31 = vld [vmem:[%s4629_s4 + $0xc0] sm:$0xff]  ;;  %v3813_v42 = vld [vmem:[%s4629_s4 + $0x658] sm:$0xff]  ;;  %v2769_v43 = vmax.f32 %v2704_v30, %v3724_v28  ;;  %v3788_v44 = vld [vmem:[%s4629_s4 + $0x590] sm:$0xff] }
 0x15e   : > { %3915 = vmatmul.msk.f32.vlgmr.msra.gmra.mxu2 %vm3109_vm1, %v3092_v57  ;;  %v3666_v32 = vld [vmem:[%s4629_s4 + $0x1c0] sm:$0xff]  ;;  %v3093_v46 = vmax.f32 %v3028_v35, %v3883_v20  ;;  %v2892_v47 = vmax.f32 %v2827_v37, %v3781_v27  ;;  %v2562_v49 = vld [vmem:[%s4629_s4 + $0x30] sm:$0xff]  ;;  %v3845_v52 = vld [vmem:[%s4629_s4 + $0x758] sm:$0xff]  ;;  %v2951_v0 = vmax.f32 %v2886_v41, %v3807_v36 }
 0x15f   : > { %v3698_v33 = vld [vmem:[%s4629_s4 + $0x2c0] sm:$0xff]  ;;  %v2645_v39 = vmax.f32 %v2580_v31, %v3666_v32  ;;  %v3015_v40 = vmax.f32 %v2950_v17, %v3838_v11  ;;  %v3648_v50 = vld [vmem:[%s4629_s4 + $0x130] sm:$0xff]  ;;  %v3877_v53 = vld [vmem:[%s4629_s4 + $0x858] sm:$0xff]  ;;  %v2834_v54 = vmax.f32 %v2769_v43, %v3756_v38 }
 0x160   : > { %v3870_v34 = vld [vmem:[%s4629_s4 + $0x820] sm:$0xff]  ;;  %v3680_v51 = vld [vmem:[%s4629_s4 + $0x230] sm:$0xff]  ;;  %v2627_v56 = vmax.f32 %v2562_v49, %v3648_v50  ;;  %v3839_v57 = vld [vmem:[%s4629_s4 + $0x728] sm:$0xff]  ;;  %v2957_v58 = vmax.f32 %v2892_v47, %v3813_v42 }
 0x161   : > { %v3730_v45 = vld [vmem:[%s4629_s4 + $0x3c0] sm:$0xff]  ;;  %v2710_v48 = vmax.f32 %v2645_v39, %v3698_v33  ;;  %v3820_v59 = vld [vmem:[%s4629_s4 + $0x690] sm:$0xff]  ;;  %v3080_v63 = vmax.f32 %v3015_v40, %v3870_v34  ;;  %v2899_v1 = vmax.f32 %v2834_v54, %v3788_v44  ;;  %v3871_v17 = vld [vmem:[%s4629_s4 + $0x828] sm:$0xff]  ;;  %v3016_v24 = vmax.f32 %v2951_v0, %v3839_v57 }
 0x162   : > { %v3762_v55 = vld [vmem:[%s4629_s4 + $0x4c0] sm:$0xff]  ;;  %v3712_v62 = vld [vmem:[%s4629_s4 + $0x330] sm:$0xff]  ;;  %v2692_v2 = vmax.f32 %v2627_v56, %v3680_v51  ;;  %v3022_v6 = vmax.f32 %v2957_v58, %v3845_v52  ;;  %v2575_v21 = vld [vmem:[%s4629_s4 + $0x98] sm:$0xff] }
 0x163   : > { %3909 = vmatmul.msk.f32.gmra.mxu1 %vm3109_vm1, %v3086_v29  ;;  %v2775_v60 = vmax.f32 %v2710_v48, %v3730_v45  ;;  %v3794_v61 = vld [vmem:[%s4629_s4 + $0x5c0] sm:$0xff]  ;;  %v3852_v7 = vld [vmem:[%s4629_s4 + $0x790] sm:$0xff]  ;;  %v2964_v12 = vmax.f32 %v2899_v1, %v3820_v59  ;;  %v3661_v22 = vld [vmem:[%s4629_s4 + $0x198] sm:$0xff]  ;;  %v3081_v47 = vmax.f32 %v3016_v24, %v3871_v17 }
 0x164   : > { %3902 = vmatmul.msk.f32.gmra.mxu0 %vm3109_vm1, %v3079_v10  ;;  %v2568_v3 = vld [vmem:[%s4629_s4 + $0x60] sm:$0xff]  ;;  %v3884_v8 = vld [vmem:[%s4629_s4 + $0x890] sm:$0xff]  ;;  %v2757_v14 = vmax.f32 %v2692_v2, %v3712_v62  ;;  %v3087_v18 = vmax.f32 %v3022_v6, %v3877_v53  ;;  %v3693_v23 = vld [vmem:[%s4629_s4 + $0x298] sm:$0xff]  ;;  %v2640_v30 = vmax.f32 %v2575_v21, %v3661_v22 }
 0x165   : > { %v3654_v4 = vld [vmem:[%s4629_s4 + $0x160] sm:$0xff]  ;;  %v2840_v9 = vmax.f32 %v2775_v60, %v3762_v55  ;;  %v3744_v10 = vld [vmem:[%s4629_s4 + $0x430] sm:$0xff]  ;;  %v3029_v25 = vmax.f32 %v2964_v12, %v3852_v7  ;;  %v3725_v35 = vld [vmem:[%s4629_s4 + $0x398] sm:$0xff] }
 0x166   : > { %3916 = vmatmul.msk.f32.gmra.mxu2 %vm3109_vm1, %v3093_v46  ;;  %v3686_v5 = vld [vmem:[%s4629_s4 + $0x260] sm:$0xff]  ;;  %v2633_v11 = vmax.f32 %v2568_v3, %v3654_v4  ;;  %v3776_v15 = vld [vmem:[%s4629_s4 + $0x530] sm:$0xff]  ;;  %v2822_v28 = vmax.f32 %v2757_v14, %v3744_v10  ;;  %v2705_v38 = vmax.f32 %v2640_v30, %v3693_v23  ;;  %v2581_v39 = vld [vmem:[%s4629_s4 + $0xc8] sm:$0xff] }
 0x167   : > { %v3826_v13 = vld [vmem:[%s4629_s4 + $0x6c0] sm:$0xff]  ;;  %v2905_v19 = vmax.f32 %v2840_v9, %v3794_v61  ;;  %v3808_v32 = vld [vmem:[%s4629_s4 + $0x630] sm:$0xff]  ;;  %v3094_v36 = vmax.f32 %v3029_v25, %v3884_v8  ;;  %v3667_v40 = vld [vmem:[%s4629_s4 + $0x1c8] sm:$0xff] }
 0x168   : > { %v3718_v16 = vld [vmem:[%s4629_s4 + $0x360] sm:$0xff]  ;;  %v2698_v20 = vmax.f32 %v2633_v11, %v3686_v5  ;;  %v2887_v37 = vmax.f32 %v2822_v28, %v3776_v15  ;;  %v3699_v41 = vld [vmem:[%s4629_s4 + $0x2c8] sm:$0xff]  ;;  %v3840_v43 = vld [vmem:[%s4629_s4 + $0x730] sm:$0xff]  ;;  %v2646_v46 = vmax.f32 %v2581_v39, %v3667_v40  ;;  %v2770_v50 = vmax.f32 %v2705_v38, %v3725_v35 }
 0x169   : > { %v3858_v26 = vld [vmem:[%s4629_s4 + $0x7c0] sm:$0xff]  ;;  %v2970_v31 = vmax.f32 %v2905_v19, %v3826_v13  ;;  %v3757_v45 = vld [vmem:[%s4629_s4 + $0x498] sm:$0xff]  ;;  %v3731_v52 = vld [vmem:[%s4629_s4 + $0x3c8] sm:$0xff] }
 0x16a   : > { %v3890_v27 = vld [vmem:[%s4629_s4 + $0x8c0] sm:$0xff]  ;;  %v2763_v33 = vmax.f32 %v2698_v20, %v3718_v16  ;;  %v2952_v48 = vmax.f32 %v2887_v37, %v3808_v32  ;;  %v3789_v51 = vld [vmem:[%s4629_s4 + $0x598] sm:$0xff]  ;;  %v2711_v55 = vmax.f32 %v2646_v46, %v3699_v41  ;;  %v2835_v61 = vmax.f32 %v2770_v50, %v3757_v45  ;;  %v3763_v62 = vld [vmem:[%s4629_s4 + $0x4c8] sm:$0xff] }
 0x16b   : > { %v3750_v29 = vld [vmem:[%s4629_s4 + $0x460] sm:$0xff]  ;;  %3910 = vmatmul.msk.f32.gmra.mxu1 %vm3109_vm1, %v3087_v18  ;;  %v3035_v42 = vmax.f32 %v2970_v31, %v3858_v26  ;;  %v2563_v56 = vld [vmem:[%s4629_s4 + $0x38] sm:$0xff]  ;;  %v3872_v0 = vld [vmem:[%s4629_s4 + $0x830] sm:$0xff] }
 0x16c   : > { %3903 = vmatmul.msk.f32.gmra.mxu0 %vm3109_vm1, %v3080_v63  ;;  %v3782_v34 = vld [vmem:[%s4629_s4 + $0x560] sm:$0xff]  ;;  %v2828_v44 = vmax.f32 %v2763_v33, %v3750_v29  ;;  %v3649_v57 = vld [vmem:[%s4629_s4 + $0x138] sm:$0xff]  ;;  %v2776_v3 = vmax.f32 %v2711_v55, %v3731_v52  ;;  %v3795_v4 = vld [vmem:[%s4629_s4 + $0x5c8] sm:$0xff]  ;;  %v3017_v6 = vmax.f32 %v2952_v48, %v3840_v43  ;;  %v2900_v7 = vmax.f32 %v2835_v61, %v3789_v51 }
 0x16d   : > { %v3814_v49 = vld [vmem:[%s4629_s4 + $0x660] sm:$0xff]  ;;  %v3100_v53 = vmax.f32 %v3035_v42, %v3890_v27  ;;  %v3681_v58 = vld [vmem:[%s4629_s4 + $0x238] sm:$0xff]  ;;  %v2628_v63 = vmax.f32 %v2563_v56, %v3649_v57  ;;  %v2569_v9 = vld [vmem:[%s4629_s4 + $0x68] sm:$0xff] }
 0x16e   : > { %3917 = vmatmul.msk.f32.gmra.mxu2 %vm3109_vm1, %v3094_v36  ;;  %v2893_v54 = vmax.f32 %v2828_v44, %v3782_v34  ;;  %v3846_v59 = vld [vmem:[%s4629_s4 + $0x760] sm:$0xff]  ;;  %v3821_v2 = vld [vmem:[%s4629_s4 + $0x698] sm:$0xff]  ;;  %v3655_v10 = vld [vmem:[%s4629_s4 + $0x168] sm:$0xff]  ;;  %v2841_v15 = vmax.f32 %v2776_v3, %v3763_v62  ;;  %v3082_v29 = vmax.f32 %v3017_v6, %v3872_v0 }
 0x16f   : > { %v3878_v60 = vld [vmem:[%s4629_s4 + $0x860] sm:$0xff]  ;;  %3923 = vmatmul.msk.f32.vlgmr.msra.gmra.mxu3 %vm3109_vm1, %v3100_v53  ;;  %v3713_v5 = vld [vmem:[%s4629_s4 + $0x338] sm:$0xff]  ;;  %v2693_v8 = vmax.f32 %v2628_v63, %v3681_v58  ;;  %v3687_v11 = vld [vmem:[%s4629_s4 + $0x268] sm:$0xff]  ;;  %v2634_v17 = vmax.f32 %v2569_v9, %v3655_v10  ;;  %v2965_v18 = vmax.f32 %v2900_v7, %v3821_v2 }
 0x170   : > { %v2958_v1 = vmax.f32 %v2893_v54, %v3814_v49  ;;  %v3853_v13 = vld [vmem:[%s4629_s4 + $0x798] sm:$0xff]  ;;  %v3827_v19 = vld [vmem:[%s4629_s4 + $0x6c8] sm:$0xff]  ;;  %v2906_v24 = vmax.f32 %v2841_v15, %v3795_v4  ;;  %v2576_v26 = vld [vmem:[%s4629_s4 + $0xa0] sm:$0xff] }
 0x171   : > { %v3885_v14 = vld [vmem:[%s4629_s4 + $0x898] sm:$0xff]  ;;  %v2758_v20 = vmax.f32 %v2693_v8, %v3713_v5  ;;  %v3719_v22 = vld [vmem:[%s4629_s4 + $0x368] sm:$0xff]  ;;  %v2699_v25 = vmax.f32 %v2634_v17, %v3687_v11  ;;  %v3662_v27 = vld [vmem:[%s4629_s4 + $0x1a0] sm:$0xff]  ;;  %v3030_v30 = vmax.f32 %v2965_v18, %v3853_v13 }
 0x172   : > { %v3023_v12 = vmax.f32 %v2958_v1, %v3846_v59  ;;  %v3745_v16 = vld [vmem:[%s4629_s4 + $0x438] sm:$0xff]  ;;  %v3694_v28 = vld [vmem:[%s4629_s4 + $0x2a0] sm:$0xff]  ;;  %v3859_v31 = vld [vmem:[%s4629_s4 + $0x7c8] sm:$0xff]  ;;  %v2641_v35 = vmax.f32 %v2576_v26, %v3662_v27  ;;  %v2971_v36 = vmax.f32 %v2906_v24, %v3827_v19 }
 0x173   : > { %v3777_v21 = vld [vmem:[%s4629_s4 + $0x538] sm:$0xff]  ;;  %v3891_v32 = vld [vmem:[%s4629_s4 + $0x8c8] sm:$0xff]  ;;  %v2823_v33 = vmax.f32 %v2758_v20, %v3745_v16  ;;  %v2764_v38 = vmax.f32 %v2699_v25, %v3719_v22  ;;  %v3726_v40 = vld [vmem:[%s4629_s4 + $0x3a0] sm:$0xff]  ;;  %v3095_v41 = vmax.f32 %v3030_v30, %v3885_v14 }
 0x174   : > { %3904 = vmatmul.msk.f32.gmra.mxu0 %vm3109_vm1, %v3081_v47  ;;  %v3088_v23 = vmax.f32 %v3023_v12, %v3878_v60  ;;  %v3751_v34 = vld [vmem:[%s4629_s4 + $0x468] sm:$0xff]  ;;  %v3809_v37 = vld [vmem:[%s4629_s4 + $0x638] sm:$0xff]  ;;  %v2706_v43 = vmax.f32 %v2641_v35, %v3694_v28  ;;  %v2582_v44 = vld [vmem:[%s4629_s4 + $0xd0] sm:$0xff]  ;;  %v3036_v47 = vmax.f32 %v2971_v36, %v3859_v31 }
 0x175   : > { %v3783_v39 = vld [vmem:[%s4629_s4 + $0x568] sm:$0xff]  ;;  %v2888_v42 = vmax.f32 %v2823_v33, %v3777_v21  ;;  %v3668_v45 = vld [vmem:[%s4629_s4 + $0x1d0] sm:$0xff]  ;;  %v3841_v48 = vld [vmem:[%s4629_s4 + $0x738] sm:$0xff]  ;;  %v2829_v50 = vmax.f32 %v2764_v38, %v3751_v34 }
 0x176   : > { %3911 = vmatmul.msk.f32.gmra.mxu1 %vm3109_vm1, %v3088_v23  ;;  %v3700_v46 = vld [vmem:[%s4629_s4 + $0x2d0] sm:$0xff]  ;;  %v3873_v49 = vld [vmem:[%s4629_s4 + $0x838] sm:$0xff]  ;;  %v3758_v51 = vld [vmem:[%s4629_s4 + $0x4a0] sm:$0xff]  ;;  %v2647_v52 = vmax.f32 %v2582_v44, %v3668_v45  ;;  %3918 = vmatmul.msk.f32.gmra.mxu2 %vm3109_vm1, %v3095_v41  ;;  %v2771_v55 = vmax.f32 %v2706_v43, %v3726_v40  ;;  %v3101_v58 = vmax.f32 %v3036_v47, %v3891_v32 }
 0x177   : > { %v2953_v53 = vmax.f32 %v2888_v42, %v3809_v37  ;;  %v3815_v54 = vld [vmem:[%s4629_s4 + $0x668] sm:$0xff]  ;;  %v3790_v56 = vld [vmem:[%s4629_s4 + $0x5a0] sm:$0xff]  ;;  %v3732_v57 = vld [vmem:[%s4629_s4 + $0x3d0] sm:$0xff]  ;;  %v2894_v59 = vmax.f32 %v2829_v50, %v3783_v39 }
 0x178   : > { %v2712_v60 = vmax.f32 %v2647_v52, %v3700_v46  ;;  %v2570_v61 = vld [vmem:[%s4629_s4 + $0x70] sm:$0xff]  ;;  %v3847_v1 = vld [vmem:[%s4629_s4 + $0x768] sm:$0xff]  ;;  %v2836_v3 = vmax.f32 %v2771_v55, %v3758_v51  ;;  %3924 = vmatmul.msk.f32.gmra.mxu3 %vm3109_vm1, %v3101_v58  ;;  %v3822_v7 = vld [vmem:[%s4629_s4 + $0x6a0] sm:$0xff] }
 0x179   : > { %v3656_v62 = vld [vmem:[%s4629_s4 + $0x170] sm:$0xff]  ;;  %v3018_v0 = vmax.f32 %v2953_v53, %v3841_v48  ;;  %v3879_v2 = vld [vmem:[%s4629_s4 + $0x868] sm:$0xff]  ;;  %v2959_v6 = vmax.f32 %v2894_v59, %v3815_v54  ;;  %v3854_v18 = vld [vmem:[%s4629_s4 + $0x7a0] sm:$0xff] }
 0x17a   : > { %v3688_v63 = vld [vmem:[%s4629_s4 + $0x270] sm:$0xff]  ;;  %v2635_v5 = vmax.f32 %v2570_v61, %v3656_v62  ;;  %v2777_v8 = vmax.f32 %v2712_v60, %v3732_v57  ;;  %v2901_v12 = vmax.f32 %v2836_v3, %v3790_v56  ;;  %v2577_v14 = vld [vmem:[%s4629_s4 + $0xa8] sm:$0xff]  ;;  %v3886_v19 = vld [vmem:[%s4629_s4 + $0x8a0] sm:$0xff] }
 0x17b   : > { %v3764_v4 = vld [vmem:[%s4629_s4 + $0x4d0] sm:$0xff]  ;;  %v3083_v11 = vmax.f32 %v3018_v0, %v3873_v49  ;;  %v3663_v15 = vld [vmem:[%s4629_s4 + $0x1a8] sm:$0xff]  ;;  %v3024_v17 = vmax.f32 %v2959_v6, %v3847_v1  ;;  %v2583_v31 = vld [vmem:[%s4629_s4 + $0xd8] sm:$0xff] }
 0x17c   : > { %3905 = vmatmul.msk.f32.gmra.mxu0 %vm3109_vm1, %v3082_v29  ;;  %v3796_v9 = vld [vmem:[%s4629_s4 + $0x5d0] sm:$0xff]  ;;  %v2700_v13 = vmax.f32 %v2635_v5, %v3688_v63  ;;  %v3695_v16 = vld [vmem:[%s4629_s4 + $0x2a8] sm:$0xff]  ;;  %v2842_v20 = vmax.f32 %v2777_v8, %v3764_v4  ;;  %v2642_v22 = vmax.f32 %v2577_v14, %v3663_v15  ;;  %v2966_v23 = vmax.f32 %v2901_v12, %v3822_v7  ;;  %v3669_v32 = vld [vmem:[%s4629_s4 + $0x1d8] sm:$0xff] }
 0x17d   : > { %v3720_v10 = vld [vmem:[%s4629_s4 + $0x370] sm:$0xff]  ;;  %v3727_v27 = vld [vmem:[%s4629_s4 + $0x3a8] sm:$0xff]  ;;  %v3089_v28 = vmax.f32 %v3024_v17, %v3879_v2  ;;  %v3701_v33 = vld [vmem:[%s4629_s4 + $0x2d8] sm:$0xff]  ;;  %v2648_v39 = vmax.f32 %v2583_v31, %v3669_v32 }
 0x17e   : > { %v3752_v21 = vld [vmem:[%s4629_s4 + $0x470] sm:$0xff]  ;;  %v2765_v25 = vmax.f32 %v2700_v13, %v3720_v10  ;;  %v2907_v29 = vmax.f32 %v2842_v20, %v3796_v9  ;;  %v2707_v30 = vmax.f32 %v2642_v22, %v3695_v16  ;;  %v3031_v34 = vmax.f32 %v2966_v23, %v3854_v18  ;;  %v3759_v38 = vld [vmem:[%s4629_s4 + $0x4a8] sm:$0xff]  ;;  %v3733_v44 = vld [vmem:[%s4629_s4 + $0x3d8] sm:$0xff] }
 0x17f   : > { %v3828_v24 = vld [vmem:[%s4629_s4 + $0x6d0] sm:$0xff]  ;;  %3912 = vmatmul.msk.f32.gmra.mxu1 %vm3109_vm1, %v3089_v28  ;;  %v3791_v43 = vld [vmem:[%s4629_s4 + $0x5a8] sm:$0xff]  ;;  %v2713_v47 = vmax.f32 %v2648_v39, %v3701_v33  ;;  %v2571_v48 = vld [vmem:[%s4629_s4 + $0x78] sm:$0xff] }
 0x180   : > { %v3784_v26 = vld [vmem:[%s4629_s4 + $0x570] sm:$0xff]  ;;  %v2830_v37 = vmax.f32 %v2765_v25, %v3752_v21  ;;  %v2972_v40 = vmax.f32 %v2907_v29, %v3828_v24  ;;  %v2772_v42 = vmax.f32 %v2707_v30, %v3727_v27  ;;  %v3096_v45 = vmax.f32 %v3031_v34, %v3886_v19  ;;  %v3657_v49 = vld [vmem:[%s4629_s4 + $0x178] sm:$0xff]  ;;  %v3823_v58 = vld [vmem:[%s4629_s4 + $0x6a8] sm:$0xff] }
 0x181   : > { %v3860_v35 = vld [vmem:[%s4629_s4 + $0x7d0] sm:$0xff]  ;;  %v3689_v50 = vld [vmem:[%s4629_s4 + $0x278] sm:$0xff]  ;;  %v2636_v56 = vmax.f32 %v2571_v48, %v3657_v49  ;;  %v2778_v59 = vmax.f32 %v2713_v47, %v3733_v44  ;;  %v3855_v5 = vld [vmem:[%s4629_s4 + $0x7a8] sm:$0xff] }
 0x182   : > { %v3892_v36 = vld [vmem:[%s4629_s4 + $0x8d0] sm:$0xff]  ;;  %v2895_v46 = vmax.f32 %v2830_v37, %v3784_v26  ;;  %v3037_v51 = vmax.f32 %v2972_v40, %v3860_v35  ;;  %v2837_v54 = vmax.f32 %v2772_v42, %v3759_v38  ;;  %v3765_v55 = vld [vmem:[%s4629_s4 + $0x4d8] sm:$0xff]  ;;  %3919 = vmatmul.msk.f32.gmra.mxu2 %vm3109_vm1, %v3096_v45  ;;  %v3887_v6 = vld [vmem:[%s4629_s4 + $0x8a8] sm:$0xff] }
 0x183   : > { %v3816_v41 = vld [vmem:[%s4629_s4 + $0x670] sm:$0xff]  ;;  %v3797_v60 = vld [vmem:[%s4629_s4 + $0x5d8] sm:$0xff]  ;;  %v2701_v0 = vmax.f32 %v2636_v56, %v3689_v50  ;;  %v2843_v7 = vmax.f32 %v2778_v59, %v3765_v55  ;;  %v2584_v18 = vld [vmem:[%s4629_s4 + $0xe0] sm:$0xff] }
 0x184   : > { %3906 = vmatmul.msk.f32.gmra.mxu0 %vm3109_vm1, %v3083_v11  ;;  %v3848_v52 = vld [vmem:[%s4629_s4 + $0x770] sm:$0xff]  ;;  %v2960_v57 = vmax.f32 %v2895_v46, %v3816_v41  ;;  %v3721_v61 = vld [vmem:[%s4629_s4 + $0x378] sm:$0xff]  ;;  %v3102_v62 = vmax.f32 %v3037_v51, %v3892_v36  ;;  %v2902_v63 = vmax.f32 %v2837_v54, %v3791_v43  ;;  %v3670_v19 = vld [vmem:[%s4629_s4 + $0x1e0] sm:$0xff] }
 0x185   : > { %v3880_v53 = vld [vmem:[%s4629_s4 + $0x870] sm:$0xff]  ;;  %v3753_v8 = vld [vmem:[%s4629_s4 + $0x478] sm:$0xff]  ;;  %v2766_v12 = vmax.f32 %v2701_v0, %v3721_v61  ;;  %v2908_v16 = vmax.f32 %v2843_v7, %v3797_v60  ;;  %v3702_v20 = vld [vmem:[%s4629_s4 + $0x2e0] sm:$0xff]  ;;  %v2649_v26 = vmax.f32 %v2584_v18, %v3670_v19 }
 0x186   : > { %v2578_v1 = vld [vmem:[%s4629_s4 + $0xb0] sm:$0xff]  ;;  %v3025_v4 = vmax.f32 %v2960_v57, %v3848_v52  ;;  %3925 = vmatmul.msk.f32.gmra.mxu3 %vm3109_vm1, %v3102_v62  ;;  %v2967_v10 = vmax.f32 %v2902_v63, %v3823_v58  ;;  %v3829_v11 = vld [vmem:[%s4629_s4 + $0x6d8] sm:$0xff]  ;;  %v3734_v31 = vld [vmem:[%s4629_s4 + $0x3e0] sm:$0xff] }
 0x187   : > { %v3664_v2 = vld [vmem:[%s4629_s4 + $0x1b0] sm:$0xff]  ;;  %v3785_v13 = vld [vmem:[%s4629_s4 + $0x578] sm:$0xff]  ;;  %v2831_v24 = vmax.f32 %v2766_v12, %v3753_v8  ;;  %v2973_v27 = vmax.f32 %v2908_v16, %v3829_v11  ;;  %v2714_v34 = vmax.f32 %v2649_v26, %v3702_v20  ;;  %v3766_v42 = vld [vmem:[%s4629_s4 + $0x4e0] sm:$0xff] }
 0x188   : > { %v3696_v3 = vld [vmem:[%s4629_s4 + $0x2b0] sm:$0xff]  ;;  %v2643_v9 = vmax.f32 %v2578_v1, %v3664_v2  ;;  %v3090_v15 = vmax.f32 %v3025_v4, %v3880_v53  ;;  %v3032_v21 = vmax.f32 %v2967_v10, %v3855_v5  ;;  %v3861_v22 = vld [vmem:[%s4629_s4 + $0x7d8] sm:$0xff]  ;;  %v3798_v47 = vld [vmem:[%s4629_s4 + $0x5e0] sm:$0xff] }
 0x189   : > { %v3728_v14 = vld [vmem:[%s4629_s4 + $0x3b0] sm:$0xff]  ;;  %v3893_v23 = vld [vmem:[%s4629_s4 + $0x8d8] sm:$0xff]  ;;  %v2896_v33 = vmax.f32 %v2831_v24, %v3785_v13  ;;  %v3038_v38 = vmax.f32 %v2973_v27, %v3861_v22  ;;  %v2779_v46 = vmax.f32 %v2714_v34, %v3734_v31  ;;  %v2585_v52 = vld [vmem:[%s4629_s4 + $0xe8] sm:$0xff] }
 0x18a   : > { %v2708_v17 = vmax.f32 %v2643_v9, %v3696_v3  ;;  %v3760_v25 = vld [vmem:[%s4629_s4 + $0x4b0] sm:$0xff]  ;;  %3913 = vmatmul.msk.f32.gmra.mxu1 %vm3109_vm1, %v3090_v15  ;;  %v3817_v28 = vld [vmem:[%s4629_s4 + $0x678] sm:$0xff]  ;;  %v3097_v32 = vmax.f32 %v3032_v21, %v3887_v6  ;;  %v3671_v53 = vld [vmem:[%s4629_s4 + $0x1e8] sm:$0xff] }
 0x18b   : > { %v3792_v30 = vld [vmem:[%s4629_s4 + $0x5b0] sm:$0xff]  ;;  %v2579_v35 = vld [vmem:[%s4629_s4 + $0xb8] sm:$0xff]  ;;  %v2961_v44 = vmax.f32 %v2896_v33, %v3817_v28  ;;  %v3103_v49 = vmax.f32 %v3038_v38, %v3893_v23  ;;  %v3703_v54 = vld [vmem:[%s4629_s4 + $0x2e8] sm:$0xff]  ;;  %v2844_v58 = vmax.f32 %v2779_v46, %v3766_v42  ;;  %v2650_v60 = vmax.f32 %v2585_v52, %v3671_v53 }
 0x18c   : > { %v2773_v29 = vmax.f32 %v2708_v17, %v3728_v14  ;;  %v3665_v36 = vld [vmem:[%s4629_s4 + $0x1b8] sm:$0xff]  ;;  %3920 = vmatmul.msk.f32.gmra.mxu2 %vm3109_vm1, %v3097_v32  ;;  %v3824_v45 = vld [vmem:[%s4629_s4 + $0x6b0] sm:$0xff]  ;;  %v3830_v62 = vld [vmem:[%s4629_s4 + $0x6e0] sm:$0xff] }
 0x18d   : > { %v3697_v37 = vld [vmem:[%s4629_s4 + $0x2b8] sm:$0xff]  ;;  %v2644_v43 = vmax.f32 %v2579_v35, %v3665_v36  ;;  %v3856_v56 = vld [vmem:[%s4629_s4 + $0x7b0] sm:$0xff]  ;;  %v3735_v1 = vld [vmem:[%s4629_s4 + $0x3e8] sm:$0xff]  ;;  %v2909_v3 = vmax.f32 %v2844_v58, %v3798_v47  ;;  %v2715_v4 = vmax.f32 %v2650_v60, %v3703_v54 }
 0x18e   : > { %v3849_v39 = vld [vmem:[%s4629_s4 + $0x778] sm:$0xff]  ;;  %v2838_v41 = vmax.f32 %v2773_v29, %v3760_v25  ;;  %v3888_v57 = vld [vmem:[%s4629_s4 + $0x8b0] sm:$0xff]  ;;  %3926 = vmatmul.msk.f32.gmra.mxu3 %vm3109_vm1, %v3103_v49  ;;  %v3862_v9 = vld [vmem:[%s4629_s4 + $0x7e0] sm:$0xff] }
 0x18f   : > { %v3881_v40 = vld [vmem:[%s4629_s4 + $0x878] sm:$0xff]  ;;  %v2709_v51 = vmax.f32 %v2644_v43, %v3697_v37  ;;  %v3026_v55 = vmax.f32 %v2961_v44, %v3849_v39  ;;  %v2586_v5 = vld [vmem:[%s4629_s4 + $0xf0] sm:$0xff]  ;;  %v3894_v10 = vld [vmem:[%s4629_s4 + $0x8e0] sm:$0xff]  ;;  %v2974_v14 = vmax.f32 %v2909_v3, %v3830_v62  ;;  %v2780_v16 = vmax.f32 %v2715_v4, %v3735_v1 }
 0x190   : > { %v3729_v48 = vld [vmem:[%s4629_s4 + $0x3b8] sm:$0xff]  ;;  %v2903_v50 = vmax.f32 %v2838_v41, %v3792_v30  ;;  %v3672_v6 = vld [vmem:[%s4629_s4 + $0x1f0] sm:$0xff]  ;;  %v3767_v12 = vld [vmem:[%s4629_s4 + $0x4e8] sm:$0xff] }
 0x191   : > { %v3761_v59 = vld [vmem:[%s4629_s4 + $0x4b8] sm:$0xff]  ;;  %v2774_v63 = vmax.f32 %v2709_v51, %v3729_v48  ;;  %v3091_v2 = vmax.f32 %v3026_v55, %v3881_v40  ;;  %v3704_v7 = vld [vmem:[%s4629_s4 + $0x2f0] sm:$0xff]  ;;  %v2651_v13 = vmax.f32 %v2586_v5, %v3672_v6  ;;  %v3799_v17 = vld [vmem:[%s4629_s4 + $0x5e8] sm:$0xff]  ;;  %v3039_v25 = vmax.f32 %v2974_v14, %v3862_v9 }
 0x192   : > { %v2968_v61 = vmax.f32 %v2903_v50, %v3824_v45  ;;  %v3793_v0 = vld [vmem:[%s4629_s4 + $0x5b8] sm:$0xff]  ;;  %v3736_v18 = vld [vmem:[%s4629_s4 + $0x3f0] sm:$0xff]  ;;  %v2845_v27 = vmax.f32 %v2780_v16, %v3767_v12  ;;  %v3831_v31 = vld [vmem:[%s4629_s4 + $0x6e8] sm:$0xff] }
 0x193   : > { %v2839_v11 = vmax.f32 %v2774_v63, %v3761_v59  ;;  %3914 = vmatmul.msk.f32.gmra.mxu1 %vm3109_vm1, %v3091_v2  ;;  %v3825_v15 = vld [vmem:[%s4629_s4 + $0x6b8] sm:$0xff]  ;;  %v2716_v21 = vmax.f32 %v2651_v13, %v3704_v7  ;;  %v3768_v28 = vld [vmem:[%s4629_s4 + $0x4f0] sm:$0xff]  ;;  %v3104_v34 = vmax.f32 %v3039_v25, %v3894_v10  ;;  %v3863_v40 = vld [vmem:[%s4629_s4 + $0x7e8] sm:$0xff] }
 0x194   : > { %v3033_v8 = vmax.f32 %v2968_v61, %v3856_v56  ;;  %v2587_v22 = vld [vmem:[%s4629_s4 + $0xf8] sm:$0xff]  ;;  %v2910_v36 = vmax.f32 %v2845_v27, %v3799_v17  ;;  %v3800_v37 = vld [vmem:[%s4629_s4 + $0x5f0] sm:$0xff]  ;;  %v3895_v45 = vld [vmem:[%s4629_s4 + $0x8e8] sm:$0xff] }
 0x195   : > { %v2904_v20 = vmax.f32 %v2839_v11, %v3793_v0  ;;  %v3673_v23 = vld [vmem:[%s4629_s4 + $0x1f8] sm:$0xff]  ;;  %v2781_v32 = vmax.f32 %v2716_v21, %v3736_v18  ;;  %v3832_v47 = vld [vmem:[%s4629_s4 + $0x6f0] sm:$0xff] }
 0x196   : > { %v3098_v19 = vmax.f32 %v3033_v8, %v3888_v57  ;;  %v3705_v24 = vld [vmem:[%s4629_s4 + $0x2f8] sm:$0xff]  ;;  %v2652_v29 = vmax.f32 %v2587_v22, %v3673_v23  ;;  %3927 = vmatmul.msk.f32.gmra.mxu3 %vm3109_vm1, %v3104_v34  ;;  %v2975_v42 = vmax.f32 %v2910_v36, %v3831_v31  ;;  %v3864_v53 = vld [vmem:[%s4629_s4 + $0x7f0] sm:$0xff] }
 0x197   : > { %v3857_v26 = vld [vmem:[%s4629_s4 + $0x7b8] sm:$0xff]  ;;  %v2969_v30 = vmax.f32 %v2904_v20, %v3825_v15  ;;  %v2846_v41 = vmax.f32 %v2781_v32, %v3768_v28  ;;  %v3896_v57 = vld [vmem:[%s4629_s4 + $0x8f0] sm:$0xff] }
 0x198   : > { %3921 = vmatmul.msk.f32.gmra.mxu2 %vm3109_vm1, %v3098_v19  ;;  %v3737_v33 = vld [vmem:[%s4629_s4 + $0x3f8] sm:$0xff]  ;;  %v2717_v38 = vmax.f32 %v2652_v29, %v3705_v24  ;;  %v3040_v49 = vmax.f32 %v2975_v42, %v3863_v40 }
 0x199   : > { %v3889_v35 = vld [vmem:[%s4629_s4 + $0x8b8] sm:$0xff]  ;;  %v3034_v39 = vmax.f32 %v2969_v30, %v3857_v26  ;;  %v2911_v46 = vmax.f32 %v2846_v41, %v3800_v37 }
 0x19a   : > { %v2782_v43 = vmax.f32 %v2717_v38, %v3737_v33  ;;  %v3769_v48 = vld [vmem:[%s4629_s4 + $0x4f8] sm:$0xff]  ;;  %v3105_v50 = vmax.f32 %v3040_v49, %v3895_v45 }
 0x19b   : > { %v3099_v44 = vmax.f32 %v3034_v39, %v3889_v35  ;;  %v2976_v51 = vmax.f32 %v2911_v46, %v3832_v47  ;;  %v3801_v54 = vld [vmem:[%s4629_s4 + $0x5f8] sm:$0xff] }
 0x19c   : > { %v2847_v52 = vmax.f32 %v2782_v43, %v3769_v48  ;;  %v3833_v58 = vld [vmem:[%s4629_s4 + $0x6f8] sm:$0xff] }
 0x19d   : > { %v3041_v55 = vmax.f32 %v2976_v51, %v3864_v53  ;;  %v3865_v61 = vld [vmem:[%s4629_s4 + $0x7f8] sm:$0xff] }
 0x19e   : > { %3928 = vmatmul.msk.f32.gmra.mxu3 %vm3109_vm1, %v3105_v50  ;;  %v2912_v56 = vmax.f32 %v2847_v52, %v3801_v54  ;;  %v3897_v63 = vld [vmem:[%s4629_s4 + $0x8f8] sm:$0xff] }
 0x19f   : > { %v3106_v59 = vmax.f32 %v3041_v55, %v3896_v57 }
 0x1a0   : > { %3922 = vmatmul.msk.f32.gmra.mxu2 %vm3109_vm1, %v3099_v44  ;;  %v2977_v60 = vmax.f32 %v2912_v56, %v3833_v58 }
 0x1a2   : > { %v3042_v62 = vmax.f32 %v2977_v60, %v3865_v61 }
 0x1a4   : > { %v3107_v0 = vmax.f32 %v3042_v62, %v3897_v63 }
 0x1a6   : > { %3929 = vmatmul.msk.f32.gmra.mxu3 %vm3109_vm1, %v3106_v59 }
 0x1ae   : > { %3930 = vmatmul.msk.f32.gmra.mxu3 %vm3109_vm1, %v3107_v0 }
 0x1c9   : > { %v3227_v1 = vpop.f32.mrf.mxu0 }
 0x1ca   : > { %3324 = vst.msk [vmem:[%s4955_s9] sm:$0xff] %vm3323_vm2, %v3227_v1  ;;  %v3425_v15 = vmul.f32 %v3227_v1, %v3227_v1  ;;  %v3356_v18 = vsel %vm3323_vm2, %v3227_v1, 0.0 }
 0x1cc   : > { %v3457_v25 = vsel %vm3323_vm2, %v3425_v15, 0.0 }
 0x1d0   : > { %v4961_v3 = vpop.f32.mrf.mxu1 }
 0x1d1   : > { %v3230_v2 = vpop.f32.mrf.mxu0  ;;  %3332 = vst.msk [vmem:[%s4955_s9 + $0x40] sm:$0xff] %vm3323_vm2, %v4961_v3  ;;  %v3433_v51 = vmul.f32 %v4961_v3, %v4961_v3  ;;  %v3371_v58 = vsel %vm3323_vm2, %v4961_v3, 0.0 }
 0x1d2   : > { %3325 = vst.msk [vmem:[%s4955_s9 + $0x8] sm:$0xff] %vm3323_vm2, %v3230_v2  ;;  %v3426_v13 = vmul.f32 %v3230_v2, %v3230_v2  ;;  %v3357_v16 = vsel %vm3323_vm2, %v3230_v2, 0.0 }
 0x1d3   : > { %v3358_v24 = vadd.f32 %v3357_v16, %v3356_v18  ;;  %v3472_v63 = vsel %vm3323_vm2, %v3433_v51, 0.0 }
 0x1d4   : > { %v3458_v19 = vsel %vm3323_vm2, %v3426_v13, 0.0 }
 0x1d5   : > { %v3459_v29 = vadd.f32 %v3458_v19, %v3457_v25 }
 0x1d8   : > { %v4968_v5 = vpop.f32.mrf.mxu1 }
 0x1d9   : > { %v3233_v4 = vpop.f32.mrf.mxu0  ;;  %3333 = vst.msk [vmem:[%s4955_s9 + $0x48] sm:$0xff] %vm3323_vm2, %v4968_v5  ;;  %v3434_v59 = vmul.f32 %v4968_v5, %v4968_v5  ;;  %v3373_v0 = vsel %vm3323_vm2, %v4968_v5, 0.0 }
 0x1da   : > { %3326 = vst.msk [vmem:[%s4955_s9 + $0x10] sm:$0xff] %vm3323_vm2, %v3233_v4  ;;  %v3427_v17 = vmul.f32 %v3233_v4, %v3233_v4  ;;  %v3359_v20 = vsel %vm3323_vm2, %v3233_v4, 0.0 }
 0x1db   : > { %v3360_v30 = vadd.f32 %v3359_v20, %v3358_v24  ;;  %v3474_v4 = vsel %vm3323_vm2, %v3434_v59, 0.0 }
 0x1dc   : > { %v3460_v26 = vsel %vm3323_vm2, %v3427_v17, 0.0 }
 0x1dd   : > { %v3461_v35 = vadd.f32 %v3460_v26, %v3459_v29 }
 0x1e0   : > { %v4977_v8 = vpop.f32.mrf.mxu1 }
 0x1e1   : > { %v3236_v6 = vpop.f32.mrf.mxu0  ;;  %v4973_v7 = vpop.f32.mrf.mxu2  ;;  %3334 = vst.msk [vmem:[%s4955_s9 + $0x50] sm:$0xff] %vm3323_vm2, %v4977_v8  ;;  %v3435_v1 = vmul.f32 %v4977_v8, %v4977_v8 }
 0x1e2   : > { %3327 = vst.msk [vmem:[%s4955_s9 + $0x18] sm:$0xff] %vm3323_vm2, %v3236_v6  ;;  %v3428_v21 = vmul.f32 %v3236_v6, %v3236_v6  ;;  %v3361_v27 = vsel %vm3323_vm2, %v3236_v6, 0.0  ;;  %v3375_v6 = vsel %vm3323_vm2, %v4977_v8, 0.0 }
 0x1e3   : > { %3340 = vst.msk [vmem:[%s4955_s9 + $0x80] sm:$0xff] %vm3323_vm2, %v4973_v7  ;;  %v3362_v36 = vadd.f32 %v3361_v27, %v3360_v30  ;;  %v3476_v15 = vsel %vm3323_vm2, %v3435_v1, 0.0 }
 0x1e4   : > { %v3462_v32 = vsel %vm3323_vm2, %v3428_v21, 0.0 }
 0x1e5   : > { %v3463_v40 = vadd.f32 %v3462_v32, %v3461_v35 }
 0x1e8   : > { %v4987_v10 = vpop.f32.mrf.mxu1 }
 0x1e9   : > { %v3239_v9 = vpop.f32.mrf.mxu0  ;;  %v4989_v11 = vpop.f32.mrf.mxu2  ;;  %3335 = vst.msk [vmem:[%s4955_s9 + $0x58] sm:$0xff] %vm3323_vm2, %v4987_v10  ;;  %v3377_v5 = vsel %vm3323_vm2, %v4987_v10, 0.0 }
 0x1ea   : > { %3328 = vst.msk [vmem:[%s4955_s9 + $0x20] sm:$0xff] %vm3323_vm2, %v3239_v9  ;;  %v3429_v28 = vmul.f32 %v3239_v9, %v3239_v9  ;;  %v3363_v33 = vsel %vm3323_vm2, %v3239_v9, 0.0  ;;  %v3436_v9 = vmul.f32 %v4987_v10, %v4987_v10  ;;  %v3389_v51 = vsel %vm3323_vm2, %v4989_v11, 0.0 }
 0x1eb   : > { %3341 = vst.msk [vmem:[%s4955_s9 + $0x88] sm:$0xff] %vm3323_vm2, %v4989_v11  ;;  %v3364_v41 = vadd.f32 %v3363_v33, %v3362_v36 }
 0x1ec   : > { %v3464_v37 = vsel %vm3323_vm2, %v3429_v28, 0.0  ;;  %v3478_v8 = vsel %vm3323_vm2, %v3436_v9, 0.0 }
 0x1ed   : > { %v3465_v44 = vadd.f32 %v3464_v37, %v3463_v40 }
 0x1f1   : > { %v3242_v12 = vpop.f32.mrf.mxu0  ;;  %v4999_v14 = vpop.f32.mrf.mxu2 }
 0x1f2   : > { %3329 = vst.msk [vmem:[%s4955_s9 + $0x28] sm:$0xff] %vm3323_vm2, %v3242_v12  ;;  %v5010_v23 = vpop.f32.mrf.mxu3  ;;  %v3430_v34 = vmul.f32 %v3242_v12, %v3242_v12  ;;  %v3365_v38 = vsel %vm3323_vm2, %v3242_v12, 0.0 }
 0x1f3   : > { %3342 = vst.msk [vmem:[%s4955_s9 + $0x90] sm:$0xff] %vm3323_vm2, %v4999_v14  ;;  %v5008_v22 = vpop.f32.mrf.mxu1  ;;  %v3366_v45 = vadd.f32 %v3365_v38, %v3364_v41 }
 0x1f4   : > { %3336 = vst.msk [vmem:[%s4955_s9 + $0x60] sm:$0xff] %vm3323_vm2, %v5008_v22  ;;  %v3466_v42 = vsel %vm3323_vm2, %v3430_v34, 0.0  ;;  %v3437_v16 = vmul.f32 %v5008_v22, %v5008_v22  ;;  %v3379_v21 = vsel %vm3323_vm2, %v5008_v22, 0.0 }
 0x1f5   : > { %3348 = vst.msk [vmem:[%s4955_s9 + $0xc0] sm:$0xff] %vm3323_vm2, %v5010_v23  ;;  %v3467_v48 = vadd.f32 %v3466_v42, %v3465_v44  ;;  %v3442_v44 = vmul.f32 %v4989_v11, %v4989_v11 }
 0x1f6   : > { %v3480_v10 = vsel %vm3323_vm2, %v3437_v16, 0.0 }
 0x1f9   : > { %v3245_v31 = vpop.f32.mrf.mxu0  ;;  %v5029_v46 = vpop.f32.mrf.mxu2 }
 0x1fa   : > { %3330 = vst.msk [vmem:[%s4955_s9 + $0x30] sm:$0xff] %vm3323_vm2, %v3245_v31  ;;  %v3431_v39 = vmul.f32 %v3245_v31, %v3245_v31  ;;  %v3367_v43 = vsel %vm3323_vm2, %v3245_v31, 0.0  ;;  %v3393_v11 = vsel %vm3323_vm2, %v5029_v46, 0.0 }
 0x1fb   : > { %3343 = vst.msk [vmem:[%s4955_s9 + $0x98] sm:$0xff] %vm3323_vm2, %v5029_v46  ;;  %v3368_v49 = vadd.f32 %v3367_v43, %v3366_v45  ;;  %v5040_v55 = vpop.f32.mrf.mxu3  ;;  %v3387_v43 = vsel %vm3323_vm2, %v4973_v7, 0.0 }
 0x1fc   : > { %v3468_v47 = vsel %vm3323_vm2, %v3431_v39, 0.0  ;;  %v3266_v54 = vpop.f32.mrf.mxu1  ;;  %3349 = vst.msk [vmem:[%s4955_s9 + $0xc8] sm:$0xff] %vm3323_vm2, %v5040_v55  ;;  %v3441_v39 = vmul.f32 %v4973_v7, %v4973_v7  ;;  %v3443_v7 = vmul.f32 %v4999_v14, %v4999_v14 }
 0x1fd   : > { %v3469_v56 = vadd.f32 %v3468_v47, %v3467_v48  ;;  %3337 = vst.msk [vmem:[%s4955_s9 + $0x68] sm:$0xff] %vm3323_vm2, %v3266_v54  ;;  %v3438_v24 = vmul.f32 %v3266_v54, %v3266_v54  ;;  %v3381_v27 = vsel %vm3323_vm2, %v3266_v54, 0.0  ;;  %v3490_v54 = vsel %vm3323_vm2, %v3442_v44, 0.0 }
 0x1ff   : > { %v3482_v22 = vsel %vm3323_vm2, %v3438_v24, 0.0 }
 0x201   : > { %v3248_v50 = vpop.f32.mrf.mxu0 }
 0x202   : > { %3331 = vst.msk [vmem:[%s4955_s9 + $0x38] sm:$0xff] %vm3323_vm2, %v3248_v50  ;;  %v3369_v52 = vsel %vm3323_vm2, %v3248_v50, 0.0  ;;  %v3432_v53 = vmul.f32 %v3248_v50, %v3248_v50  ;;  %v3488_v50 = vsel %vm3323_vm2, %v3441_v39, 0.0 }
 0x203   : > { %v3370_v57 = vadd.f32 %v3369_v52, %v3368_v49 }
 0x204   : > { %v3470_v60 = vsel %vm3323_vm2, %v3432_v53, 0.0 }
 0x205   : > { %v3372_v61 = vadd.f32 %v3371_v58, %v3370_v57  ;;  %v3471_v62 = vadd.f32 %v3470_v60, %v3469_v56  ;;  %v3287_v20 = vpop.f32.mrf.mxu2  ;;  %v3391_v56 = vsel %vm3323_vm2, %v4999_v14, 0.0  ;;  %v3444_v57 = vmul.f32 %v5029_v46, %v5029_v46 }
 0x206   : > { %3344 = vst.msk [vmem:[%s4955_s9 + $0xa0] sm:$0xff] %vm3323_vm2, %v3287_v20  ;;  %v3492_v60 = vsel %vm3323_vm2, %v3443_v7, 0.0  ;;  %v3395_v14 = vsel %vm3323_vm2, %v3287_v20, 0.0 }
 0x207   : > { %v3374_v2 = vadd.f32 %v3373_v0, %v3372_v61  ;;  %v3473_v3 = vadd.f32 %v3472_v63, %v3471_v62  ;;  %v3269_v19 = vpop.f32.mrf.mxu1  ;;  %v3445_v61 = vmul.f32 %v3287_v20, %v3287_v20  ;;  %v3494_v1 = vsel %vm3323_vm2, %v3444_v57, 0.0 }
 0x208   : > { %3338 = vst.msk [vmem:[%s4955_s9 + $0x70] sm:$0xff] %vm3323_vm2, %v3269_v19  ;;  %v3439_v31 = vmul.f32 %v3269_v19, %v3269_v19  ;;  %v3383_v33 = vsel %vm3323_vm2, %v3269_v19, 0.0 }
 0x209   : > { %v3376_v12 = vadd.f32 %v3375_v6, %v3374_v2  ;;  %v3475_v13 = vadd.f32 %v3474_v4, %v3473_v3  ;;  %v5076_v28 = vpop.f32.mrf.mxu3  ;;  %v3496_v9 = vsel %vm3323_vm2, %v3445_v61, 0.0 }
 0x20a   : > { %3350 = vst.msk [vmem:[%s4955_s9 + $0xd0] sm:$0xff] %vm3323_vm2, %v5076_v28  ;;  %v3484_v35 = vsel %vm3323_vm2, %v3439_v31, 0.0 }
 0x20b   : > { %v3477_v17 = vadd.f32 %v3476_v15, %v3475_v13  ;;  %v3378_v18 = vadd.f32 %v3377_v5, %v3376_v12 }
 0x20d   : > { %v3380_v25 = vadd.f32 %v3379_v21, %v3378_v18  ;;  %v3479_v26 = vadd.f32 %v3478_v8, %v3477_v17  ;;  %v3449_v8 = vmul.f32 %v5010_v23, %v5010_v23 }
 0x20f   : > { %v3382_v29 = vadd.f32 %v3381_v27, %v3380_v25  ;;  %v3481_v30 = vadd.f32 %v3480_v10, %v3479_v26  ;;  %v3290_v38 = vpop.f32.mrf.mxu2  ;;  %v3403_v10 = vsel %vm3323_vm2, %v5010_v23, 0.0  ;;  %v3450_v27 = vmul.f32 %v5040_v55, %v5040_v55 }
 0x210   : > { %v3272_v37 = vpop.f32.mrf.mxu1  ;;  %3345 = vst.msk [vmem:[%s4955_s9 + $0xa8] sm:$0xff] %vm3323_vm2, %v3290_v38  ;;  %v3446_v2 = vmul.f32 %v3290_v38, %v3290_v38  ;;  %v3397_v12 = vsel %vm3323_vm2, %v3290_v38, 0.0 }
 0x211   : > { %v3483_v32 = vadd.f32 %v3482_v22, %v3481_v30  ;;  %v3384_v34 = vadd.f32 %v3383_v33, %v3382_v29  ;;  %3339 = vst.msk [vmem:[%s4955_s9 + $0x78] sm:$0xff] %vm3323_vm2, %v3272_v37  ;;  %v3385_v40 = vsel %vm3323_vm2, %v3272_v37, 0.0  ;;  %v3440_v41 = vmul.f32 %v3272_v37, %v3272_v37  ;;  %v5096_v47 = vpop.f32.mrf.mxu3 }
 0x212   : > { %3351 = vst.msk [vmem:[%s4955_s9 + $0xd8] sm:$0xff] %vm3323_vm2, %v5096_v47  ;;  %v3498_v5 = vsel %vm3323_vm2, %v3446_v2, 0.0  ;;  %v3405_v33 = vsel %vm3323_vm2, %v5040_v55, 0.0  ;;  %v3407_v37 = vsel %vm3323_vm2, %v5076_v28, 0.0  ;;  %v3452_v38 = vmul.f32 %v5096_v47, %v5096_v47 }
 0x213   : > { %v3485_v36 = vadd.f32 %v3484_v35, %v3483_v32  ;;  %v3386_v42 = vadd.f32 %v3385_v40, %v3384_v34  ;;  %v3486_v45 = vsel %vm3323_vm2, %v3440_v41, 0.0  ;;  %v3504_v32 = vsel %vm3323_vm2, %v3449_v8, 0.0 }
 0x214   : > { %v3451_v34 = vmul.f32 %v5076_v28, %v5076_v28  ;;  %v3409_v55 = vsel %vm3323_vm2, %v5096_v47, 0.0 }
 0x215   : > { %v3388_v48 = vadd.f32 %v3387_v43, %v3386_v42  ;;  %v3487_v49 = vadd.f32 %v3486_v45, %v3485_v36  ;;  %v3506_v36 = vsel %vm3323_vm2, %v3450_v27, 0.0  ;;  %v3510_v45 = vsel %vm3323_vm2, %v3452_v38, 0.0 }
 0x216   : > { %v3508_v41 = vsel %vm3323_vm2, %v3451_v34, 0.0 }
 0x217   : > { %v3390_v52 = vadd.f32 %v3389_v51, %v3388_v48  ;;  %v3489_v53 = vadd.f32 %v3488_v50, %v3487_v49 }
 0x219   : > { %v3392_v58 = vadd.f32 %v3391_v56, %v3390_v52  ;;  %v3491_v59 = vadd.f32 %v3490_v54, %v3489_v53  ;;  %v3311_v6 = vpop.f32.mrf.mxu3 }
 0x21a   : > { %3352 = vst.msk [vmem:[%s4955_s9 + $0xe0] sm:$0xff] %vm3323_vm2, %v3311_v6  ;;  %v3453_v42 = vmul.f32 %v3311_v6, %v3311_v6  ;;  %v3411_v48 = vsel %vm3323_vm2, %v3311_v6, 0.0 }
 0x21b   : > { %v3293_v62 = vpop.f32.mrf.mxu2  ;;  %v3493_v63 = vadd.f32 %v3492_v60, %v3491_v59  ;;  %v3394_v0 = vadd.f32 %v3393_v11, %v3392_v58 }
 0x21c   : > { %3346 = vst.msk [vmem:[%s4955_s9 + $0xb0] sm:$0xff] %vm3323_vm2, %v3293_v62  ;;  %v3447_v46 = vmul.f32 %v3293_v62, %v3293_v62  ;;  %v3399_v16 = vsel %vm3323_vm2, %v3293_v62, 0.0  ;;  %v3512_v7 = vsel %vm3323_vm2, %v3453_v42, 0.0 }
 0x21d   : > { %v3396_v3 = vadd.f32 %v3395_v14, %v3394_v0  ;;  %v3495_v4 = vadd.f32 %v3494_v1, %v3493_v63 }
 0x21e   : > { %v3500_v19 = vsel %vm3323_vm2, %v3447_v46, 0.0 }
 0x21f   : > { %v3398_v13 = vadd.f32 %v3397_v12, %v3396_v3  ;;  %v3497_v15 = vadd.f32 %v3496_v9, %v3495_v4 }
 0x221   : > { %v3499_v17 = vadd.f32 %v3498_v5, %v3497_v15  ;;  %v3400_v18 = vadd.f32 %v3399_v16, %v3398_v13  ;;  %v3314_v30 = vpop.f32.mrf.mxu3 }
 0x222   : > { %3353 = vst.msk [vmem:[%s4955_s9 + $0xe8] sm:$0xff] %vm3323_vm2, %v3314_v30  ;;  %v3454_v49 = vmul.f32 %v3314_v30, %v3314_v30  ;;  %v3413_v52 = vsel %vm3323_vm2, %v3314_v30, 0.0 }
 0x223   : > { %v3296_v20 = vpop.f32.mrf.mxu2  ;;  %v3501_v21 = vadd.f32 %v3500_v19, %v3499_v17 }
 0x224   : > { %3347 = vst.msk [vmem:[%s4955_s9 + $0xb8] sm:$0xff] %vm3323_vm2, %v3296_v20  ;;  %v3401_v24 = vsel %vm3323_vm2, %v3296_v20, 0.0  ;;  %v3448_v25 = vmul.f32 %v3296_v20, %v3296_v20  ;;  %v3514_v56 = vsel %vm3323_vm2, %v3454_v49, 0.0 }
 0x225   : > { %v3402_v26 = vadd.f32 %v3401_v24, %v3400_v18 }
 0x226   : > { %v3502_v29 = vsel %vm3323_vm2, %v3448_v25, 0.0 }
 0x227   : > { %v3404_v31 = vadd.f32 %v3403_v10, %v3402_v26  ;;  %v3503_v22 = vadd.f32 %v3502_v29, %v3501_v21 }
 0x229   : > { %v3406_v35 = vadd.f32 %v3405_v33, %v3404_v31  ;;  %v3505_v23 = vadd.f32 %v3504_v32, %v3503_v22  ;;  %v3317_v50 = vpop.f32.mrf.mxu3 }
 0x22a   : > { %3354 = vst.msk [vmem:[%s4955_s9 + $0xf0] sm:$0xff] %vm3323_vm2, %v3317_v50  ;;  %v3455_v54 = vmul.f32 %v3317_v50, %v3317_v50  ;;  %v3415_v58 = vsel %vm3323_vm2, %v3317_v50, 0.0 }
 0x22b   : > { %v3408_v39 = vadd.f32 %v3407_v37, %v3406_v35  ;;  %v3507_v40 = vadd.f32 %v3506_v36, %v3505_v23 }
 0x22c   : > { %v3516_v60 = vsel %vm3323_vm2, %v3455_v54, 0.0 }
 0x22d   : > { %v3509_v43 = vadd.f32 %v3508_v41, %v3507_v40  ;;  %v3410_v44 = vadd.f32 %v3409_v55, %v3408_v39 }
 0x22f   : > { %v3412_v28 = vadd.f32 %v3411_v48, %v3410_v44  ;;  %v3511_v51 = vadd.f32 %v3510_v45, %v3509_v43 }
 0x231   : > { %v3414_v53 = vadd.f32 %v3413_v52, %v3412_v28  ;;  %v3513_v47 = vadd.f32 %v3512_v7, %v3511_v51  ;;  %v3320_v61 = vpop.f32.mrf.mxu3 }
 0x232   : > { %3355 = vst.msk [vmem:[%s4955_s9 + $0xf8] sm:$0xff] %vm3323_vm2, %v3320_v61  ;;  %v3417_v62 = vsel %vm3323_vm2, %v3320_v61, 0.0  ;;  %v3456_v63 = vmul.f32 %v3320_v61, %v3320_v61 }
 0x233   : > { %v3515_v57 = vadd.f32 %v3514_v56, %v3513_v47  ;;  %v3416_v59 = vadd.f32 %v3415_v58, %v3414_v53 }
 0x234   : > { %v3518_v1 = vsel %vm3323_vm2, %v3456_v63, 0.0 }
 0x235   : > { %v3517_v11 = vadd.f32 %v3516_v60, %v3515_v57  ;;  %v3418_v0 = vadd.f32 %v3417_v62, %v3416_v59 }
 0x237   : > { %v3419_v14 = vrot.slane %v3418_v0, 4  ;;  %v3519_v2 = vadd.f32 %v3518_v1, %v3517_v11 }
 0x239   : > { %v3420_v3 = vadd.f32 %v3419_v14, %v3418_v0  ;;  %v3520_v4 = vrot.slane %v3519_v2, 4 }
 0x23b   : > { %v3421_v6 = vrot.slane %v3420_v3, 2  ;;  %v3521_v9 = vadd.f32 %v3520_v4, %v3519_v2 }
 0x23d   : > { %v3422_v12 = vadd.f32 %v3421_v6, %v3420_v3  ;;  %v3522_v46 = vrot.slane %v3521_v9, 2 }
 0x23f   : > { %v3423_v13 = vrot.slane %v3422_v12, 1  ;;  %v3523_v15 = vadd.f32 %v3522_v46, %v3521_v9 }
 0x241   : > { %v3524_v5 = vrot.slane %v3523_v15, 1  ;;  %v3424_v16 = vadd.f32 %v3423_v13, %v3422_v12 }
 0x243   : > { %v3525_v17 = vadd.f32 %v3524_v5, %v3523_v15 }
 0x245   : > { %v3527_v18 = vsel %vm3526_vm3, %v3424_v16, %v3525_v17 }
 0x246   : > { %3529 = vst.msk [vmem:[%s2555_s14] sm:$0x3] %vm3528_vm4, %v3527_v18 }
 0x247 PF: > { %p11_p10 = scmp.ge.s32.totalorder %s4026_s16, 4   ;;  %s5182_s12 = smov %s3981_s13 }
 0x248   : > { %s5183_s13 = smov %s4035_s19  ;;  %s5184_s14 = smov %s4026_s16 }
 0x249   :  { %13 = sbr.rel (!%p11_p10) target bundleno = 2 (0x2), region = 141 }

// kernel: _lambda_.11
= control target key start
LH: loop header
LB: loop body
LE: loop exit
PB: predicated region body
PF: predicated region fallthrough
CT: control target
= control target key end

     0   :  { %11 = vsyncpa [#allocation3], 0  ;;  %s2113_s0 = inlined_call_operand.vmem [shape: f32[512,8], index: 0, kind: input, shape index: {}]   ;;  %s2114_s1 = inlined_call_operand.vmem [shape: f32[512,8], index: 1, kind: input, shape index: {}]   ;;  %s2115_s2 = inlined_call_operand.vmem [shape: f32[512,8], index: 2, kind: input, shape index: {}]   ;;  %s2116_s3 = inlined_call_operand.vmem [shape: f32[512,8], index: 3, kind: input, shape index: {}]   ;;  %s2117_s4 = inlined_call_operand.vmem [shape: f32[1,32], index: 4, kind: input, shape index: {}]   ;;  %s2118_s5 = inlined_call_operand.vmem [shape: f32[1,32], index: 5, kind: input, shape index: {}]   ;;  %s2119_s6 = inlined_call_operand.hbm [shape: f32[512,32], index: 6, kind: output, shape index: {}]  }
   0x1   :  { %13 = vsyncpa [#allocation3 + $0x1], 0  ;;  %s1348_s21 = smov 0   ;;  %s1350_s22 = smov 0  }
   0x2   :  { %s1352_s23 = smov 0   ;;  %s1354_s24 = smov 0  }
   0x3 LB: > { %s1369_s25 = sadd.s32 4294967295, %s1307_s24   ;;  %s1181_s26 = sadd.s32 4294967294, %s1307_s24   ;;  %s1307_s24 = sphi %s1354_s24, %s2125_s24   ;;  %s1303_s23 = sphi %s1352_s23, %s2124_s23   ;;  %s1299_s22 = sphi %s1350_s22, %s2123_s22   ;;  %s1295_s21 = sphi %s1348_s21, %s2122_s21  }
   0x4   : > { %s1373_s27 = sadd.s32 1, %s1307_s24   ;;  %s172_s28 = sadd.s32 1, %s1303_s23 }
   0x5   : > { %s169_s29 = ssub.s32 %s1307_s24, %s1373_s27  ;;  %p182_p0 = scmp.ne.s32.totalorder %s1303_s23, %s1299_s22 }
   0x6   : > { %p170_p1 = scmp.eq.s32.totalorder %s169_s29, 0  ;;  %p183_p2 = scmp.eq.s32.totalorder %s1369_s25, 1 }
   0x7   : > { %p188_p3 = scmp.ne.s32.totalorder %s1299_s22, %s1295_s21  ;;  %p189_p4 = scmp.eq.s32.totalorder %s1181_s26, 1 }
   0x8   : > { %s1384_s30 = scalar_select %p170_p1, %s1303_s23, %s172_s28  }
   0x9   : > { %p1386_p5 = por %p183_p2, %p182_p0  ;;  %p1390_p6 = por %p189_p4, %p188_p3 }
   0xa   : > { %p1184_p7 = scmp.ge.s32.totalorder %s1307_s24, 1  ;;  %p249_p8 = scmp.lt.s32.totalorder %s1307_s24, 3 }
   0xc   : > { %p250_p9 = pnand %p1184_p7, %p249_p8 }
   0xd   : > { %s1186_s9 = sshll.u32 (!%p250_p9), %s1369_s25, 5  ;;  %s1309_s14 = smov (!%p250_p9), 8  }
   0xe   : > { %253 = sbr.rel (%p250_p9) target bundleno = 398 (0x18e), region = 44  ;;  %p295_p10 = scmp.lt.s32.totalorder (!%p250_p9), %s1186_s9, 63 }
   0xf   : > { %s1310_s18 = smov (!%p250_p9), 16   ;;  %s1311_s11 = smov (!%p250_p9), 24  }
  0x10   : > { %s1199_s19 = sshll.u32 (!%p250_p9), %s1369_s25, 8  ;;  %s1265_s16 = scalar_lea.hbm (!%p250_p9), %s2119_s6, 512 }
  0x11   : > { %s1079_s28 = scalar_lea.hbm (!%p250_p9), %s2119_s6, %s1199_s19 }
  0x12   : > { %s1082_s29 = sshll.u32 (!%p250_p9), %s1079_s28, 4  ;;  %s1083_s29 = int_to_ptr.hbm [resolvable:$true] %s1082_s29 }
  0x13   : > { %s2127_s9 = smov (!%p295_p10, %s1186_s9), 63  ;;  %vm831_vm0 = vcmask 64512   ;;  %vm864_vm1 = vcmask 130048   ;;  %vm897_vm2 = vcmask 195584   ;;  %vm1034_vm3 = vcmask 261120  }
  0x14   : > { %s1397_s10 = sshll.u32 %s2127_s9, 3 }
  0x15   : > { %s1403_s13 = scalar_lea.vmem %s2114_s1, %s1397_s10  ;;  %s1469_s17 = scalar_lea.vmem %s2115_s2, %s1397_s10 }
  0x16   : > { %v355_v0 = vld [vmem:[%s1403_s13 + $0x20] sm:$0xff]  ;;  %v353_v1 = vld [vmem:[%s1403_s13 + $0x10] sm:$0xff]  ;;  %v356_v3 = vld [vmem:[%s1403_s13 + $0x28] sm:$0xff]  ;;  %s1587_s26 = scalar_lea.vmem %s2116_s3, %s1397_s10  ;;  %s1595_s9 = scalar_lea.vmem %s2113_s0, %s1397_s10 }
  0x17   : > { %v351_v2 = vld [vmem:[%s1403_s13] sm:$0xff]  ;;  %487 = vrot.lane.b32.xlu2 %v355_v0, %s1309_s14  ;;  %483 = vrot.lane.b32.xlu1 %v353_v1, %s1309_s14  ;;  %v354_v4 = vld [vmem:[%s1403_s13 + $0x18] sm:$0xff] }
  0x18   : > { %479 = vrot.lane.b32.xlu0 %v351_v2, %s1309_s14  ;;  %v352_v5 = vld [vmem:[%s1403_s13 + $0x8] sm:$0xff]  ;;  %v359_v6 = vld [vmem:[%s1403_s13 + $0x40] sm:$0xff]  ;;  %v358_v7 = vld [vmem:[%s1403_s13 + $0x38] sm:$0xff] }
  0x19   : > { %v357_v8 = vld [vmem:[%s1403_s13 + $0x30] sm:$0xff]  ;;  %v362_v9 = vld [vmem:[%s1403_s13 + $0x58] sm:$0xff]  ;;  %v360_v11 = vld [vmem:[%s1403_s13 + $0x48] sm:$0xff] }
  0x1a   : > { %v361_v10 = vld [vmem:[%s1403_s13 + $0x50] sm:$0xff]  ;;  %v364_v13 = vld [vmem:[%s1403_s13 + $0x68] sm:$0xff]  ;;  %v363_v14 = vld [vmem:[%s1403_s13 + $0x60] sm:$0xff] }
  0x1b   : > { %v365_v12 = vld [vmem:[%s1403_s13 + $0x70] sm:$0xff]  ;;  %v368_v15 = vld [vmem:[%s1403_s13 + $0x88] sm:$0xff]  ;;  %v367_v16 = vld [vmem:[%s1403_s13 + $0x80] sm:$0xff] }
  0x1c   : > { %v366_v17 = vld [vmem:[%s1403_s13 + $0x78] sm:$0xff]  ;;  %v371_v18 = vld [vmem:[%s1403_s13 + $0xa0] sm:$0xff]  ;;  %v369_v20 = vld [vmem:[%s1403_s13 + $0x90] sm:$0xff] }
  0x1d   : > { %v370_v19 = vld [vmem:[%s1403_s13 + $0x98] sm:$0xff]  ;;  %v373_v22 = vld [vmem:[%s1403_s13 + $0xb0] sm:$0xff]  ;;  %v372_v23 = vld [vmem:[%s1403_s13 + $0xa8] sm:$0xff] }
  0x1e   : > { %v374_v21 = vld [vmem:[%s1403_s13 + $0xb8] sm:$0xff]  ;;  %v377_v24 = vld [vmem:[%s1403_s13 + $0xd0] sm:$0xff]  ;;  %v376_v25 = vld [vmem:[%s1403_s13 + $0xc8] sm:$0xff] }
  0x1f   : > { %489 = vrot.lane.b32.xlu2 %v356_v3, %s1309_s14  ;;  %485 = vrot.lane.b32.xlu1 %v354_v4, %s1309_s14  ;;  %v375_v26 = vld [vmem:[%s1403_s13 + $0xc0] sm:$0xff]  ;;  %v380_v27 = vld [vmem:[%s1403_s13 + $0xe8] sm:$0xff] }
  0x20   : > { %481 = vrot.lane.b32.xlu0 %v352_v5, %s1309_s14  ;;  %v379_v28 = vld [vmem:[%s1403_s13 + $0xe0] sm:$0xff]  ;;  %v378_v29 = vld [vmem:[%s1403_s13 + $0xd8] sm:$0xff]  ;;  %v381_v32 = vld [vmem:[%s1403_s13 + $0xf0] sm:$0xff] }
  0x21   : > { %v383_v30 = vld [vmem:[%s1469_s17] sm:$0xff]  ;;  %v382_v31 = vld [vmem:[%s1403_s13 + $0xf8] sm:$0xff]  ;;  %v385_v34 = vld [vmem:[%s1469_s17 + $0x10] sm:$0xff]  ;;  %s291_s13 = sand.u32 1, %s1299_s22  }
  0x22   : > { %v386_v33 = vld [vmem:[%s1469_s17 + $0x18] sm:$0xff]  ;;  %v384_v35 = vld [vmem:[%s1469_s17 + $0x8] sm:$0xff]  ;;  %v389_v37 = vld [vmem:[%s1469_s17 + $0x30] sm:$0xff] }
  0x23   : > { %v388_v38 = vld [vmem:[%s1469_s17 + $0x28] sm:$0xff]  ;;  %v387_v39 = vld [vmem:[%s1469_s17 + $0x20] sm:$0xff]  ;;  %v390_v43 = vld [vmem:[%s1469_s17 + $0x38] sm:$0xff] }
  0x24   : > { %v392_v41 = vld [vmem:[%s1469_s17 + $0x48] sm:$0xff]  ;;  %v391_v42 = vld [vmem:[%s1469_s17 + $0x40] sm:$0xff]  ;;  %v394_v46 = vld [vmem:[%s1469_s17 + $0x58] sm:$0xff] }
  0x25   : > { %v395_v45 = vld [vmem:[%s1469_s17 + $0x60] sm:$0xff]  ;;  %v393_v47 = vld [vmem:[%s1469_s17 + $0x50] sm:$0xff]  ;;  %v398_v51 = vld [vmem:[%s1469_s17 + $0x78] sm:$0xff] }
  0x26   : > { %v397_v52 = vld [vmem:[%s1469_s17 + $0x70] sm:$0xff]  ;;  %v396_v53 = vld [vmem:[%s1469_s17 + $0x68] sm:$0xff]  ;;  %v399_v59 = vld [vmem:[%s1469_s17 + $0x80] sm:$0xff] }
  0x27   : > { %495 = vrot.lane.b32.xlu2 %v359_v6, %s1309_s14  ;;  %493 = vrot.lane.b32.xlu1 %v358_v7, %s1309_s14  ;;  %v401_v57 = vld [vmem:[%s1469_s17 + $0x90] sm:$0xff]  ;;  %v400_v58 = vld [vmem:[%s1469_s17 + $0x88] sm:$0xff] }
  0x28   : > { %491 = vrot.lane.b32.xlu0 %v357_v8, %s1309_s14  ;;  %v404_v63 = vld [vmem:[%s1469_s17 + $0xa8] sm:$0xff]  ;;  %v403_v0 = vld [vmem:[%s1469_s17 + $0xa0] sm:$0xff]  ;;  %v402_v1 = vld [vmem:[%s1469_s17 + $0x98] sm:$0xff] }
  0x29   : > { %v407_v5 = vld [vmem:[%s1469_s17 + $0xc0] sm:$0xff]  ;;  %v406_v6 = vld [vmem:[%s1469_s17 + $0xb8] sm:$0xff]  ;;  %v405_v7 = vld [vmem:[%s1469_s17 + $0xb0] sm:$0xff] }
  0x2f   : > { %501 = vrot.lane.b32.xlu2 %v362_v9, %s1309_s14  ;;  %499 = vrot.lane.b32.xlu1 %v361_v10, %s1309_s14 }
  0x30   : > { %497 = vrot.lane.b32.xlu0 %v360_v11, %s1309_s14  ;;  %v410_v11 = vld [vmem:[%s1469_s17 + $0xd8] sm:$0xff] }
  0x37   : > { %507 = vrot.lane.b32.xlu2 %v365_v12, %s1309_s14  ;;  %505 = vrot.lane.b32.xlu1 %v364_v13, %s1309_s14  ;;  %v409_v12 = vld [vmem:[%s1469_s17 + $0xd0] sm:$0xff]  ;;  %v408_v13 = vld [vmem:[%s1469_s17 + $0xc8] sm:$0xff] }
  0x38   : > { %503 = vrot.lane.b32.xlu0 %v363_v14, %s1309_s14 }
  0x3f   : > { %513 = vrot.lane.b32.xlu2 %v368_v15, %s1309_s14  ;;  %511 = vrot.lane.b32.xlu1 %v367_v16, %s1309_s14 }
  0x40   : > { %509 = vrot.lane.b32.xlu0 %v366_v17, %s1309_s14  ;;  %v413_v17 = vld [vmem:[%s1469_s17 + $0xf0] sm:$0xff] }
  0x47   : > { %519 = vrot.lane.b32.xlu2 %v371_v18, %s1309_s14  ;;  %517 = vrot.lane.b32.xlu1 %v370_v19, %s1309_s14  ;;  %v412_v18 = vld [vmem:[%s1469_s17 + $0xe8] sm:$0xff]  ;;  %v411_v19 = vld [vmem:[%s1469_s17 + $0xe0] sm:$0xff] }
  0x48   : > { %515 = vrot.lane.b32.xlu0 %v369_v20, %s1309_s14 }
  0x4f   : > { %525 = vrot.lane.b32.xlu2 %v374_v21, %s1309_s14  ;;  %523 = vrot.lane.b32.xlu1 %v373_v22, %s1309_s14 }
  0x50   : > { %521 = vrot.lane.b32.xlu0 %v372_v23, %s1309_s14  ;;  %v416_v23 = vld [vmem:[%s1587_s26 + $0x8] sm:$0xff] }
  0x57   : > { %531 = vrot.lane.b32.xlu2 %v377_v24, %s1309_s14  ;;  %529 = vrot.lane.b32.xlu1 %v376_v25, %s1309_s14  ;;  %v415_v24 = vld [vmem:[%s1587_s26] sm:$0xff]  ;;  %v414_v25 = vld [vmem:[%s1469_s17 + $0xf8] sm:$0xff]  ;;  %s1185_s17 = sshll.u32 %s291_s13, 8 }
  0x58   : > { %527 = vrot.lane.b32.xlu0 %v375_v26, %s1309_s14  ;;  %v319_v26 = vld [vmem:[%s1595_s9] sm:$0xff] }
  0x5f   : > { %537 = vrot.lane.b32.xlu2 %v380_v27, %s1309_s14  ;;  %535 = vrot.lane.b32.xlu1 %v379_v28, %s1309_s14 }
  0x60   : > { %533 = vrot.lane.b32.xlu0 %v378_v29, %s1309_s14 }
  0x67   : > { %607 = vrot.lane.b32.xlu2 %v383_v30, %s1310_s18  ;;  %541 = vrot.lane.b32.xlu1 %v382_v31, %s1309_s14 }
  0x68   : > { %539 = vrot.lane.b32.xlu0 %v381_v32, %s1309_s14  ;;  %v419_v32 = vld [vmem:[%s1587_s26 + $0x20] sm:$0xff] }
  0x6f   : > { %613 = vrot.lane.b32.xlu2 %v386_v33, %s1310_s18  ;;  %611 = vrot.lane.b32.xlu1 %v385_v34, %s1310_s18  ;;  %v418_v33 = vld [vmem:[%s1587_s26 + $0x18] sm:$0xff]  ;;  %v417_v34 = vld [vmem:[%s1587_s26 + $0x10] sm:$0xff] }
  0x70   : > { %609 = vrot.lane.b32.xlu0 %v384_v35, %s1310_s18  ;;  %v322_v35 = vld [vmem:[%s1595_s9 + $0x18] sm:$0xff] }
  0x71   : > { %v1483_v36 = vpop.permute.xlu2 %487 }
  0x77   : > { %619 = vrot.lane.b32.xlu2 %v389_v37, %s1310_s18  ;;  %617 = vrot.lane.b32.xlu1 %v388_v38, %s1310_s18 }
  0x78   : > { %615 = vrot.lane.b32.xlu0 %v387_v39, %s1310_s18 }
  0x79   : > { %v1491_v40 = vpop.permute.xlu2 %489 }
  0x7f   : > { %625 = vrot.lane.b32.xlu2 %v392_v41, %s1310_s18  ;;  %623 = vrot.lane.b32.xlu1 %v391_v42, %s1310_s18 }
  0x80   : > { %621 = vrot.lane.b32.xlu0 %v390_v43, %s1310_s18  ;;  %v422_v43 = vld [vmem:[%s1587_s26 + $0x38] sm:$0xff] }
  0x81   : > { %v1499_v44 = vpop.permute.xlu2 %495 }
  0x87   : > { %631 = vrot.lane.b32.xlu2 %v395_v45, %s1310_s18  ;;  %629 = vrot.lane.b32.xlu1 %v394_v46, %s1310_s18  ;;  %v421_v45 = vld [vmem:[%s1587_s26 + $0x30] sm:$0xff]  ;;  %v420_v46 = vld [vmem:[%s1587_s26 + $0x28] sm:$0xff] }
  0x88   : > { %627 = vrot.lane.b32.xlu0 %v393_v47, %s1310_s18  ;;  %v325_v47 = vld [vmem:[%s1595_s9 + $0x30] sm:$0xff] }
  0x89   : > { %v1507_v48 = vpop.permute.xlu2 %501  ;;  %v1509_v49 = vpop.permute.xlu1 %483 }
  0x8a   : > { %v1511_v50 = vpop.permute.xlu0 %479 }
  0x8b   : > { %v832_v27 = vsel %vm831_vm0, %v319_v26, %v1511_v50 }
  0x8f   : > { %637 = vrot.lane.b32.xlu2 %v398_v51, %s1310_s18  ;;  %635 = vrot.lane.b32.xlu1 %v397_v52, %s1310_s18 }
  0x90   : > { %633 = vrot.lane.b32.xlu0 %v396_v53, %s1310_s18 }
  0x91   : > { %v1519_v54 = vpop.permute.xlu2 %507  ;;  %v1521_v55 = vpop.permute.xlu1 %485 }
  0x92   : > { %v1523_v56 = vpop.permute.xlu0 %481  ;;  %v835_v37 = vsel %vm831_vm0, %v322_v35, %v1521_v55 }
  0x97   : > { %643 = vrot.lane.b32.xlu2 %v401_v57, %s1310_s18  ;;  %641 = vrot.lane.b32.xlu1 %v400_v58, %s1310_s18  ;;  %v425_v57 = vld [vmem:[%s1587_s26 + $0x50] sm:$0xff]  ;;  %v424_v58 = vld [vmem:[%s1587_s26 + $0x48] sm:$0xff] }
  0x98   : > { %639 = vrot.lane.b32.xlu0 %v399_v59, %s1310_s18  ;;  %v423_v59 = vld [vmem:[%s1587_s26 + $0x40] sm:$0xff] }
  0x99   : > { %v1531_v60 = vpop.permute.xlu2 %513  ;;  %v1533_v61 = vpop.permute.xlu1 %493 }
  0x9a   : > { %v1535_v62 = vpop.permute.xlu0 %491 }
  0x9b   : > { %v838_v50 = vsel %vm831_vm0, %v325_v47, %v1535_v62  ;;  %v433_v47 = vld [vmem:[%s1587_s26 + $0x90] sm:$0xff] }
  0x9f   : > { %649 = vrot.lane.b32.xlu2 %v404_v63, %s1310_s18  ;;  %647 = vrot.lane.b32.xlu1 %v403_v0, %s1310_s18  ;;  %v328_v63 = vld [vmem:[%s1595_s9 + $0x48] sm:$0xff] }
  0xa0   : > { %645 = vrot.lane.b32.xlu0 %v402_v1, %s1310_s18 }
  0xa1   : > { %v1543_v2 = vpop.permute.xlu2 %519  ;;  %v1545_v3 = vpop.permute.xlu1 %499 }
  0xa2   : > { %v1547_v4 = vpop.permute.xlu0 %497 }
  0xa3   : > { %v841_v62 = vsel %vm831_vm0, %v328_v63, %v1547_v4 }
  0xa7   : > { %655 = vrot.lane.b32.xlu2 %v407_v5, %s1310_s18  ;;  %653 = vrot.lane.b32.xlu1 %v406_v6, %s1310_s18 }
  0xa8   : > { %651 = vrot.lane.b32.xlu0 %v405_v7, %s1310_s18  ;;  %v428_v7 = vld [vmem:[%s1587_s26 + $0x68] sm:$0xff] }
  0xa9   : > { %v1555_v8 = vpop.permute.xlu2 %525  ;;  %v1557_v9 = vpop.permute.xlu1 %505 }
  0xaa   : > { %v1559_v10 = vpop.permute.xlu0 %503 }
  0xaf   : > { %661 = vrot.lane.b32.xlu2 %v410_v11, %s1310_s18  ;;  %659 = vrot.lane.b32.xlu1 %v409_v12, %s1310_s18  ;;  %v427_v11 = vld [vmem:[%s1587_s26 + $0x60] sm:$0xff]  ;;  %v426_v12 = vld [vmem:[%s1587_s26 + $0x58] sm:$0xff] }
  0xb0   : > { %657 = vrot.lane.b32.xlu0 %v408_v13, %s1310_s18  ;;  %v321_v13 = vld [vmem:[%s1595_s9 + $0x10] sm:$0xff] }
  0xb1   : > { %v1567_v14 = vpop.permute.xlu2 %531  ;;  %v1569_v15 = vpop.permute.xlu1 %511  ;;  %v834_v4 = vsel %vm831_vm0, %v321_v13, %v1509_v49  ;;  %v324_v49 = vld [vmem:[%s1595_s9 + $0x28] sm:$0xff] }
  0xb2   : > { %v1571_v16 = vpop.permute.xlu0 %509 }
  0xb7   : > { %667 = vrot.lane.b32.xlu2 %v413_v17, %s1310_s18  ;;  %665 = vrot.lane.b32.xlu1 %v412_v18, %s1310_s18  ;;  %v331_v17 = vld [vmem:[%s1595_s9 + $0x60] sm:$0xff] }
  0xb8   : > { %663 = vrot.lane.b32.xlu0 %v411_v19, %s1310_s18  ;;  %v844_v18 = vsel %vm831_vm0, %v331_v17, %v1559_v10  ;;  %v334_v10 = vld [vmem:[%s1595_s9 + $0x78] sm:$0xff] }
  0xb9   : > { %v1579_v20 = vpop.permute.xlu2 %537  ;;  %v1581_v21 = vpop.permute.xlu1 %517 }
  0xba   : > { %v1589_v22 = vpop.permute.xlu0 %515 }
  0xbf   : > { %737 = vrot.lane.b32.xlu2 %v416_v23, %s1311_s11  ;;  %735 = vrot.lane.b32.xlu1 %v415_v24, %s1311_s11 }
  0xc0   : > { %669 = vrot.lane.b32.xlu0 %v414_v25, %s1310_s18  ;;  %s1838_s18 = scalar_lea.vmem [#allocation2], %s1185_s17 }
  0xc1   : > { %v608_v28 = vpop.permute.xlu2 %607  ;;  %v1606_v29 = vpop.permute.xlu1 %523  ;;  %s1080_s25 = sshll.u32 %s1838_s18, 4  ;;  %s1081_s25 = int_to_ptr.vmem [resolvable:$true] %s1080_s25 }
  0xc2   : > { %v1609_v30 = vsel %vm864_vm1, %v832_v27, %v608_v28  ;;  %v1611_v31 = vpop.permute.xlu0 %521  ;;  %v431_v27 = vld [vmem:[%s1587_s26 + $0x80] sm:$0xff]  ;;  %v430_v28 = vld [vmem:[%s1587_s26 + $0x78] sm:$0xff] }
  0xc7   : > { %743 = vrot.lane.b32.xlu2 %v419_v32, %s1311_s11  ;;  %741 = vrot.lane.b32.xlu1 %v418_v33, %s1311_s11  ;;  %v429_v32 = vld [vmem:[%s1587_s26 + $0x70] sm:$0xff]  ;;  %v837_v33 = vsel %vm831_vm0, %v324_v49, %v1491_v40  ;;  %v327_v40 = vld [vmem:[%s1595_s9 + $0x40] sm:$0xff] }
  0xc8   : > { %739 = vrot.lane.b32.xlu0 %v417_v34, %s1311_s11  ;;  %v847_v34 = vsel %vm831_vm0, %v334_v10, %v1571_v16  ;;  %v337_v16 = vld [vmem:[%s1595_s9 + $0x90] sm:$0xff]  ;;  %v438_v49 = vld [vmem:[%s1587_s26 + $0xb8] sm:$0xff] }
  0xc9   : > { %v614_v38 = vpop.permute.xlu2 %613  ;;  %v1622_v39 = vpop.permute.xlu1 %529 }
  0xca   : > { %v1625_v41 = vsel %vm864_vm1, %v835_v37, %v614_v38  ;;  %v1627_v42 = vpop.permute.xlu0 %527 }
  0xcf   : > { %749 = vrot.lane.b32.xlu2 %v422_v43, %s1311_s11  ;;  %747 = vrot.lane.b32.xlu1 %v421_v45, %s1311_s11 }
  0xd0   : > { %745 = vrot.lane.b32.xlu0 %v420_v46, %s1311_s11  ;;  %v434_v46 = vld [vmem:[%s1587_s26 + $0x98] sm:$0xff] }
  0xd1   : > { %v620_v51 = vpop.permute.xlu2 %619  ;;  %v1638_v52 = vpop.permute.xlu1 %535 }
  0xd2   : > { %v1641_v53 = vsel %vm864_vm1, %v838_v50, %v620_v51  ;;  %v1643_v55 = vpop.permute.xlu0 %533  ;;  %v432_v50 = vld [vmem:[%s1587_s26 + $0x88] sm:$0xff]  ;;  %v840_v51 = vsel %vm831_vm0, %v327_v40, %v1499_v44  ;;  %v330_v44 = vld [vmem:[%s1595_s9 + $0x58] sm:$0xff] }
  0xd3   : > { %v843_v13 = vsel %vm831_vm0, %v330_v44, %v1507_v48  ;;  %v333_v48 = vld [vmem:[%s1595_s9 + $0x70] sm:$0xff]  ;;  %v442_v40 = vld [vmem:[%s1587_s26 + $0xd8] sm:$0xff] }
  0xd4   : > { %v846_v10 = vsel %vm831_vm0, %v333_v48, %v1519_v54  ;;  %v336_v54 = vld [vmem:[%s1595_s9 + $0x88] sm:$0xff]  ;;  %v446_v44 = vld [vmem:[%s1587_s26 + $0xf8] sm:$0xff] }
  0xd7   : > { %755 = vrot.lane.b32.xlu2 %v425_v57, %s1311_s11  ;;  %753 = vrot.lane.b32.xlu1 %v424_v58, %s1311_s11  ;;  %v850_v57 = vsel %vm831_vm0, %v337_v16, %v1589_v22  ;;  %v340_v22 = vld [vmem:[%s1595_s9 + $0xa8] sm:$0xff]  ;;  %v441_v16 = vld [vmem:[%s1587_s26 + $0xd0] sm:$0xff] }
  0xd8   : > { %751 = vrot.lane.b32.xlu0 %v423_v59, %s1311_s11  ;;  %v853_v17 = vsel %vm831_vm0, %v340_v22, %v1611_v31  ;;  %v343_v31 = vld [vmem:[%s1595_s9 + $0xc0] sm:$0xff]  ;;  %v445_v22 = vld [vmem:[%s1587_s26 + $0xf0] sm:$0xff] }
  0xd9   : > { %v626_v0 = vpop.permute.xlu2 %625  ;;  %v1654_v1 = vpop.permute.xlu1 %541 }
  0xda   : > { %v1657_v5 = vsel %vm864_vm1, %v841_v62, %v626_v0  ;;  %v1659_v6 = vpop.permute.xlu0 %539 }
  0xdf   : > { %761 = vrot.lane.b32.xlu2 %v428_v7, %s1311_s11  ;;  %759 = vrot.lane.b32.xlu1 %v427_v11, %s1311_s11  ;;  %v437_v7 = vld [vmem:[%s1587_s26 + $0xb0] sm:$0xff]  ;;  %v436_v11 = vld [vmem:[%s1587_s26 + $0xa8] sm:$0xff] }
  0xe0   : > { %757 = vrot.lane.b32.xlu0 %v426_v12, %s1311_s11  ;;  %v435_v12 = vld [vmem:[%s1587_s26 + $0xa0] sm:$0xff] }
  0xe1   : > { %v632_v19 = vpop.permute.xlu2 %631  ;;  %v612_v23 = vpop.permute.xlu1 %611 }
  0xe2   : > { %v1674_v24 = vsel %vm864_vm1, %v844_v18, %v632_v19  ;;  %v1677_v25 = vsel %vm864_vm1, %v834_v4, %v612_v23  ;;  %v1679_v26 = vpop.permute.xlu0 %609 }
  0xe7   : > { %767 = vrot.lane.b32.xlu2 %v431_v27, %s1311_s11  ;;  %765 = vrot.lane.b32.xlu1 %v430_v28, %s1311_s11  ;;  %v440_v28 = vld [vmem:[%s1587_s26 + $0xc8] sm:$0xff] }
  0xe8   : > { %763 = vrot.lane.b32.xlu0 %v429_v32, %s1311_s11  ;;  %v439_v32 = vld [vmem:[%s1587_s26 + $0xc0] sm:$0xff] }
  0xe9   : > { %v638_v35 = vpop.permute.xlu2 %637  ;;  %v618_v37 = vpop.permute.xlu1 %617 }
  0xea   : > { %v1694_v38 = vsel %vm864_vm1, %v847_v34, %v638_v35  ;;  %v1697_v43 = vsel %vm864_vm1, %v837_v33, %v618_v37  ;;  %v1699_v45 = vpop.permute.xlu0 %615  ;;  %v856_v33 = vsel %vm831_vm0, %v343_v31, %v1627_v42  ;;  %v346_v42 = vld [vmem:[%s1595_s9 + $0xd8] sm:$0xff]  ;;  %v320_v31 = vld [vmem:[%s1595_s9 + $0x8] sm:$0xff] }
  0xef   : > { %773 = vrot.lane.b32.xlu2 %v434_v46, %s1311_s11  ;;  %771 = vrot.lane.b32.xlu1 %v433_v47, %s1311_s11 }
  0xf0   : > { %769 = vrot.lane.b32.xlu0 %v432_v50, %s1311_s11  ;;  %v443_v50 = vld [vmem:[%s1587_s26 + $0xe0] sm:$0xff] }
  0xf1   : > { %v644_v58 = vpop.permute.xlu2 %643  ;;  %v624_v59 = vpop.permute.xlu1 %623 }
  0xf2   : > { %v1714_v63 = vsel %vm864_vm1, %v850_v57, %v644_v58  ;;  %v1717_v62 = vsel %vm864_vm1, %v840_v51, %v624_v59  ;;  %v1719_v0 = vpop.permute.xlu0 %621  ;;  %v849_v51 = vsel %vm831_vm0, %v336_v54, %v1531_v60  ;;  %v859_v57 = vsel %vm831_vm0, %v346_v42, %v1643_v55  ;;  %v349_v60 = vld [vmem:[%s1595_s9 + $0xf0] sm:$0xff]  ;;  %v323_v42 = vld [vmem:[%s1595_s9 + $0x20] sm:$0xff] }
  0xf7   : > { %779 = vrot.lane.b32.xlu2 %v437_v7, %s1311_s11  ;;  %777 = vrot.lane.b32.xlu1 %v436_v11, %s1311_s11 }
  0xf8   : > { %775 = vrot.lane.b32.xlu0 %v435_v12, %s1311_s11 }
  0xf9   : > { %v650_v4 = vpop.permute.xlu2 %649  ;;  %v630_v18 = vpop.permute.xlu1 %629 }
  0xfa   : > { %v1734_v19 = vsel %vm864_vm1, %v853_v17, %v650_v4  ;;  %v1737_v23 = vsel %vm864_vm1, %v843_v13, %v630_v18  ;;  %v1739_v27 = vpop.permute.xlu0 %627  ;;  %v444_v13 = vld [vmem:[%s1587_s26 + $0xe8] sm:$0xff]  ;;  %v339_v17 = vld [vmem:[%s1595_s9 + $0xa0] sm:$0xff]  ;;  %v862_v4 = vsel %vm831_vm0, %v349_v60, %v1659_v6  ;;  %v833_v6 = vsel %vm831_vm0, %v320_v31, %v1523_v56 }
  0xfb   : > { %v852_v55 = vsel %vm831_vm0, %v339_v17, %v1543_v2  ;;  %v1806_v2 = vld [vmem:[%s2117_s4] ss:$0 sm:$0xff] }
  0xff   : > { %785 = vrot.lane.b32.xlu2 %v440_v28, %s1311_s11  ;;  %783 = vrot.lane.b32.xlu1 %v439_v32, %s1311_s11 }
 0x100   : > { %781 = vrot.lane.b32.xlu0 %v438_v49, %s1311_s11 }
 0x101   : > { %v656_v34 = vpop.permute.xlu2 %655  ;;  %v636_v35 = vpop.permute.xlu1 %635 }
 0x102   : > { %v1754_v37 = vsel %vm864_vm1, %v856_v33, %v656_v34  ;;  %v1757_v46 = vsel %vm864_vm1, %v846_v10, %v636_v35  ;;  %v1759_v47 = vpop.permute.xlu0 %633  ;;  %v342_v10 = vld [vmem:[%s1595_s9 + $0xb8] sm:$0xff]  ;;  %v866_v34 = vsel %vm864_vm1, %v833_v6, %v1679_v26  ;;  %v1818_v35 = vld [vmem:[%s2118_s5] ss:$0 sm:$0xff] }
 0x103   : > { %v855_v33 = vsel %vm831_vm0, %v342_v10, %v1555_v8 }
 0x107   : > { %791 = vrot.lane.b32.xlu2 %v443_v50, %s1311_s11  ;;  %789 = vrot.lane.b32.xlu1 %v442_v40, %s1311_s11 }
 0x108   : > { %787 = vrot.lane.b32.xlu0 %v441_v16, %s1311_s11 }
 0x109   : > { %v662_v58 = vpop.permute.xlu2 %661  ;;  %v642_v59 = vpop.permute.xlu1 %641 }
 0x10a   : > { %v1774_v7 = vsel %vm864_vm1, %v859_v57, %v662_v58  ;;  %v1777_v11 = vsel %vm864_vm1, %v849_v51, %v642_v59  ;;  %v1779_v12 = vpop.permute.xlu0 %639  ;;  %v345_v51 = vld [vmem:[%s1595_s9 + $0xd0] sm:$0xff]  ;;  %v836_v58 = vsel %vm831_vm0, %v323_v42, %v1483_v36 }
 0x10b   : > { %v858_v59 = vsel %vm831_vm0, %v345_v51, %v1567_v14 }
 0x10f   : > { %797 = vrot.lane.b32.xlu2 %v446_v44, %s1311_s11  ;;  %795 = vrot.lane.b32.xlu1 %v445_v22, %s1311_s11  ;;  %v869_v44 = vsel %vm864_vm1, %v836_v58, %v1699_v45 }
 0x110   : > { %793 = vrot.lane.b32.xlu0 %v444_v13, %s1311_s11  ;;  %s1259_s11 = sshra.s32 %s1083_s29, 4  ;;  %s1260_s11 = int_to_ptr.hbm [resolvable:$true] %s1259_s11 }
 0x111   : > { %v668_v18 = vpop.permute.xlu2 %667  ;;  %v648_v28 = vpop.permute.xlu1 %647  ;;  %s1261_s10 = scalar_lea.hbm %s1260_s11, 256  ;;  %p1266_p0 = scmp.lt.s32.totalorder %s1260_s11, %s2119_s6 }
 0x112   : > { %v1794_v32 = vsel %vm864_vm1, %v862_v4, %v668_v18  ;;  %v1797_v49 = vsel %vm864_vm1, %v852_v55, %v648_v28  ;;  %v1799_v48 = vpop.permute.xlu0 %645  ;;  %v326_v55 = vld [vmem:[%s1595_s9 + $0x38] sm:$0xff]  ;;  %v348_v4 = vld [vmem:[%s1595_s9 + $0xe8] sm:$0xff]  ;;  %p1262_p11 = scmp.ne.s32.totalorder %s1260_s11, %s1261_s10  ;;  %p1267_p1 = scmp.lt.s32.totalorder %s1265_s16, %s1261_s10 }
 0x113   : > { %v839_v28 = vsel %vm831_vm0, %v326_v55, %v1533_v61  ;;  %v861_v31 = vsel %vm831_vm0, %v348_v4, %v1579_v20 }
 0x114   : > { %v872_v10 = vsel %vm864_vm1, %v839_v28, %v1719_v0  ;;  %p1263_p12 = pnand %p1262_p11, %p1386_p5  ;;  %p1268_p2 = por %p1267_p1, %p1266_p0 }
 0x116   : > { %p1264_p13 = pneg %p1263_p12 }
 0x118   : > { %p1269_p3 = pnand %p1268_p2, %p1264_p13 }
 0x119   : > { %v738_v50 = vpop.permute.xlu2 %737  ;;  %v654_v40 = vpop.permute.xlu1 %653 }
 0x11a   : > { %v899_v16 = vsel %vm897_vm2, %v866_v34, %v738_v50  ;;  %v1822_v54 = vsel %vm864_vm1, %v855_v33, %v654_v40  ;;  %v1824_v56 = vpop.permute.xlu0 %651 }
 0x11b   : > { %v935_v8 = vmul.f32 %v1806_v2, %v899_v16  ;;  %v329_v16 = vld [vmem:[%s1595_s9 + $0x50] sm:$0xff] }
 0x11c   : > { %v842_v0 = vsel %vm831_vm0, %v329_v16, %v1545_v3 }
 0x11d   : > { %v971_v26 = vadd.f32 %v1818_v35, %v935_v8  ;;  %v875_v42 = vsel %vm864_vm1, %v842_v0, %v1739_v27 }
 0x11f   : > { %v1003_v57 = vmax.f32 %v971_v26, 0.0 }
 0x121   : > { %1036 = vst.msk [vmem:[%s1838_s18 + $0x8] sm:$0xff] %vm1034_vm3, %v1003_v57  ;;  %v744_v22 = vpop.permute.xlu2 %743  ;;  %v660_v13 = vpop.permute.xlu1 %659 }
 0x122   : > { %v902_v17 = vsel %vm897_vm2, %v869_v44, %v744_v22  ;;  %v1844_v60 = vsel %vm864_vm1, %v858_v59, %v660_v13  ;;  %v1846_v36 = vpop.permute.xlu0 %657  ;;  %v332_v22 = vld [vmem:[%s1595_s9 + $0x68] sm:$0xff] }
 0x123   : > { %v938_v14 = vmul.f32 %v1806_v2, %v902_v17  ;;  %v845_v55 = vsel %vm831_vm0, %v332_v22, %v1557_v9  ;;  %v338_v22 = vld [vmem:[%s1595_s9 + $0x98] sm:$0xff] }
 0x125   : > { %v974_v45 = vadd.f32 %v1818_v35, %v938_v14 }
 0x127   : > { %v1006_v18 = vmax.f32 %v974_v45, 0.0 }
 0x129   : > { %1039 = vst.msk [vmem:[%s1838_s18 + $0x20] sm:$0xff] %vm1034_vm3, %v1006_v18  ;;  %v750_v6 = vpop.permute.xlu2 %749  ;;  %v666_v33 = vpop.permute.xlu1 %665 }
 0x12a   : > { %v905_v34 = vsel %vm897_vm2, %v872_v10, %v750_v6  ;;  %v1862_v50 = vsel %vm864_vm1, %v861_v31, %v666_v33  ;;  %v1864_v40 = vpop.permute.xlu0 %663  ;;  %v335_v33 = vld [vmem:[%s1595_s9 + $0x80] sm:$0xff] }
 0x12b   : > { %v941_v61 = vmul.f32 %v1806_v2, %v905_v34 }
 0x12d   : > { %v977_v20 = vadd.f32 %v1818_v35, %v941_v61 }
 0x12f   : > { %v1009_v8 = vmax.f32 %v977_v20, 0.0 }
 0x131   : > { %1042 = vst.msk [vmem:[%s1838_s18 + $0x38] sm:$0xff] %vm1034_vm3, %v1009_v8  ;;  %v756_v26 = vpop.permute.xlu2 %755  ;;  %v736_v51 = vpop.permute.xlu1 %735  ;;  %v848_v8 = vsel %vm831_vm0, %v335_v33, %v1569_v15 }
 0x132   : > { %v908_v57 = vsel %vm897_vm2, %v875_v42, %v756_v26  ;;  %v898_v58 = vsel %vm897_vm2, %v1609_v30, %v736_v51  ;;  %v1878_v59 = vpop.permute.xlu0 %669  ;;  %v878_v30 = vsel %vm864_vm1, %v845_v55, %v1759_v47  ;;  %v851_v55 = vsel %vm831_vm0, %v338_v22, %v1581_v21 }
 0x133   : > { %v944_v44 = vmul.f32 %v1806_v2, %v908_v57  ;;  %v934_v3 = vmul.f32 %v1806_v2, %v898_v58 }
 0x135   : > { %v980_v27 = vadd.f32 %v1818_v35, %v944_v44  ;;  %v970_v13 = vadd.f32 %v1818_v35, %v934_v3 }
 0x137   : > { %v1012_v17 = vmax.f32 %v980_v27, 0.0  ;;  %v1002_v14 = vmax.f32 %v970_v13, 0.0 }
 0x139   : > { %1045 = vst.msk [vmem:[%s1838_s18 + $0x50] sm:$0xff] %vm1034_vm3, %v1012_v17  ;;  %v762_v45 = vpop.permute.xlu2 %761  ;;  %v742_v4 = vpop.permute.xlu1 %741 }
 0x13a   : > { %1035 = vst.msk [vmem:[%s1838_s18] sm:$0xff] %vm1034_vm3, %v1002_v14  ;;  %v911_v18 = vsel %vm897_vm2, %v878_v30, %v762_v45  ;;  %v901_v28 = vsel %vm897_vm2, %v1625_v41, %v742_v4  ;;  %v740_v31 = vpop.permute.xlu0 %739 }
 0x13b   : > { %v947_v10 = vmul.f32 %v1806_v2, %v911_v18  ;;  %v937_v9 = vmul.f32 %v1806_v2, %v901_v28  ;;  %v900_v47 = vsel %vm897_vm2, %v1677_v25, %v740_v31  ;;  %v881_v25 = vsel %vm864_vm1, %v848_v8, %v1779_v12 }
 0x13c   : > { %v936_v6 = vmul.f32 %v1806_v2, %v900_v47  ;;  %v341_v47 = vld [vmem:[%s1595_s9 + $0xb0] sm:$0xff] }
 0x13d   : > { %v983_v34 = vadd.f32 %v1818_v35, %v947_v10  ;;  %v973_v61 = vadd.f32 %v1818_v35, %v937_v9 }
 0x13e   : > { %v972_v16 = vadd.f32 %v1818_v35, %v936_v6 }
 0x13f   : > { %v1015_v41 = vmax.f32 %v983_v34, 0.0  ;;  %v1005_v20 = vmax.f32 %v973_v61, 0.0 }
 0x140   : > { %v1004_v0 = vmax.f32 %v972_v16, 0.0  ;;  %v854_v16 = vsel %vm831_vm0, %v341_v47, %v1606_v29 }
 0x141   : > { %1048 = vst.msk [vmem:[%s1838_s18 + $0x68] sm:$0xff] %vm1034_vm3, %v1015_v41  ;;  %v768_v42 = vpop.permute.xlu2 %767  ;;  %v748_v26 = vpop.permute.xlu1 %747 }
 0x142   : > { %1038 = vst.msk [vmem:[%s1838_s18 + $0x18] sm:$0xff] %vm1034_vm3, %v1005_v20  ;;  %v914_v51 = vsel %vm897_vm2, %v881_v25, %v768_v42  ;;  %v904_v57 = vsel %vm897_vm2, %v1641_v53, %v748_v26  ;;  %v746_v58 = vpop.permute.xlu0 %745 }
 0x143   : > { %1037 = vst.msk [vmem:[%s1838_s18 + $0x10] sm:$0xff] %vm1034_vm3, %v1004_v0  ;;  %v950_v15 = vmul.f32 %v1806_v2, %v914_v51  ;;  %v940_v12 = vmul.f32 %v1806_v2, %v904_v57  ;;  %v903_v44 = vsel %vm897_vm2, %v1697_v43, %v746_v58  ;;  %v884_v43 = vsel %vm864_vm1, %v851_v55, %v1799_v48  ;;  %v344_v57 = vld [vmem:[%s1595_s9 + $0xc8] sm:$0xff] }
 0x144   : > { %v939_v3 = vmul.f32 %v1806_v2, %v903_v44 }
 0x145   : > { %v986_v27 = vadd.f32 %v1818_v35, %v950_v15  ;;  %v976_v53 = vadd.f32 %v1818_v35, %v940_v12 }
 0x146   : > { %v975_v13 = vadd.f32 %v1818_v35, %v939_v3  ;;  %v857_v3 = vsel %vm831_vm0, %v344_v57, %v1622_v39 }
 0x147   : > { %v1018_v17 = vmax.f32 %v986_v27, 0.0  ;;  %v1008_v14 = vmax.f32 %v976_v53, 0.0 }
 0x148   : > { %v1007_v30 = vmax.f32 %v975_v13, 0.0 }
 0x149   : > { %1051 = vst.msk [vmem:[%s1838_s18 + $0x80] sm:$0xff] %vm1034_vm3, %v1018_v17  ;;  %v774_v45 = vpop.permute.xlu2 %773  ;;  %v754_v4 = vpop.permute.xlu1 %753 }
 0x14a   : > { %1041 = vst.msk [vmem:[%s1838_s18 + $0x30] sm:$0xff] %vm1034_vm3, %v1008_v14  ;;  %v917_v18 = vsel %vm897_vm2, %v884_v43, %v774_v45  ;;  %v907_v28 = vsel %vm897_vm2, %v1657_v5, %v754_v4  ;;  %v752_v31 = vpop.permute.xlu0 %751  ;;  %v347_v43 = vld [vmem:[%s1595_s9 + $0xe0] sm:$0xff] }
 0x14b   : > { %1040 = vst.msk [vmem:[%s1838_s18 + $0x28] sm:$0xff] %vm1034_vm3, %v1007_v30  ;;  %v953_v21 = vmul.f32 %v1806_v2, %v917_v18  ;;  %v943_v48 = vmul.f32 %v1806_v2, %v907_v28  ;;  %v906_v10 = vsel %vm897_vm2, %v1717_v62, %v752_v31  ;;  %v887_v62 = vsel %vm864_vm1, %v854_v16, %v1824_v56 }
 0x14c   : > { %v942_v9 = vmul.f32 %v1806_v2, %v906_v10  ;;  %v860_v31 = vsel %vm831_vm0, %v347_v43, %v1638_v52 }
 0x14d   : > { %v989_v6 = vadd.f32 %v1818_v35, %v953_v21  ;;  %v979_v5 = vadd.f32 %v1818_v35, %v943_v48 }
 0x14e   : > { %v978_v33 = vadd.f32 %v1818_v35, %v942_v9 }
 0x14f   : > { %v1021_v34 = vmax.f32 %v989_v6, 0.0  ;;  %v1011_v61 = vmax.f32 %v979_v5, 0.0 }
 0x150   : > { %v1010_v41 = vmax.f32 %v978_v33, 0.0 }
 0x151   : > { %1054 = vst.msk [vmem:[%s1838_s18 + $0x98] sm:$0xff] %vm1034_vm3, %v1021_v34  ;;  %v780_v20 = vpop.permute.xlu2 %779  ;;  %v760_v8 = vpop.permute.xlu1 %759  ;;  %v350_v34 = vld [vmem:[%s1595_s9 + $0xf8] sm:$0xff]  ;;  %s1068_s9 = scalar_lea.sflag [#allocation3], %s291_s13 }
 0x152   : > { %1044 = vst.msk [vmem:[%s1838_s18 + $0x48] sm:$0xff] %vm1034_vm3, %v1011_v61  ;;  %v920_v0 = vsel %vm897_vm2, %v887_v62, %v780_v20  ;;  %v910_v25 = vsel %vm897_vm2, %v1674_v24, %v760_v8  ;;  %v758_v42 = vpop.permute.xlu0 %757  ;;  %v863_v20 = vsel %vm831_vm0, %v350_v34, %v1654_v1 }
 0x153   : > { %1043 = vst.msk [vmem:[%s1838_s18 + $0x40] sm:$0xff] %vm1034_vm3, %v1010_v41  ;;  %v956_v29 = vmul.f32 %v1806_v2, %v920_v0  ;;  %v946_v56 = vmul.f32 %v1806_v2, %v910_v25  ;;  %v909_v26 = vsel %vm897_vm2, %v1737_v23, %v758_v42  ;;  %v890_v23 = vsel %vm864_vm1, %v857_v3, %v1846_v36 }
 0x154   : > { %v945_v51 = vmul.f32 %v1806_v2, %v909_v26  ;;  %v896_v0 = vsel %vm864_vm1, %v863_v20, %v1878_v59 }
 0x155   : > { %v992_v58 = vadd.f32 %v1818_v35, %v956_v29  ;;  %v982_v24 = vadd.f32 %v1818_v35, %v946_v56 }
 0x156   : > { %v981_v15 = vadd.f32 %v1818_v35, %v945_v51 }
 0x157   : > { %v1024_v12 = vmax.f32 %v992_v58, 0.0  ;;  %v1014_v44 = vmax.f32 %v982_v24, 0.0 }
 0x158   : > { %v1013_v22 = vmax.f32 %v981_v15, 0.0 }
 0x159   : > { %1057 = vst.msk [vmem:[%s1838_s18 + $0xb0] sm:$0xff] %vm1034_vm3, %v1024_v12  ;;  %v786_v27 = vpop.permute.xlu2 %785  ;;  %v766_v53 = vpop.permute.xlu1 %765 }
 0x15a   : > { %1047 = vst.msk [vmem:[%s1838_s18 + $0x60] sm:$0xff] %vm1034_vm3, %v1014_v44  ;;  %v923_v13 = vsel %vm897_vm2, %v890_v23, %v786_v27  ;;  %v913_v17 = vsel %vm897_vm2, %v1694_v38, %v766_v53  ;;  %v764_v14 = vpop.permute.xlu0 %763 }
 0x15b   : > { %1046 = vst.msk [vmem:[%s1838_s18 + $0x58] sm:$0xff] %vm1034_vm3, %v1013_v22  ;;  %v959_v39 = vmul.f32 %v1806_v2, %v923_v13  ;;  %v949_v36 = vmul.f32 %v1806_v2, %v913_v17  ;;  %v912_v55 = vsel %vm897_vm2, %v1757_v46, %v764_v14  ;;  %v893_v46 = vsel %vm864_vm1, %v860_v31, %v1864_v40 }
 0x15c   : > { %v948_v30 = vmul.f32 %v1806_v2, %v912_v55 }
 0x15d   : > { %v995_v45 = vadd.f32 %v1818_v35, %v959_v39  ;;  %v985_v38 = vadd.f32 %v1818_v35, %v949_v36 }
 0x15e   : > { %v984_v4 = vadd.f32 %v1818_v35, %v948_v30 }
 0x15f   : > { %v1027_v18 = vmax.f32 %v995_v45, 0.0  ;;  %v1017_v28 = vmax.f32 %v985_v38, 0.0 }
 0x160   : > { %v1016_v21 = vmax.f32 %v984_v4, 0.0 }
 0x161   : > { %1060 = vst.msk [vmem:[%s1838_s18 + $0xc8] sm:$0xff] %vm1034_vm3, %v1027_v18  ;;  %v792_v48 = vpop.permute.xlu2 %791  ;;  %v772_v10 = vpop.permute.xlu1 %771 }
 0x162   : > { %1050 = vst.msk [vmem:[%s1838_s18 + $0x78] sm:$0xff] %vm1034_vm3, %v1017_v28  ;;  %v926_v9 = vsel %vm897_vm2, %v893_v46, %v792_v48  ;;  %v916_v47 = vsel %vm897_vm2, %v1714_v63, %v772_v10  ;;  %v770_v6 = vpop.permute.xlu0 %769 }
 0x163   : > { %1049 = vst.msk [vmem:[%s1838_s18 + $0x70] sm:$0xff] %vm1034_vm3, %v1016_v21  ;;  %v962_v52 = vmul.f32 %v1806_v2, %v926_v9  ;;  %v952_v40 = vmul.f32 %v1806_v2, %v916_v47  ;;  %v915_v5 = vsel %vm897_vm2, %v1777_v11, %v770_v6 }
 0x164   : > { %v951_v33 = vmul.f32 %v1806_v2, %v915_v5 }
 0x165   : > { %v998_v61 = vadd.f32 %v1818_v35, %v962_v52  ;;  %v988_v63 = vadd.f32 %v1818_v35, %v952_v40 }
 0x166   : > { %v987_v16 = vadd.f32 %v1818_v35, %v951_v33 }
 0x167   : > { %v1030_v41 = vmax.f32 %v998_v61, 0.0  ;;  %v1020_v62 = vmax.f32 %v988_v63, 0.0 }
 0x168   : > { %v1019_v8 = vmax.f32 %v987_v16, 0.0 }
 0x169   : > { %1063 = vst.msk [vmem:[%s1838_s18 + $0xe0] sm:$0xff] %vm1034_vm3, %v1030_v41  ;;  %v798_v11 = vpop.permute.xlu2 %797  ;;  %v778_v25 = vpop.permute.xlu1 %777 }
 0x16a   : > { %1053 = vst.msk [vmem:[%s1838_s18 + $0x90] sm:$0xff] %vm1034_vm3, %v1020_v62  ;;  %v929_v42 = vsel %vm897_vm2, %v896_v0, %v798_v11  ;;  %v919_v29 = vsel %vm897_vm2, %v1734_v19, %v778_v25  ;;  %v776_v56 = vpop.permute.xlu0 %775 }
 0x16b   : > { %1052 = vst.msk [vmem:[%s1838_s18 + $0x88] sm:$0xff] %vm1034_vm3, %v1019_v8  ;;  %v965_v1 = vmul.f32 %v1806_v2, %v929_v42  ;;  %v955_v59 = vmul.f32 %v1806_v2, %v919_v29  ;;  %v918_v26 = vsel %vm897_vm2, %v1797_v49, %v776_v56 }
 0x16c   : > { %v954_v51 = vmul.f32 %v1806_v2, %v918_v26 }
 0x16d   : > { %v1001_v57 = vadd.f32 %v1818_v35, %v965_v1  ;;  %v991_v58 = vadd.f32 %v1818_v35, %v955_v59 }
 0x16e   : > { %v990_v24 = vadd.f32 %v1818_v35, %v954_v51 }
 0x16f   : > { %v1033_v19 = vmax.f32 %v1001_v57, 0.0  ;;  %v1023_v15 = vmax.f32 %v991_v58, 0.0 }
 0x170   : > { %v1022_v12 = vmax.f32 %v990_v24, 0.0 }
 0x171   : > { %1066 = vst.msk [vmem:[%s1838_s18 + $0xf8] sm:$0xff] %vm1034_vm3, %v1033_v19  ;;  %v784_v44 = vpop.permute.xlu1 %783 }
 0x172   : > { %1056 = vst.msk [vmem:[%s1838_s18 + $0xa8] sm:$0xff] %vm1034_vm3, %v1023_v15  ;;  %v922_v49 = vsel %vm897_vm2, %v1754_v37, %v784_v44  ;;  %v782_v3 = vpop.permute.xlu0 %781 }
 0x173   : > { %1055 = vst.msk [vmem:[%s1838_s18 + $0xa0] sm:$0xff] %vm1034_vm3, %v1022_v12  ;;  %v958_v22 = vmul.f32 %v1806_v2, %v922_v49  ;;  %v921_v23 = vsel %vm897_vm2, %v1822_v54, %v782_v3 }
 0x174   : > { %v957_v27 = vmul.f32 %v1806_v2, %v921_v23 }
 0x175   : > { %v994_v53 = vadd.f32 %v1818_v35, %v958_v22 }
 0x176   : > { %v993_v13 = vadd.f32 %v1818_v35, %v957_v27 }
 0x177   : > { %v1026_v17 = vmax.f32 %v994_v53, 0.0 }
 0x178   : > { %v1025_v14 = vmax.f32 %v993_v13, 0.0 }
 0x179   : > { %1059 = vst.msk [vmem:[%s1838_s18 + $0xc0] sm:$0xff] %vm1034_vm3, %v1026_v17  ;;  %v790_v37 = vpop.permute.xlu1 %789 }
 0x17a   : > { %1058 = vst.msk [vmem:[%s1838_s18 + $0xb8] sm:$0xff] %vm1034_vm3, %v1025_v14  ;;  %v925_v39 = vsel %vm897_vm2, %v1774_v7, %v790_v37  ;;  %v788_v54 = vpop.permute.xlu0 %787 }
 0x17b   : > { %v961_v36 = vmul.f32 %v1806_v2, %v925_v39  ;;  %v924_v55 = vsel %vm897_vm2, %v1844_v60, %v788_v54 }
 0x17c   : > { %v960_v30 = vmul.f32 %v1806_v2, %v924_v55 }
 0x17d   : > { %v997_v43 = vadd.f32 %v1818_v35, %v961_v36 }
 0x17e   : > { %v996_v45 = vadd.f32 %v1818_v35, %v960_v30 }
 0x17f   : > { %v1029_v38 = vmax.f32 %v997_v43, 0.0 }
 0x180   : > { %v1028_v4 = vmax.f32 %v996_v45, 0.0 }
 0x181   : > { %1062 = vst.msk [vmem:[%s1838_s18 + $0xd8] sm:$0xff] %vm1034_vm3, %v1029_v38  ;;  %v796_v18 = vpop.permute.xlu1 %795 }
 0x182   : > { %1061 = vst.msk [vmem:[%s1838_s18 + $0xd0] sm:$0xff] %vm1034_vm3, %v1028_v4  ;;  %v928_v7 = vsel %vm897_vm2, %v1794_v32, %v796_v18  ;;  %v794_v60 = vpop.permute.xlu0 %793 }
 0x183   : > { %v964_v28 = vmul.f32 %v1806_v2, %v928_v7  ;;  %v927_v31 = vsel %vm897_vm2, %v1862_v50, %v794_v60 }
 0x184   : > { %v963_v21 = vmul.f32 %v1806_v2, %v927_v31 }
 0x185   : > { %v1000_v46 = vadd.f32 %v1818_v35, %v964_v28 }
 0x186   : > { %v999_v32 = vadd.f32 %v1818_v35, %v963_v21 }
 0x187   : > { %v1032_v48 = vmax.f32 %v1000_v46, 0.0 }
 0x188   : > { %v1031_v10 = vmax.f32 %v999_v32, 0.0 }
 0x189   : > { %1065 = vst.msk [vmem:[%s1838_s18 + $0xf0] sm:$0xff] %vm1034_vm3, %v1032_v48 }
 0x18a   : > { %1064 = vst.msk [vmem:[%s1838_s18 + $0xe8] sm:$0xff] %vm1034_vm3, %v1031_v10 }
 0x18b   : > { %1272 = shalt.err (!%p1269_p3)
}
 0x18c   : > { %s1312_s13 = smov 128  }
 0x18d   : > { %1200 = dma.vmem_to_hbm [thread:$0]  (%p1386_p5), %s1081_s25, 4096, %s1083_s29, %s1068_s9, %s1312_s13, %s1312_s13, %s1309_s14  }
 0x18e PF: > { %p1206_p4 = scmp.ge.s32.totalorder %s1307_s24, 2  ;;  %s1097_s18 = sand.u32 1, %s1295_s21  }
 0x18f   : > { %s1098_s20 = scalar_lea.sflag [#allocation3], %s1097_s18 }
 0x190   : > { %p1203_p7 = pnand %p1206_p4, %p1390_p6 }
 0x192   : > { %p1204_p8 = pneg %p1203_p7 }
 0x194   : > { %1290 = dma.done.wait (%p1204_p8), %s1098_s20, 4096  }
 0x195   : > { %1292 = vsyncadd (%p1204_p8), %s1098_s20, 4294963200  ;;  %p16_p9 = scmp.ge.s32.totalorder %s1373_s27, 4   ;;  %s2122_s21 = smov %s1299_s22 }
 0x196   : > { %s2123_s22 = smov %s1303_s23  ;;  %s2124_s23 = smov %s1384_s30 }
 0x197   : > { %s2125_s24 = smov %s1373_s27  ;;  %18 = sbr.rel (!%p16_p9) target bundleno = 3 (0x3), region = 88 }
 0x19c   :  { %1104 = vsyncpa [#allocation3], 1 }
 0x19d   :  { %1106 = vsyncpa [#allocation3 + $0x1], 1 }

</bundles_post_ra>
